<compile_context>
chip_gen: v5e
topology: v5e:2x2
jax: 0.10.0
libtpu: 0.0.40
codegen_flags: <defaults>
</compile_context>

<pallas_src>
import functools

import jax
import jax.numpy as jnp
from jax import lax
from jax.experimental import pallas as pl
from jax.experimental.pallas import tpu as pltpu

EPS = 1e-5

# GEMM tile caps (balanced tiling below).  Worst-case footprint with these
# caps (double-buffered bf16 inputs + fp32 acc + double-buffered fp32 output)
# stays ~12 MiB, inside the scoped-VMEM defaults on v5e/v6e/v7x.
_TM_CAP = 512
_TN_CAP = 1024
_TK_CAP = 1024


def _cdiv(a, b):
    return (a + b - 1) // b


def _round_up(x, m):
    return _cdiv(x, m) * m


def _tile(dim, cap, align):
    """Balanced tile: full-extent (zero padding) if it fits, else ~cap."""
    if dim <= cap:
        return dim
    return _round_up(_cdiv(dim, _cdiv(dim, cap)), align)


def _apply_act(y, act):
    if act == "leaky_relu":               # nn.LeakyReLU(0.2)
        return jnp.where(y >= 0, y, 0.2 * y)
    if act == "tanh":                     # nn.Tanh
        return jnp.tanh(y)
    return y


# ----------------------------------------------------------------------------
# GEMM kernels:  act((X @ W) + shift)   (block 0 and the final 1x1 conv)
# ----------------------------------------------------------------------------
def _gemm_kernel(x_ref, w_ref, shift_ref, o_ref, *, act):
    # Single K tile: compute straight into the output, no scratch accumulator,
    # no zero-init pass, no acc->out copy.
    y = jnp.dot(x_ref[...], w_ref[...], preferred_element_type=jnp.float32)
    y = _apply_act(y + shift_ref[...], act)
    o_ref[...] = y.astype(o_ref.dtype)


def _gemm_kernel_ksplit(x_ref, w_ref, shift_ref, o_ref, acc_ref, *, act):
    k = pl.program_id(2)

    @pl.when(k == 0)
    def _():
        acc_ref[...] = jnp.zeros_like(acc_ref)

    acc_ref[...] += jnp.dot(x_ref[...], w_ref[...],
                            preferred_element_type=jnp.float32)

    @pl.when(k == pl.num_programs(2) - 1)
    def _():
        y = _apply_act(acc_ref[...] + shift_ref[...], act)
        o_ref[...] = y.astype(o_ref.dtype)


def fused_matmul(x, w, shift, act="none", out_dtype=jnp.float32):
    """act((x @ w) + shift); x:(M,K), w:(K,N), shift:(N,) broadcast over rows."""
    M, K = x.shape
    Kw, N = w.shape
    assert K == Kw

    x = x.astype(jnp.bfloat16)
    w = w.astype(jnp.bfloat16)
    shift = shift.reshape(1, N).astype(jnp.float32)

    n_align = 256 if N >= 256 else 128    # v6e/v7x MXU is 2x 256x256
    k_align = 256 if K >= 256 else 128
    tm = _tile(M, _TM_CAP, 16)
    tn = _tile(N, _TN_CAP, n_align)
    tk = _tile(K, _TK_CAP, k_align)
    Mp, Np, Kp = _round_up(M, tm), _round_up(N, tn), _round_up(K, tk)

    # v7x megacore: keep a parallel grid extent >= 2 when the split is free.
    if Mp // tm == 1 and Np // tn == 1 and tn % (2 * n_align) == 0:
        tn //= 2

    if (Mp, Kp) != (M, K):
        x = jnp.pad(x, ((0, Mp - M), (0, Kp - K)))
    if (Kp, Np) != (K, N):
        w = jnp.pad(w, ((0, Kp - K), (0, Np - N)))
    if Np != N:
        shift = jnp.pad(shift, ((0, 0), (0, Np - N)))

    nk = Kp // tk
    if nk == 1:
        grid = (Mp // tm, Np // tn)
        kernel = functools.partial(_gemm_kernel, act=act)
        in_specs = [
            pl.BlockSpec((tm, tk), lambda i, j: (i, 0)),
            pl.BlockSpec((tk, tn), lambda i, j: (0, j)),
            pl.BlockSpec((1, tn), lambda i, j: (0, j)),
        ]
        out_specs = pl.BlockSpec((tm, tn), lambda i, j: (i, j))
        scratch = []
        dims = ("parallel", "parallel")
    else:
        grid = (Mp // tm, Np // tn, nk)
        kernel = functools.partial(_gemm_kernel_ksplit, act=act)
        in_specs = [
            pl.BlockSpec((tm, tk), lambda i, j, k: (i, k)),
            pl.BlockSpec((tk, tn), lambda i, j, k: (k, j)),
            pl.BlockSpec((1, tn), lambda i, j, k: (0, j)),
        ]
        out_specs = pl.BlockSpec((tm, tn), lambda i, j, k: (i, j))
        scratch = [pltpu.VMEM((tm, tn), jnp.float32)]
        dims = ("parallel", "parallel", "arbitrary")

    out = pl.pallas_call(
        kernel,
        out_shape=jax.ShapeDtypeStruct((Mp, Np), out_dtype),
        grid_spec=pltpu.PrefetchScalarGridSpec(
            num_scalar_prefetch=0,
            grid=grid,
            in_specs=in_specs,
            out_specs=out_specs,
            scratch_shapes=scratch,
        ),
        compiler_params=pltpu.CompilerParams(
            dimension_semantics=dims,
            vmem_limit_bytes=32 * 1024 * 1024,
        ),
    )(x, w, shift)

    if (Mp, Np) != (M, N):
        out = out[:M, :N]
    return out


# ----------------------------------------------------------------------------
# Fully fused ConvTranspose2d(K=4, stride=2, padding=1) + BN shift + LeakyReLU
# via the 2x2 sub-pixel / phase decomposition (see module docstring).
# ----------------------------------------------------------------------------
def _tconv_kernel(x_ref, w_ref, shift_ref, o_ref, xp_ref, *, H, W, Cout):
    # Zero-ring-padded copy of the input plane in VMEM (the ring implements the
    # transposed-conv boundary; it never leaves VMEM).
    xp_ref[...] = jnp.zeros_like(xp_ref)
    xp_ref[1:H + 1, 1:W + 1, :] = x_ref[0]

    shift = shift_ref[...]                            # (1, 2*Cout) f32

    def row_body(m, carry):
        # The 9 shifted (W, Cin) views of the padded plane this row pair needs.
        xs = [[xp_ref[m + a, b:b + W, :] for b in range(3)] for a in range(3)]
        for rh in range(2):                           # output row 2*m + rh
            acc = jnp.zeros((W, 2 * Cout), jnp.float32)
            for dh in range(2):
                a = 1 + rh - dh
                for b in range(3):
                    acc = acc + jnp.dot(xs[a][b], w_ref[rh, dh, b, :, :],
                                        preferred_element_type=jnp.float32)
            acc = _apply_act(acc + shift, "leaky_relu")
            o_ref[0, m, rh, :, :] = acc.astype(o_ref.dtype)
        return carry

    lax.fori_loop(0, H, row_body, 0)


def tconv2x_fused(x, w_pack, shift, cout):
    """x: (B, H, W, Cin) -> (B, 2H, 2W, cout), BN shift + LeakyReLU applied."""
    B, H, W, Cin = x.shape
    x = x.astype(jnp.bfloat16)
    out = pl.pallas_call(
        functools.partial(_tconv_kernel, H=H, W=W, Cout=cout),
        out_shape=jax.ShapeDtypeStruct((B, H, 2, W, 2 * cout), jnp.bfloat16),
        grid_spec=pltpu.PrefetchScalarGridSpec(
            num_scalar_prefetch=0,
            grid=(B,),
            in_specs=[
                pl.BlockSpec((1, H, W, Cin), lambda b: (b, 0, 0, 0)),
                pl.BlockSpec((2, 2, 3, Cin, 2 * cout),
                             lambda b: (0, 0, 0, 0, 0)),
                pl.BlockSpec((1, 2 * cout), lambda b: (0, 0)),
            ],
            out_specs=pl.BlockSpec((1, H, 2, W, 2 * cout),
                                   lambda b: (b, 0, 0, 0, 0)),
            scratch_shapes=[pltpu.VMEM((H + 2, W + 2, Cin), jnp.bfloat16)],
        ),
        compiler_params=pltpu.CompilerParams(
            dimension_semantics=("parallel",),
            vmem_limit_bytes=32 * 1024 * 1024,
        ),
    )(x, w_pack, shift)
    # Row-major layouts coincide: this reshape is a free bitcast in XLA.
    return out.reshape(B, 2 * H, 2 * W, cout)


# ----------------------------------------------------------------------------
# Parameters: mirror Conv.__init__
# ----------------------------------------------------------------------------
def init_params(key, lat_features, image_features, image_size, base_features):
    block_cfg = [(lat_features, base_features * 2 ** 5,
                  image_size // 2 ** 5, 1, 0)]
    for i in reversed(range(5)):
        block_cfg.append((base_features * 2 ** (i + 1),
                          base_features * 2 ** i, 4, 2, 1))

    blocks = []
    for (cin, cout, K, stride, padding) in block_cfg:
        key, kw, kg, kb = jax.random.split(key, 4)
        wt = 0.05 * jax.random.normal(kw, (cin, cout, K, K), jnp.float32)
        gamma = 1.0 + 0.1 * jax.random.normal(kg, (cout,), jnp.float32)
        beta = 0.1 * jax.random.normal(kb, (cout,), jnp.float32)
        blocks.append(dict(wt=wt, gamma=gamma, beta=beta,
                           K=K, stride=stride, padding=padding))

    key, kw, kb = jax.random.split(key, 3)
    final_w = 0.05 * jax.random.normal(
        kw, (image_features, base_features, 1, 1), jnp.float32)
    final_b = 0.1 * jax.random.normal(kb, (image_features,), jnp.float32)
    return dict(blocks=blocks, final_w=final_w, final_b=final_b)


def prepare_params(params):
    """Fold eval-mode BN scale into W, pack weights for the fused kernels."""
    blocks = params["blocks"]

    # Block 0 (1x1 spatial input): plain GEMM weight, columns (kh, kw, cout).
    b0 = blocks[0]
    cin0, c0 = b0["wt"].shape[0], b0["wt"].shape[1]
    k0 = b0["K"]
    scale0 = b0["gamma"] / jnp.sqrt(1.0 + EPS)         # running_var=1, mean=0
    w0 = (b0["wt"] * scale0[None, :, None, None]).transpose(0, 2, 3, 1)
    w0 = w0.reshape(cin0, k0 * k0 * c0).astype(jnp.bfloat16)
    shift0 = jnp.tile(b0["beta"], k0 * k0).astype(jnp.float32)

    # Stride-2 blocks: phase-packed weight (rh, dh, col_offset, Cin, (rw, co)).
    tconv = []
    for blk in blocks[1:]:
        wt, gamma, beta = blk["wt"], blk["gamma"], blk["beta"]
        cin, cout = wt.shape[0], wt.shape[1]
        scale = gamma / jnp.sqrt(1.0 + EPS)
        ws = wt * scale[None, :, None, None]           # (cin, cout, 4, 4) f32
        w_pack = jnp.zeros((2, 2, 3, cin, 2 * cout), jnp.float32)
        for rh in range(2):
            for dh in range(2):
                kh = 2 * dh + 1 - rh
                for b in range(3):
                    for rw in range(2):
                        dw = rw + 1 - b
                        if dw < 0 or dw > 1:
                            continue
                        kw = 2 * dw + 1 - rw
                        w_pack = w_pack.at[
                            rh, dh, b, :, rw * cout:(rw + 1) * cout
                        ].set(ws[:, :, kh, kw])
        shift2 = jnp.tile(beta, 2).reshape(1, 2 * cout).astype(jnp.float32)
        tconv.append(dict(w=w_pack.astype(jnp.bfloat16), shift=shift2,
                          cout=cout))

    fw = params["final_w"][:, :, 0, 0].T.astype(jnp.bfloat16)   # (Cin, Cimg)
    fb = params["final_b"].astype(jnp.float32)
    return dict(w0=w0, shift0=shift0, K0=k0, C0=c0, tconv=tconv,
                final_w=fw, final_b=fb)


# ----------------------------------------------------------------------------
# Forward: mirrors Conv.forward (NHWC internally, NCHW at the boundary)
# ----------------------------------------------------------------------------
def conv_forward(prepared, z):
    B = z.shape[0]
    K0, C0 = prepared["K0"], prepared["C0"]

    # Block 0: pure GEMM with BN shift + LeakyReLU fused in the epilogue.
    y = fused_matmul(z, prepared["w0"], prepared["shift0"],
                     act="leaky_relu", out_dtype=jnp.bfloat16)
    x = y.reshape(B, K0, K0, C0)                       # NHWC, bf16

    # Five stride-2 blocks: fully fused transposed conv + shift + LeakyReLU.
    for blk in prepared["tconv"]:
        x = tconv2x_fused(x, blk["w"], blk["shift"], blk["cout"])

    # Final 1x1 conv + bias + tanh, fused in one GEMM kernel.
    Bx, H, W, Cin = x.shape
    cimg = prepared["final_w"].shape[1]
    y = fused_matmul(x.reshape(Bx * H * W, Cin), prepared["final_w"],
                     prepared["final_b"], act="tanh", out_dtype=jnp.float32)
    y = y.reshape(Bx, H, W, cimg)
    # TODO(synk): the NCHW boundary transpose (C=3 off the lane dim) is a
    # relayout left to XLA; keep NHWC if the downstream consumer allows.
    return y.transpose(0, 3, 1, 2)


# ----------------------------------------------------------------------------
# Pure-JAX reference (fp32) for numerical validation.
# ----------------------------------------------------------------------------
def _leaky(x):
    return jnp.where(x >= 0, x, 0.2 * x)


def reference_forward(params, z):
    x = z.reshape(z.shape[0], z.shape[1], 1, 1)
    for blk in params["blocks"]:
        wt, gamma, beta = blk["wt"], blk["gamma"], blk["beta"]
        K, s, p = blk["K"], blk["stride"], blk["padding"]
        w_flip = jnp.flip(wt, (2, 3)).transpose(1, 0, 2, 3)      # OIHW
        pad = K - 1 - p
        x = jax.lax.conv_general_dilated(
            x, w_flip, window_strides=(1, 1),
            padding=((pad, pad), (pad, pad)),
            lhs_dilation=(s, s),
            dimension_numbers=("NCHW", "OIHW", "NCHW"))
        scale = gamma / jnp.sqrt(1.0 + EPS)
        x = x * scale[None, :, None, None] + beta[None, :, None, None]
        x = _leaky(x)
    w, b = params["final_w"], params["final_b"]
    x = jnp.einsum("bchw,oc->bohw", x, w[:, :, 0, 0]) + b[None, :, None, None]
    return jnp.tanh(x)


# ----------------------------------------------------------------------------
if __name__ == "__main__":
    batch = 2
    lat_features = 8
    image_features = 3
    image_size = 32          # must be divisible by 2**5
    base_features = 4        # small for the demo

    key = jax.random.PRNGKey(0)
    kp, kz = jax.random.split(key)
    params = init_params(kp, lat_features, image_features, image_size,
                         base_features)
    z = jax.random.normal(kz, (batch, lat_features), jnp.float32)

    prepared = prepare_params(params)
    fwd = jax.jit(lambda zz: conv_forward(prepared, zz))
    out = jax.block_until_ready(fwd(z))

    assert out.shape == (batch, image_features, image_size, image_size), out.shape
    assert bool(jnp.all(jnp.isfinite(out)))
    assert bool(jnp.all(jnp.abs(out) <= 1.0 + 1e-6))     # tanh range

    ref = jax.block_until_ready(
        jax.jit(lambda zz: reference_forward(params, zz))(z))
    max_err = float(jnp.max(jnp.abs(out.astype(jnp.float32) - ref)))
    assert max_err < 3e-2, f"max abs err vs reference: {max_err}"

    print("KERNEL_OK")
</pallas_src>

<mosaic_0001>
module attributes {stable_mosaic.version = 11 : i64} {
  func.func @_tconv_kernel(%arg0: i32, %arg1: memref<1x1x1x128xbf16, #tpu.memory_space<vmem>>, %arg2: memref<2x2x3x128x128xbf16, #tpu.memory_space<vmem>>, %arg3: memref<1x128xf32, #tpu.memory_space<vmem>>, %arg4: memref<1x1x2x1x128xbf16, #tpu.memory_space<vmem>>, %arg5: memref<3x3x128xbf16, #tpu.memory_space<vmem>>) attributes {dimension_semantics = [#tpu.dimension_semantics<parallel>], iteration_bounds = array<i64: 2>, scalar_prefetch = 0 : i64, scratch_operands = 1 : i64, tpu.core_type = #tpu.core_type<tc>, window_params = [{transform_indices = @transform_0, window_bounds = array<i64: 1, 1, 1, 128>}, {pipeline_mode = #tpu.pipeline_mode<synchronous>, transform_indices = @transform_1, window_bounds = array<i64: 2, 2, 3, 128, 128>}, {pipeline_mode = #tpu.pipeline_mode<synchronous>, transform_indices = @transform_2, window_bounds = array<i64: 1, 128>}, {transform_indices = @transform_3, window_bounds = array<i64: 1, 1, 2, 1, 128>}]} {
    %cst = arith.constant 0.000000e+00 : bf16
    %0 = vector.broadcast %cst : bf16 to vector<3x3x128xbf16>
    %c0 = arith.constant 0 : index
    %c0_0 = arith.constant 0 : index
    %c0_1 = arith.constant 0 : index
    %1 = vector.load %arg5[%c0, %c0_0, %c0_1] : memref<3x3x128xbf16, #tpu.memory_space<vmem>>, vector<3x3x128xbf16>
    tpu.vector_store %arg5[%c0, %c0_0, %c0_1], %0 {strides = array<i32>} : memref<3x3x128xbf16, #tpu.memory_space<vmem>>, vector<3x3x128xbf16>,
    %c0_2 = arith.constant 0 : index
    %c0_3 = arith.constant 0 : index
    %c0_4 = arith.constant 0 : index
    %c0_5 = arith.constant 0 : index
    %2 = vector.load %arg1[%c0_2, %c0_3, %c0_4, %c0_5] : memref<1x1x1x128xbf16, #tpu.memory_space<vmem>>, vector<1x1x1x128xbf16>
    %3 = vector.shape_cast %2 : vector<1x1x1x128xbf16> to vector<1x1x128xbf16>
    %c1 = arith.constant 1 : index
    %c1_6 = arith.constant 1 : index
    %c0_7 = arith.constant 0 : index
    %4 = vector.load %arg5[%c1, %c1_6, %c0_7] : memref<3x3x128xbf16, #tpu.memory_space<vmem>>, vector<1x1x128xbf16>
    tpu.vector_store %arg5[%c1, %c1_6, %c0_7], %3 {strides = array<i32>} : memref<3x3x128xbf16, #tpu.memory_space<vmem>>, vector<1x1x128xbf16>,
    %c0_8 = arith.constant 0 : index
    %c0_9 = arith.constant 0 : index
    %5 = vector.load %arg3[%c0_8, %c0_9] : memref<1x128xf32, #tpu.memory_space<vmem>>, vector<1x128xf32>
    %c0_i32 = arith.constant 0 : i32
    %c0_i32_10 = arith.constant 0 : i32
    %6 = arith.addi %c0_i32, %c0_i32_10 : i32
    %7 = arith.index_cast %6 : i32 to index
    %c0_11 = arith.constant 0 : index
    %c0_12 = arith.constant 0 : index
    %8 = vector.load %arg5[%7, %c0_11, %c0_12] : memref<3x3x128xbf16, #tpu.memory_space<vmem>>, vector<1x1x128xbf16>
    %9 = vector.shape_cast %8 : vector<1x1x128xbf16> to vector<1x128xbf16>
    %c0_i32_13 = arith.constant 0 : i32
    %10 = arith.addi %c0_i32, %c0_i32_13 : i32
    %11 = arith.index_cast %10 : i32 to index
    %c1_14 = arith.constant 1 : index
    %c0_15 = arith.constant 0 : index
    %12 = vector.load %arg5[%11, %c1_14, %c0_15] : memref<3x3x128xbf16, #tpu.memory_space<vmem>>, vector<1x1x128xbf16>
    %13 = vector.shape_cast %12 : vector<1x1x128xbf16> to vector<1x128xbf16>
    %c0_i32_16 = arith.constant 0 : i32
    %14 = arith.addi %c0_i32, %c0_i32_16 : i32
    %15 = arith.index_cast %14 : i32 to index
    %c2 = arith.constant 2 : index
    %c0_17 = arith.constant 0 : index
    %16 = vector.load %arg5[%15, %c2, %c0_17] : memref<3x3x128xbf16, #tpu.memory_space<vmem>>, vector<1x1x128xbf16>
    %17 = vector.shape_cast %16 : vector<1x1x128xbf16> to vector<1x128xbf16>
    %c1_i32 = arith.constant 1 : i32
    %18 = arith.addi %c0_i32, %c1_i32 : i32
    %19 = arith.index_cast %18 : i32 to index
    %c0_18 = arith.constant 0 : index
    %c0_19 = arith.constant 0 : index
    %20 = vector.load %arg5[%19, %c0_18, %c0_19] : memref<3x3x128xbf16, #tpu.memory_space<vmem>>, vector<1x1x128xbf16>
    %21 = vector.shape_cast %20 : vector<1x1x128xbf16> to vector<1x128xbf16>
    %c1_i32_20 = arith.constant 1 : i32
    %22 = arith.addi %c0_i32, %c1_i32_20 : i32
    %23 = arith.index_cast %22 : i32 to index
    %c1_21 = arith.constant 1 : index
    %c0_22 = arith.constant 0 : index
    %24 = vector.load %arg5[%23, %c1_21, %c0_22] : memref<3x3x128xbf16, #tpu.memory_space<vmem>>, vector<1x1x128xbf16>
    %25 = vector.shape_cast %24 : vector<1x1x128xbf16> to vector<1x128xbf16>
    %c1_i32_23 = arith.constant 1 : i32
    %26 = arith.addi %c0_i32, %c1_i32_23 : i32
    %27 = arith.index_cast %26 : i32 to index
    %c2_24 = arith.constant 2 : index
    %c0_25 = arith.constant 0 : index
    %28 = vector.load %arg5[%27, %c2_24, %c0_25] : memref<3x3x128xbf16, #tpu.memory_space<vmem>>, vector<1x1x128xbf16>
    %29 = vector.shape_cast %28 : vector<1x1x128xbf16> to vector<1x128xbf16>
    %c2_i32 = arith.constant 2 : i32
    %30 = arith.addi %c0_i32, %c2_i32 : i32
    %31 = arith.index_cast %30 : i32 to index
    %c0_26 = arith.constant 0 : index
    %c0_27 = arith.constant 0 : index
    %32 = vector.load %arg5[%31, %c0_26, %c0_27] : memref<3x3x128xbf16, #tpu.memory_space<vmem>>, vector<1x1x128xbf16>
    %33 = vector.shape_cast %32 : vector<1x1x128xbf16> to vector<1x128xbf16>
    %c2_i32_28 = arith.constant 2 : i32
    %34 = arith.addi %c0_i32, %c2_i32_28 : i32
    %35 = arith.index_cast %34 : i32 to index
    %c1_29 = arith.constant 1 : index
    %c0_30 = arith.constant 0 : index
    %36 = vector.load %arg5[%35, %c1_29, %c0_30] : memref<3x3x128xbf16, #tpu.memory_space<vmem>>, vector<1x1x128xbf16>
    %37 = vector.shape_cast %36 : vector<1x1x128xbf16> to vector<1x128xbf16>
    %c2_i32_31 = arith.constant 2 : i32
    %38 = arith.addi %c0_i32, %c2_i32_31 : i32
    %39 = arith.index_cast %38 : i32 to index
    %c2_32 = arith.constant 2 : index
    %c0_33 = arith.constant 0 : index
    %40 = vector.load %arg5[%39, %c2_32, %c0_33] : memref<3x3x128xbf16, #tpu.memory_space<vmem>>, vector<1x1x128xbf16>
    %41 = vector.shape_cast %40 : vector<1x1x128xbf16> to vector<1x128xbf16>
    %cst_34 = arith.constant 0.000000e+00 : f32
    %42 = vector.broadcast %cst_34 : f32 to vector<1x128xf32>
    %c0_35 = arith.constant 0 : index
    %c0_36 = arith.constant 0 : index
    %c0_37 = arith.constant 0 : index
    %c0_38 = arith.constant 0 : index
    %c0_39 = arith.constant 0 : index
    %43 = vector.load %arg2[%c0_35, %c0_36, %c0_37, %c0_38, %c0_39] : memref<2x2x3x128x128xbf16, #tpu.memory_space<vmem>>, vector<1x1x1x128x128xbf16>
    %44 = vector.shape_cast %43 : vector<1x1x1x128x128xbf16> to vector<128x128xbf16>
    %cst_40 = arith.constant dense<0.000000e+00> : vector<1x128xf32>
    %45 = tpu.matmul %21, %44, %cst_40 {dimension_numbers = #tpu.dot_dimension_numbers<[1], [0], [0], [1], [0, 0, 1, 1], [], []>} : vector<1x128xbf16>, vector<128x128xbf16>, vector<1x128xf32> -> vector<1x128xf32>
    %46 = arith.addf %42, %45 : vector<1x128xf32>
    %c0_41 = arith.constant 0 : index
    %c0_42 = arith.constant 0 : index
    %c1_43 = arith.constant 1 : index
    %c0_44 = arith.constant 0 : index
    %c0_45 = arith.constant 0 : index
    %47 = vector.load %arg2[%c0_41, %c0_42, %c1_43, %c0_44, %c0_45] : memref<2x2x3x128x128xbf16, #tpu.memory_space<vmem>>, vector<1x1x1x128x128xbf16>
    %48 = vector.shape_cast %47 : vector<1x1x1x128x128xbf16> to vector<128x128xbf16>
    %cst_46 = arith.constant dense<0.000000e+00> : vector<1x128xf32>
    %49 = tpu.matmul %25, %48, %cst_46 {dimension_numbers = #tpu.dot_dimension_numbers<[1], [0], [0], [1], [0, 0, 1, 1], [], []>} : vector<1x128xbf16>, vector<128x128xbf16>, vector<1x128xf32> -> vector<1x128xf32>
    %50 = arith.addf %46, %49 : vector<1x128xf32>
    %c0_47 = arith.constant 0 : index
    %c0_48 = arith.constant 0 : index
    %c2_49 = arith.constant 2 : index
    %c0_50 = arith.constant 0 : index
    %c0_51 = arith.constant 0 : index
    %51 = vector.load %arg2[%c0_47, %c0_48, %c2_49, %c0_50, %c0_51] : memref<2x2x3x128x128xbf16, #tpu.memory_space<vmem>>, vector<1x1x1x128x128xbf16>
    %52 = vector.shape_cast %51 : vector<1x1x1x128x128xbf16> to vector<128x128xbf16>
    %cst_52 = arith.constant dense<0.000000e+00> : vector<1x128xf32>
    %53 = tpu.matmul %29, %52, %cst_52 {dimension_numbers = #tpu.dot_dimension_numbers<[1], [0], [0], [1], [0, 0, 1, 1], [], []>} : vector<1x128xbf16>, vector<128x128xbf16>, vector<1x128xf32> -> vector<1x128xf32>
    %54 = arith.addf %50, %53 : vector<1x128xf32>
    %c0_53 = arith.constant 0 : index
    %c1_54 = arith.constant 1 : index
    %c0_55 = arith.constant 0 : index
    %c0_56 = arith.constant 0 : index
    %c0_57 = arith.constant 0 : index
    %55 = vector.load %arg2[%c0_53, %c1_54, %c0_55, %c0_56, %c0_57] : memref<2x2x3x128x128xbf16, #tpu.memory_space<vmem>>, vector<1x1x1x128x128xbf16>
    %56 = vector.shape_cast %55 : vector<1x1x1x128x128xbf16> to vector<128x128xbf16>
    %cst_58 = arith.constant dense<0.000000e+00> : vector<1x128xf32>
    %57 = tpu.matmul %9, %56, %cst_58 {dimension_numbers = #tpu.dot_dimension_numbers<[1], [0], [0], [1], [0, 0, 1, 1], [], []>} : vector<1x128xbf16>, vector<128x128xbf16>, vector<1x128xf32> -> vector<1x128xf32>
    %58 = arith.addf %54, %57 : vector<1x128xf32>
    %c0_59 = arith.constant 0 : index
    %c1_60 = arith.constant 1 : index
    %c1_61 = arith.constant 1 : index
    %c0_62 = arith.constant 0 : index
    %c0_63 = arith.constant 0 : index
    %59 = vector.load %arg2[%c0_59, %c1_60, %c1_61, %c0_62, %c0_63] : memref<2x2x3x128x128xbf16, #tpu.memory_space<vmem>>, vector<1x1x1x128x128xbf16>
    %60 = vector.shape_cast %59 : vector<1x1x1x128x128xbf16> to vector<128x128xbf16>
    %cst_64 = arith.constant dense<0.000000e+00> : vector<1x128xf32>
    %61 = tpu.matmul %13, %60, %cst_64 {dimension_numbers = #tpu.dot_dimension_numbers<[1], [0], [0], [1], [0, 0, 1, 1], [], []>} : vector<1x128xbf16>, vector<128x128xbf16>, vector<1x128xf32> -> vector<1x128xf32>
    %62 = arith.addf %58, %61 : vector<1x128xf32>
    %c0_65 = arith.constant 0 : index
    %c1_66 = arith.constant 1 : index
    %c2_67 = arith.constant 2 : index
    %c0_68 = arith.constant 0 : index
    %c0_69 = arith.constant 0 : index
    %63 = vector.load %arg2[%c0_65, %c1_66, %c2_67, %c0_68, %c0_69] : memref<2x2x3x128x128xbf16, #tpu.memory_space<vmem>>, vector<1x1x1x128x128xbf16>
    %64 = vector.shape_cast %63 : vector<1x1x1x128x128xbf16> to vector<128x128xbf16>
    %cst_70 = arith.constant dense<0.000000e+00> : vector<1x128xf32>
    %65 = tpu.matmul %17, %64, %cst_70 {dimension_numbers = #tpu.dot_dimension_numbers<[1], [0], [0], [1], [0, 0, 1, 1], [], []>} : vector<1x128xbf16>, vector<128x128xbf16>, vector<1x128xf32> -> vector<1x128xf32>
    %66 = arith.addf %62, %65 : vector<1x128xf32>
    %67 = arith.addf %66, %5 : vector<1x128xf32>
    %cst_71 = arith.constant 0.000000e+00 : f32
    %68 = vector.broadcast %cst_71 : f32 to vector<1x128xf32>
    %69 = arith.cmpf oge, %67, %68 : vector<1x128xf32>
    %cst_72 = arith.constant 2.000000e-01 : f32
    %70 = vector.broadcast %cst_72 : f32 to vector<1x128xf32>
    %71 = arith.mulf %70, %67 : vector<1x128xf32>
    %72 = arith.select %69, %67, %71 : vector<1x128xi1>, vector<1x128xf32>
    %73 = arith.truncf %72 : vector<1x128xf32> to vector<1x128xbf16>
    %c0_73 = arith.constant 0 : index
    %74 = arith.index_cast %c0_i32 : i32 to index
    %c0_74 = arith.constant 0 : index
    %c0_75 = arith.constant 0 : index
    %c0_76 = arith.constant 0 : index
    %75 = vector.load %arg4[%c0_73, %74, %c0_74, %c0_75, %c0_76] : memref<1x1x2x1x128xbf16, #tpu.memory_space<vmem>>, vector<1x1x1x1x128xbf16>
    %76 = vector.shape_cast %75 : vector<1x1x1x1x128xbf16> to vector<1x128xbf16>
    %77 = vector.shape_cast %73 : vector<1x128xbf16> to vector<1x1x1x1x128xbf16>
    tpu.vector_store %arg4[%c0_73, %74, %c0_74, %c0_75, %c0_76], %77 {strides = array<i32>} : memref<1x1x2x1x128xbf16, #tpu.memory_space<vmem>>, vector<1x1x1x1x128xbf16>,
    %cst_77 = arith.constant 0.000000e+00 : f32
    %78 = vector.broadcast %cst_77 : f32 to vector<1x128xf32>
    %c1_78 = arith.constant 1 : index
    %c0_79 = arith.constant 0 : index
    %c0_80 = arith.constant 0 : index
    %c0_81 = arith.constant 0 : index
    %c0_82 = arith.constant 0 : index
    %79 = vector.load %arg2[%c1_78, %c0_79, %c0_80, %c0_81, %c0_82] : memref<2x2x3x128x128xbf16, #tpu.memory_space<vmem>>, vector<1x1x1x128x128xbf16>
    %80 = vector.shape_cast %79 : vector<1x1x1x128x128xbf16> to vector<128x128xbf16>
    %cst_83 = arith.constant dense<0.000000e+00> : vector<1x128xf32>
    %81 = tpu.matmul %33, %80, %cst_83 {dimension_numbers = #tpu.dot_dimension_numbers<[1], [0], [0], [1], [0, 0, 1, 1], [], []>} : vector<1x128xbf16>, vector<128x128xbf16>, vector<1x128xf32> -> vector<1x128xf32>
    %82 = arith.addf %78, %81 : vector<1x128xf32>
    %c1_84 = arith.constant 1 : index
    %c0_85 = arith.constant 0 : index
    %c1_86 = arith.constant 1 : index
    %c0_87 = arith.constant 0 : index
    %c0_88 = arith.constant 0 : index
    %83 = vector.load %arg2[%c1_84, %c0_85, %c1_86, %c0_87, %c0_88] : memref<2x2x3x128x128xbf16, #tpu.memory_space<vmem>>, vector<1x1x1x128x128xbf16>
    %84 = vector.shape_cast %83 : vector<1x1x1x128x128xbf16> to vector<128x128xbf16>
    %cst_89 = arith.constant dense<0.000000e+00> : vector<1x128xf32>
    %85 = tpu.matmul %37, %84, %cst_89 {dimension_numbers = #tpu.dot_dimension_numbers<[1], [0], [0], [1], [0, 0, 1, 1], [], []>} : vector<1x128xbf16>, vector<128x128xbf16>, vector<1x128xf32> -> vector<1x128xf32>
    %86 = arith.addf %82, %85 : vector<1x128xf32>
    %c1_90 = arith.constant 1 : index
    %c0_91 = arith.constant 0 : index
    %c2_92 = arith.constant 2 : index
    %c0_93 = arith.constant 0 : index
    %c0_94 = arith.constant 0 : index
    %87 = vector.load %arg2[%c1_90, %c0_91, %c2_92, %c0_93, %c0_94] : memref<2x2x3x128x128xbf16, #tpu.memory_space<vmem>>, vector<1x1x1x128x128xbf16>
    %88 = vector.shape_cast %87 : vector<1x1x1x128x128xbf16> to vector<128x128xbf16>
    %cst_95 = arith.constant dense<0.000000e+00> : vector<1x128xf32>
    %89 = tpu.matmul %41, %88, %cst_95 {dimension_numbers = #tpu.dot_dimension_numbers<[1], [0], [0], [1], [0, 0, 1, 1], [], []>} : vector<1x128xbf16>, vector<128x128xbf16>, vector<1x128xf32> -> vector<1x128xf32>
    %90 = arith.addf %86, %89 : vector<1x128xf32>
    %c1_96 = arith.constant 1 : index
    %c1_97 = arith.constant 1 : index
    %c0_98 = arith.constant 0 : index
    %c0_99 = arith.constant 0 : index
    %c0_100 = arith.constant 0 : index
    %91 = vector.load %arg2[%c1_96, %c1_97, %c0_98, %c0_99, %c0_100] : memref<2x2x3x128x128xbf16, #tpu.memory_space<vmem>>, vector<1x1x1x128x128xbf16>
    %92 = vector.shape_cast %91 : vector<1x1x1x128x128xbf16> to vector<128x128xbf16>
    %cst_101 = arith.constant dense<0.000000e+00> : vector<1x128xf32>
    %93 = tpu.matmul %21, %92, %cst_101 {dimension_numbers = #tpu.dot_dimension_numbers<[1], [0], [0], [1], [0, 0, 1, 1], [], []>} : vector<1x128xbf16>, vector<128x128xbf16>, vector<1x128xf32> -> vector<1x128xf32>
    %94 = arith.addf %90, %93 : vector<1x128xf32>
    %c1_102 = arith.constant 1 : index
    %c1_103 = arith.constant 1 : index
    %c1_104 = arith.constant 1 : index
    %c0_105 = arith.constant 0 : index
    %c0_106 = arith.constant 0 : index
    %95 = vector.load %arg2[%c1_102, %c1_103, %c1_104, %c0_105, %c0_106] : memref<2x2x3x128x128xbf16, #tpu.memory_space<vmem>>, vector<1x1x1x128x128xbf16>
    %96 = vector.shape_cast %95 : vector<1x1x1x128x128xbf16> to vector<128x128xbf16>
    %cst_107 = arith.constant dense<0.000000e+00> : vector<1x128xf32>
    %97 = tpu.matmul %25, %96, %cst_107 {dimension_numbers = #tpu.dot_dimension_numbers<[1], [0], [0], [1], [0, 0, 1, 1], [], []>} : vector<1x128xbf16>, vector<128x128xbf16>, vector<1x128xf32> -> vector<1x128xf32>
    %98 = arith.addf %94, %97 : vector<1x128xf32>
    %c1_108 = arith.constant 1 : index
    %c1_109 = arith.constant 1 : index
    %c2_110 = arith.constant 2 : index
    %c0_111 = arith.constant 0 : index
    %c0_112 = arith.constant 0 : index
    %99 = vector.load %arg2[%c1_108, %c1_109, %c2_110, %c0_111, %c0_112] : memref<2x2x3x128x128xbf16, #tpu.memory_space<vmem>>, vector<1x1x1x128x128xbf16>
    %100 = vector.shape_cast %99 : vector<1x1x1x128x128xbf16> to vector<128x128xbf16>
    %cst_113 = arith.constant dense<0.000000e+00> : vector<1x128xf32>
    %101 = tpu.matmul %29, %100, %cst_113 {dimension_numbers = #tpu.dot_dimension_numbers<[1], [0], [0], [1], [0, 0, 1, 1], [], []>} : vector<1x128xbf16>, vector<128x128xbf16>, vector<1x128xf32> -> vector<1x128xf32>
    %102 = arith.addf %98, %101 : vector<1x128xf32>
    %103 = arith.addf %102, %5 : vector<1x128xf32>
    %cst_114 = arith.constant 0.000000e+00 : f32
    %104 = vector.broadcast %cst_114 : f32 to vector<1x128xf32>
    %105 = arith.cmpf oge, %103, %104 : vector<1x128xf32>
    %cst_115 = arith.constant 2.000000e-01 : f32
    %106 = vector.broadcast %cst_115 : f32 to vector<1x128xf32>
    %107 = arith.mulf %106, %103 : vector<1x128xf32>
    %108 = arith.select %105, %103, %107 : vector<1x128xi1>, vector<1x128xf32>
    %109 = arith.truncf %108 : vector<1x128xf32> to vector<1x128xbf16>
    %c0_116 = arith.constant 0 : index
    %110 = arith.index_cast %c0_i32 : i32 to index
    %c1_117 = arith.constant 1 : index
    %c0_118 = arith.constant 0 : index
    %c0_119 = arith.constant 0 : index
    %111 = vector.load %arg4[%c0_116, %110, %c1_117, %c0_118, %c0_119] : memref<1x1x2x1x128xbf16, #tpu.memory_space<vmem>>, vector<1x1x1x1x128xbf16>
    %112 = vector.shape_cast %111 : vector<1x1x1x1x128xbf16> to vector<1x128xbf16>
    %113 = vector.shape_cast %109 : vector<1x128xbf16> to vector<1x1x1x1x128xbf16>
    tpu.vector_store %arg4[%c0_116, %110, %c1_117, %c0_118, %c0_119], %113 {strides = array<i32>} : memref<1x1x2x1x128xbf16, #tpu.memory_space<vmem>>, vector<1x1x1x1x128xbf16>,
    %c1_i32_120 = arith.constant 1 : i32
    return
  }
  func.func @transform_0(%arg0: i32) -> (i32, i32, i32, i32) {
    %c0_i32 = arith.constant 0 : i32
    %c0_i32_0 = arith.constant 0 : i32
    %c0_i32_1 = arith.constant 0 : i32
    %c0_i32_2 = arith.constant 0 : i32
    return %arg0, %c0_i32, %c0_i32_0, %c0_i32_1 : i32, i32, i32, i32
  }
  func.func @transform_1(%arg0: i32) -> (i32, i32, i32, i32, i32) {
    %c0_i32 = arith.constant 0 : i32
    %c0_i32_0 = arith.constant 0 : i32
    %c0_i32_1 = arith.constant 0 : i32
    %c0_i32_2 = arith.constant 0 : i32
    %c0_i32_3 = arith.constant 0 : i32
    %c0_i32_4 = arith.constant 0 : i32
    return %c0_i32, %c0_i32_0, %c0_i32_1, %c0_i32_2, %c0_i32_3 : i32, i32, i32, i32, i32
  }
  func.func @transform_2(%arg0: i32) -> (i32, i32) {
    %c0_i32 = arith.constant 0 : i32
    %c0_i32_0 = arith.constant 0 : i32
    %c0_i32_1 = arith.constant 0 : i32
    return %c0_i32, %c0_i32_0 : i32, i32
  }
  func.func @transform_3(%arg0: i32) -> (i32, i32, i32, i32, i32) {
    %c0_i32 = arith.constant 0 : i32
    %c0_i32_0 = arith.constant 0 : i32
    %c0_i32_1 = arith.constant 0 : i32
    %c0_i32_2 = arith.constant 0 : i32
    %c0_i32_3 = arith.constant 0 : i32
    return %arg0, %c0_i32, %c0_i32_0, %c0_i32_1, %c0_i32_2 : i32, i32, i32, i32, i32
  }
}

module attributes {stable_mosaic.version = 11 : i64} {
  func.func @_gemm_kernel(%arg0: i32, %arg1: i32, %arg2: memref<2x8xbf16, #tpu.memory_space<vmem>>, %arg3: memref<8x128xbf16, #tpu.memory_space<vmem>>, %arg4: memref<1x128xf32, #tpu.memory_space<vmem>>, %arg5: memref<2x128xbf16, #tpu.memory_space<vmem>>) attributes {dimension_semantics = [#tpu.dimension_semantics<parallel>, #tpu.dimension_semantics<parallel>], iteration_bounds = array<i64: 1, 1>, scalar_prefetch = 0 : i64, scratch_operands = 0 : i64, tpu.core_type = #tpu.core_type<tc>, window_params = [{transform_indices = @transform_0, window_bounds = array<i64: 2, 8>}, {transform_indices = @transform_1, window_bounds = array<i64: 8, 128>}, {transform_indices = @transform_2, window_bounds = array<i64: 1, 128>}, {transform_indices = @transform_3, window_bounds = array<i64: 2, 128>}]} {
    %c0 = arith.constant 0 : index
    %c0_0 = arith.constant 0 : index
    %0 = vector.load %arg2[%c0, %c0_0] : memref<2x8xbf16, #tpu.memory_space<vmem>>, vector<2x8xbf16>
    %c0_1 = arith.constant 0 : index
    %c0_2 = arith.constant 0 : index
    %1 = vector.load %arg3[%c0_1, %c0_2] : memref<8x128xbf16, #tpu.memory_space<vmem>>, vector<8x128xbf16>
    %cst = arith.constant dense<0.000000e+00> : vector<2x128xf32>
    %2 = tpu.matmul %0, %1, %cst {dimension_numbers = #tpu.dot_dimension_numbers<[1], [0], [0], [1], [0, 0, 1, 1], [], []>} : vector<2x8xbf16>, vector<8x128xbf16>, vector<2x128xf32> -> vector<2x128xf32>
    %c0_3 = arith.constant 0 : index
    %c0_4 = arith.constant 0 : index
    %3 = vector.load %arg4[%c0_3, %c0_4] : memref<1x128xf32, #tpu.memory_space<vmem>>, vector<1x128xf32>
    %4 = vector.broadcast %3 : vector<1x128xf32> to vector<2x128xf32>
    %5 = arith.addf %2, %4 : vector<2x128xf32>
    %cst_5 = arith.constant 0.000000e+00 : f32
    %6 = vector.broadcast %cst_5 : f32 to vector<2x128xf32>
    %7 = arith.cmpf oge, %5, %6 : vector<2x128xf32>
    %cst_6 = arith.constant 2.000000e-01 : f32
    %8 = vector.broadcast %cst_6 : f32 to vector<2x128xf32>
    %9 = arith.mulf %8, %5 : vector<2x128xf32>
    %10 = arith.select %7, %5, %9 : vector<2x128xi1>, vector<2x128xf32>
    %11 = arith.truncf %10 : vector<2x128xf32> to vector<2x128xbf16>
    %c0_7 = arith.constant 0 : index
    %c0_8 = arith.constant 0 : index
    %12 = vector.load %arg5[%c0_7, %c0_8] : memref<2x128xbf16, #tpu.memory_space<vmem>>, vector<2x128xbf16>
    tpu.vector_store %arg5[%c0_7, %c0_8], %11 {strides = array<i32>} : memref<2x128xbf16, #tpu.memory_space<vmem>>, vector<2x128xbf16>,
    return
  }
  func.func @transform_0(%arg0: i32, %arg1: i32) -> (i32, i32) {
    %c0_i32 = arith.constant 0 : i32
    %c0_i32_0 = arith.constant 0 : i32
    return %arg0, %c0_i32 : i32, i32
  }
  func.func @transform_1(%arg0: i32, %arg1: i32) -> (i32, i32) {
    %c0_i32 = arith.constant 0 : i32
    %c0_i32_0 = arith.constant 0 : i32
    return %c0_i32, %arg1 : i32, i32
  }
  func.func @transform_2(%arg0: i32, %arg1: i32) -> (i32, i32) {
    %c0_i32 = arith.constant 0 : i32
    %c0_i32_0 = arith.constant 0 : i32
    return %c0_i32, %arg1 : i32, i32
  }
  func.func @transform_3(%arg0: i32, %arg1: i32) -> (i32, i32) {
    %c0_i32 = arith.constant 0 : i32
    return %arg0, %arg1 : i32, i32
  }
}

module attributes {stable_mosaic.version = 11 : i64} {
  func.func @_tconv_kernel(%arg0: i32, %arg1: memref<1x2x2x64xbf16, #tpu.memory_space<vmem>>, %arg2: memref<2x2x3x64x64xbf16, #tpu.memory_space<vmem>>, %arg3: memref<1x64xf32, #tpu.memory_space<vmem>>, %arg4: memref<1x2x2x2x64xbf16, #tpu.memory_space<vmem>>, %arg5: memref<4x4x64xbf16, #tpu.memory_space<vmem>>) attributes {dimension_semantics = [#tpu.dimension_semantics<parallel>], iteration_bounds = array<i64: 2>, scalar_prefetch = 0 : i64, scratch_operands = 1 : i64, tpu.core_type = #tpu.core_type<tc>, window_params = [{transform_indices = @transform_0, window_bounds = array<i64: 1, 2, 2, 64>}, {pipeline_mode = #tpu.pipeline_mode<synchronous>, transform_indices = @transform_1, window_bounds = array<i64: 2, 2, 3, 64, 64>}, {pipeline_mode = #tpu.pipeline_mode<synchronous>, transform_indices = @transform_2, window_bounds = array<i64: 1, 64>}, {transform_indices = @transform_3, window_bounds = array<i64: 1, 2, 2, 2, 64>}]} {
    %cst = arith.constant 0.000000e+00 : bf16
    %0 = vector.broadcast %cst : bf16 to vector<4x4x64xbf16>
    %c0 = arith.constant 0 : index
    %c0_0 = arith.constant 0 : index
    %c0_1 = arith.constant 0 : index
    %1 = vector.load %arg5[%c0, %c0_0, %c0_1] : memref<4x4x64xbf16, #tpu.memory_space<vmem>>, vector<4x4x64xbf16>
    tpu.vector_store %arg5[%c0, %c0_0, %c0_1], %0 {strides = array<i32>} : memref<4x4x64xbf16, #tpu.memory_space<vmem>>, vector<4x4x64xbf16>,
    %c0_2 = arith.constant 0 : index
    %c0_3 = arith.constant 0 : index
    %c0_4 = arith.constant 0 : index
    %c0_5 = arith.constant 0 : index
    %2 = vector.load %arg1[%c0_2, %c0_3, %c0_4, %c0_5] : memref<1x2x2x64xbf16, #tpu.memory_space<vmem>>, vector<1x2x2x64xbf16>
    %3 = vector.shape_cast %2 : vector<1x2x2x64xbf16> to vector<2x2x64xbf16>
    %c1 = arith.constant 1 : index
    %c1_6 = arith.constant 1 : index
    %c0_7 = arith.constant 0 : index
    %4 = vector.load %arg5[%c1, %c1_6, %c0_7] : memref<4x4x64xbf16, #tpu.memory_space<vmem>>, vector<2x2x64xbf16>
    tpu.vector_store %arg5[%c1, %c1_6, %c0_7], %3 {strides = array<i32>} : memref<4x4x64xbf16, #tpu.memory_space<vmem>>, vector<2x2x64xbf16>,
    %c0_8 = arith.constant 0 : index
    %c0_9 = arith.constant 0 : index
    %5 = vector.load %arg3[%c0_8, %c0_9] : memref<1x64xf32, #tpu.memory_space<vmem>>, vector<1x64xf32>
    %c0_i32 = arith.constant 0 : i32
    %c2_i32 = arith.constant 2 : i32
    %6 = arith.addi %c0_i32, %c2_i32 : i32
    %c1_i32 = arith.constant 1 : i32
    scf.for %arg6 = %c0_i32 to %6 step %c1_i32  : i32 {
      %c0_i32_11 = arith.constant 0 : i32
      %7 = arith.addi %arg6, %c0_i32_11 : i32
      %8 = arith.index_cast %7 : i32 to index
      %c0_12 = arith.constant 0 : index
      %c0_13 = arith.constant 0 : index
      %9 = vector.load %arg5[%8, %c0_12, %c0_13] : memref<4x4x64xbf16, #tpu.memory_space<vmem>>, vector<1x2x64xbf16>
      %10 = vector.shape_cast %9 : vector<1x2x64xbf16> to vector<2x64xbf16>
      %c0_i32_14 = arith.constant 0 : i32
      %11 = arith.addi %arg6, %c0_i32_14 : i32
      %12 = arith.index_cast %11 : i32 to index
      %c1_15 = arith.constant 1 : index
      %c0_16 = arith.constant 0 : index
      %13 = vector.load %arg5[%12, %c1_15, %c0_16] : memref<4x4x64xbf16, #tpu.memory_space<vmem>>, vector<1x2x64xbf16>
      %14 = vector.shape_cast %13 : vector<1x2x64xbf16> to vector<2x64xbf16>
      %c0_i32_17 = arith.constant 0 : i32
      %15 = arith.addi %arg6, %c0_i32_17 : i32
      %16 = arith.index_cast %15 : i32 to index
      %c2 = arith.constant 2 : index
      %c0_18 = arith.constant 0 : index
      %17 = vector.load %arg5[%16, %c2, %c0_18] : memref<4x4x64xbf16, #tpu.memory_space<vmem>>, vector<1x2x64xbf16>
      %18 = vector.shape_cast %17 : vector<1x2x64xbf16> to vector<2x64xbf16>
      %c1_i32_19 = arith.constant 1 : i32
      %19 = arith.addi %arg6, %c1_i32_19 : i32
      %20 = arith.index_cast %19 : i32 to index
      %c0_20 = arith.constant 0 : index
      %c0_21 = arith.constant 0 : index
      %21 = vector.load %arg5[%20, %c0_20, %c0_21] : memref<4x4x64xbf16, #tpu.memory_space<vmem>>, vector<1x2x64xbf16>
      %22 = vector.shape_cast %21 : vector<1x2x64xbf16> to vector<2x64xbf16>
      %c1_i32_22 = arith.constant 1 : i32
      %23 = arith.addi %arg6, %c1_i32_22 : i32
      %24 = arith.index_cast %23 : i32 to index
      %c1_23 = arith.constant 1 : index
      %c0_24 = arith.constant 0 : index
      %25 = vector.load %arg5[%24, %c1_23, %c0_24] : memref<4x4x64xbf16, #tpu.memory_space<vmem>>, vector<1x2x64xbf16>
      %26 = vector.shape_cast %25 : vector<1x2x64xbf16> to vector<2x64xbf16>
      %c1_i32_25 = arith.constant 1 : i32
      %27 = arith.addi %arg6, %c1_i32_25 : i32
      %28 = arith.index_cast %27 : i32 to index
      %c2_26 = arith.constant 2 : index
      %c0_27 = arith.constant 0 : index
      %29 = vector.load %arg5[%28, %c2_26, %c0_27] : memref<4x4x64xbf16, #tpu.memory_space<vmem>>, vector<1x2x64xbf16>
      %30 = vector.shape_cast %29 : vector<1x2x64xbf16> to vector<2x64xbf16>
      %c2_i32_28 = arith.constant 2 : i32
      %31 = arith.addi %arg6, %c2_i32_28 : i32
      %32 = arith.index_cast %31 : i32 to index
      %c0_29 = arith.constant 0 : index
      %c0_30 = arith.constant 0 : index
      %33 = vector.load %arg5[%32, %c0_29, %c0_30] : memref<4x4x64xbf16, #tpu.memory_space<vmem>>, vector<1x2x64xbf16>
      %34 = vector.shape_cast %33 : vector<1x2x64xbf16> to vector<2x64xbf16>
      %c2_i32_31 = arith.constant 2 : i32
      %35 = arith.addi %arg6, %c2_i32_31 : i32
      %36 = arith.index_cast %35 : i32 to index
      %c1_32 = arith.constant 1 : index
      %c0_33 = arith.constant 0 : index
      %37 = vector.load %arg5[%36, %c1_32, %c0_33] : memref<4x4x64xbf16, #tpu.memory_space<vmem>>, vector<1x2x64xbf16>
      %38 = vector.shape_cast %37 : vector<1x2x64xbf16> to vector<2x64xbf16>
      %c2_i32_34 = arith.constant 2 : i32
      %39 = arith.addi %arg6, %c2_i32_34 : i32
      %40 = arith.index_cast %39 : i32 to index
      %c2_35 = arith.constant 2 : index
      %c0_36 = arith.constant 0 : index
      %41 = vector.load %arg5[%40, %c2_35, %c0_36] : memref<4x4x64xbf16, #tpu.memory_space<vmem>>, vector<1x2x64xbf16>
      %42 = vector.shape_cast %41 : vector<1x2x64xbf16> to vector<2x64xbf16>
      %cst_37 = arith.constant 0.000000e+00 : f32
      %43 = vector.broadcast %cst_37 : f32 to vector<2x64xf32>
      %c0_38 = arith.constant 0 : index
      %c0_39 = arith.constant 0 : index
      %c0_40 = arith.constant 0 : index
      %c0_41 = arith.constant 0 : index
      %c0_42 = arith.constant 0 : index
      %44 = vector.load %arg2[%c0_38, %c0_39, %c0_40, %c0_41, %c0_42] : memref<2x2x3x64x64xbf16, #tpu.memory_space<vmem>>, vector<1x1x1x64x64xbf16>
      %45 = vector.shape_cast %44 : vector<1x1x1x64x64xbf16> to vector<64x64xbf16>
      %cst_43 = arith.constant dense<0.000000e+00> : vector<2x64xf32>
      %46 = tpu.matmul %22, %45, %cst_43 {dimension_numbers = #tpu.dot_dimension_numbers<[1], [0], [0], [1], [0, 0, 1, 1], [], []>} : vector<2x64xbf16>, vector<64x64xbf16>, vector<2x64xf32> -> vector<2x64xf32>
      %47 = arith.addf %43, %46 : vector<2x64xf32>
      %c0_44 = arith.constant 0 : index
      %c0_45 = arith.constant 0 : index
      %c1_46 = arith.constant 1 : index
      %c0_47 = arith.constant 0 : index
      %c0_48 = arith.constant 0 : index
      %48 = vector.load %arg2[%c0_44, %c0_45, %c1_46, %c0_47, %c0_48] : memref<2x2x3x64x64xbf16, #tpu.memory_space<vmem>>, vector<1x1x1x64x64xbf16>
      %49 = vector.shape_cast %48 : vector<1x1x1x64x64xbf16> to vector<64x64xbf16>
      %cst_49 = arith.constant dense<0.000000e+00> : vector<2x64xf32>
      %50 = tpu.matmul %26, %49, %cst_49 {dimension_numbers = #tpu.dot_dimension_numbers<[1], [0], [0], [1], [0, 0, 1, 1], [], []>} : vector<2x64xbf16>, vector<64x64xbf16>, vector<2x64xf32> -> vector<2x64xf32>
      %51 = arith.addf %47, %50 : vector<2x64xf32>
      %c0_50 = arith.constant 0 : index
      %c0_51 = arith.constant 0 : index
      %c2_52 = arith.constant 2 : index
      %c0_53 = arith.constant 0 : index
      %c0_54 = arith.constant 0 : index
      %52 = vector.load %arg2[%c0_50, %c0_51, %c2_52, %c0_53, %c0_54] : memref<2x2x3x64x64xbf16, #tpu.memory_space<vmem>>, vector<1x1x1x64x64xbf16>
      %53 = vector.shape_cast %52 : vector<1x1x1x64x64xbf16> to vector<64x64xbf16>
      %cst_55 = arith.constant dense<0.000000e+00> : vector<2x64xf32>
      %54 = tpu.matmul %30, %53, %cst_55 {dimension_numbers = #tpu.dot_dimension_numbers<[1], [0], [0], [1], [0, 0, 1, 1], [], []>} : vector<2x64xbf16>, vector<64x64xbf16>, vector<2x64xf32> -> vector<2x64xf32>
      %55 = arith.addf %51, %54 : vector<2x64xf32>
      %c0_56 = arith.constant 0 : index
      %c1_57 = arith.constant 1 : index
      %c0_58 = arith.constant 0 : index
      %c0_59 = arith.constant 0 : index
      %c0_60 = arith.constant 0 : index
      %56 = vector.load %arg2[%c0_56, %c1_57, %c0_58, %c0_59, %c0_60] : memref<2x2x3x64x64xbf16, #tpu.memory_space<vmem>>, vector<1x1x1x64x64xbf16>
      %57 = vector.shape_cast %56 : vector<1x1x1x64x64xbf16> to vector<64x64xbf16>
      %cst_61 = arith.constant dense<0.000000e+00> : vector<2x64xf32>
      %58 = tpu.matmul %10, %57, %cst_61 {dimension_numbers = #tpu.dot_dimension_numbers<[1], [0], [0], [1], [0, 0, 1, 1], [], []>} : vector<2x64xbf16>, vector<64x64xbf16>, vector<2x64xf32> -> vector<2x64xf32>
      %59 = arith.addf %55, %58 : vector<2x64xf32>
      %c0_62 = arith.constant 0 : index
      %c1_63 = arith.constant 1 : index
      %c1_64 = arith.constant 1 : index
      %c0_65 = arith.constant 0 : index
      %c0_66 = arith.constant 0 : index
      %60 = vector.load %arg2[%c0_62, %c1_63, %c1_64, %c0_65, %c0_66] : memref<2x2x3x64x64xbf16, #tpu.memory_space<vmem>>, vector<1x1x1x64x64xbf16>
      %61 = vector.shape_cast %60 : vector<1x1x1x64x64xbf16> to vector<64x64xbf16>
      %cst_67 = arith.constant dense<0.000000e+00> : vector<2x64xf32>
      %62 = tpu.matmul %14, %61, %cst_67 {dimension_numbers = #tpu.dot_dimension_numbers<[1], [0], [0], [1], [0, 0, 1, 1], [], []>} : vector<2x64xbf16>, vector<64x64xbf16>, vector<2x64xf32> -> vector<2x64xf32>
      %63 = arith.addf %59, %62 : vector<2x64xf32>
      %c0_68 = arith.constant 0 : index
      %c1_69 = arith.constant 1 : index
      %c2_70 = arith.constant 2 : index
      %c0_71 = arith.constant 0 : index
      %c0_72 = arith.constant 0 : index
      %64 = vector.load %arg2[%c0_68, %c1_69, %c2_70, %c0_71, %c0_72] : memref<2x2x3x64x64xbf16, #tpu.memory_space<vmem>>, vector<1x1x1x64x64xbf16>
      %65 = vector.shape_cast %64 : vector<1x1x1x64x64xbf16> to vector<64x64xbf16>
      %cst_73 = arith.constant dense<0.000000e+00> : vector<2x64xf32>
      %66 = tpu.matmul %18, %65, %cst_73 {dimension_numbers = #tpu.dot_dimension_numbers<[1], [0], [0], [1], [0, 0, 1, 1], [], []>} : vector<2x64xbf16>, vector<64x64xbf16>, vector<2x64xf32> -> vector<2x64xf32>
      %67 = arith.addf %63, %66 : vector<2x64xf32>
      %68 = vector.broadcast %5 : vector<1x64xf32> to vector<2x64xf32>
      %69 = arith.addf %67, %68 : vector<2x64xf32>
      %cst_74 = arith.constant 0.000000e+00 : f32
      %70 = vector.broadcast %cst_74 : f32 to vector<2x64xf32>
      %71 = arith.cmpf oge, %69, %70 : vector<2x64xf32>
      %cst_75 = arith.constant 2.000000e-01 : f32
      %72 = vector.broadcast %cst_75 : f32 to vector<2x64xf32>
      %73 = arith.mulf %72, %69 : vector<2x64xf32>
      %74 = arith.select %71, %69, %73 : vector<2x64xi1>, vector<2x64xf32>
      %75 = arith.truncf %74 : vector<2x64xf32> to vector<2x64xbf16>
      %c0_76 = arith.constant 0 : index
      %76 = arith.index_cast %arg6 : i32 to index
      %c0_77 = arith.constant 0 : index
      %c0_78 = arith.constant 0 : index
      %c0_79 = arith.constant 0 : index
      %77 = vector.load %arg4[%c0_76, %76, %c0_77, %c0_78, %c0_79] : memref<1x2x2x2x64xbf16, #tpu.memory_space<vmem>>, vector<1x1x1x2x64xbf16>
      %78 = vector.shape_cast %77 : vector<1x1x1x2x64xbf16> to vector<2x64xbf16>
      %79 = vector.shape_cast %75 : vector<2x64xbf16> to vector<1x1x1x2x64xbf16>
      tpu.vector_store %arg4[%c0_76, %76, %c0_77, %c0_78, %c0_79], %79 {strides = array<i32>} : memref<1x2x2x2x64xbf16, #tpu.memory_space<vmem>>, vector<1x1x1x2x64xbf16>,
      %cst_80 = arith.constant 0.000000e+00 : f32
      %80 = vector.broadcast %cst_80 : f32 to vector<2x64xf32>
      %c1_81 = arith.constant 1 : index
      %c0_82 = arith.constant 0 : index
      %c0_83 = arith.constant 0 : index
      %c0_84 = arith.constant 0 : index
      %c0_85 = arith.constant 0 : index
      %81 = vector.load %arg2[%c1_81, %c0_82, %c0_83, %c0_84, %c0_85] : memref<2x2x3x64x64xbf16, #tpu.memory_space<vmem>>, vector<1x1x1x64x64xbf16>
      %82 = vector.shape_cast %81 : vector<1x1x1x64x64xbf16> to vector<64x64xbf16>
      %cst_86 = arith.constant dense<0.000000e+00> : vector<2x64xf32>
      %83 = tpu.matmul %34, %82, %cst_86 {dimension_numbers = #tpu.dot_dimension_numbers<[1], [0], [0], [1], [0, 0, 1, 1], [], []>} : vector<2x64xbf16>, vector<64x64xbf16>, vector<2x64xf32> -> vector<2x64xf32>
      %84 = arith.addf %80, %83 : vector<2x64xf32>
      %c1_87 = arith.constant 1 : index
      %c0_88 = arith.constant 0 : index
      %c1_89 = arith.constant 1 : index
      %c0_90 = arith.constant 0 : index
      %c0_91 = arith.constant 0 : index
      %85 = vector.load %arg2[%c1_87, %c0_88, %c1_89, %c0_90, %c0_91] : memref<2x2x3x64x64xbf16, #tpu.memory_space<vmem>>, vector<1x1x1x64x64xbf16>
      %86 = vector.shape_cast %85 : vector<1x1x1x64x64xbf16> to vector<64x64xbf16>
      %cst_92 = arith.constant dense<0.000000e+00> : vector<2x64xf32>
      %87 = tpu.matmul %38, %86, %cst_92 {dimension_numbers = #tpu.dot_dimension_numbers<[1], [0], [0], [1], [0, 0, 1, 1], [], []>} : vector<2x64xbf16>, vector<64x64xbf16>, vector<2x64xf32> -> vector<2x64xf32>
      %88 = arith.addf %84, %87 : vector<2x64xf32>
      %c1_93 = arith.constant 1 : index
      %c0_94 = arith.constant 0 : index
      %c2_95 = arith.constant 2 : index
      %c0_96 = arith.constant 0 : index
      %c0_97 = arith.constant 0 : index
      %89 = vector.load %arg2[%c1_93, %c0_94, %c2_95, %c0_96, %c0_97] : memref<2x2x3x64x64xbf16, #tpu.memory_space<vmem>>, vector<1x1x1x64x64xbf16>
      %90 = vector.shape_cast %89 : vector<1x1x1x64x64xbf16> to vector<64x64xbf16>
      %cst_98 = arith.constant dense<0.000000e+00> : vector<2x64xf32>
      %91 = tpu.matmul %42, %90, %cst_98 {dimension_numbers = #tpu.dot_dimension_numbers<[1], [0], [0], [1], [0, 0, 1, 1], [], []>} : vector<2x64xbf16>, vector<64x64xbf16>, vector<2x64xf32> -> vector<2x64xf32>
      %92 = arith.addf %88, %91 : vector<2x64xf32>
      %c1_99 = arith.constant 1 : index
      %c1_100 = arith.constant 1 : index
      %c0_101 = arith.constant 0 : index
      %c0_102 = arith.constant 0 : index
      %c0_103 = arith.constant 0 : index
      %93 = vector.load %arg2[%c1_99, %c1_100, %c0_101, %c0_102, %c0_103] : memref<2x2x3x64x64xbf16, #tpu.memory_space<vmem>>, vector<1x1x1x64x64xbf16>
      %94 = vector.shape_cast %93 : vector<1x1x1x64x64xbf16> to vector<64x64xbf16>
      %cst_104 = arith.constant dense<0.000000e+00> : vector<2x64xf32>
      %95 = tpu.matmul %22, %94, %cst_104 {dimension_numbers = #tpu.dot_dimension_numbers<[1], [0], [0], [1], [0, 0, 1, 1], [], []>} : vector<2x64xbf16>, vector<64x64xbf16>, vector<2x64xf32> -> vector<2x64xf32>
      %96 = arith.addf %92, %95 : vector<2x64xf32>
      %c1_105 = arith.constant 1 : index
      %c1_106 = arith.constant 1 : index
      %c1_107 = arith.constant 1 : index
      %c0_108 = arith.constant 0 : index
      %c0_109 = arith.constant 0 : index
      %97 = vector.load %arg2[%c1_105, %c1_106, %c1_107, %c0_108, %c0_109] : memref<2x2x3x64x64xbf16, #tpu.memory_space<vmem>>, vector<1x1x1x64x64xbf16>
      %98 = vector.shape_cast %97 : vector<1x1x1x64x64xbf16> to vector<64x64xbf16>
      %cst_110 = arith.constant dense<0.000000e+00> : vector<2x64xf32>
      %99 = tpu.matmul %26, %98, %cst_110 {dimension_numbers = #tpu.dot_dimension_numbers<[1], [0], [0], [1], [0, 0, 1, 1], [], []>} : vector<2x64xbf16>, vector<64x64xbf16>, vector<2x64xf32> -> vector<2x64xf32>
      %100 = arith.addf %96, %99 : vector<2x64xf32>
      %c1_111 = arith.constant 1 : index
      %c1_112 = arith.constant 1 : index
      %c2_113 = arith.constant 2 : index
      %c0_114 = arith.constant 0 : index
      %c0_115 = arith.constant 0 : index
      %101 = vector.load %arg2[%c1_111, %c1_112, %c2_113, %c0_114, %c0_115] : memref<2x2x3x64x64xbf16, #tpu.memory_space<vmem>>, vector<1x1x1x64x64xbf16>
      %102 = vector.shape_cast %101 : vector<1x1x1x64x64xbf16> to vector<64x64xbf16>
      %cst_116 = arith.constant dense<0.000000e+00> : vector<2x64xf32>
      %103 = tpu.matmul %30, %102, %cst_116 {dimension_numbers = #tpu.dot_dimension_numbers<[1], [0], [0], [1], [0, 0, 1, 1], [], []>} : vector<2x64xbf16>, vector<64x64xbf16>, vector<2x64xf32> -> vector<2x64xf32>
      %104 = arith.addf %100, %103 : vector<2x64xf32>
      %105 = vector.broadcast %5 : vector<1x64xf32> to vector<2x64xf32>
      %106 = arith.addf %104, %105 : vector<2x64xf32>
      %cst_117 = arith.constant 0.000000e+00 : f32
      %107 = vector.broadcast %cst_117 : f32 to vector<2x64xf32>
      %108 = arith.cmpf oge, %106, %107 : vector<2x64xf32>
      %cst_118 = arith.constant 2.000000e-01 : f32
      %109 = vector.broadcast %cst_118 : f32 to vector<2x64xf32>
      %110 = arith.mulf %109, %106 : vector<2x64xf32>
      %111 = arith.select %108, %106, %110 : vector<2x64xi1>, vector<2x64xf32>
      %112 = arith.truncf %111 : vector<2x64xf32> to vector<2x64xbf16>
      %c0_119 = arith.constant 0 : index
      %113 = arith.index_cast %arg6 : i32 to index
      %c1_120 = arith.constant 1 : index
      %c0_121 = arith.constant 0 : index
      %c0_122 = arith.constant 0 : index
      %114 = vector.load %arg4[%c0_119, %113, %c1_120, %c0_121, %c0_122] : memref<1x2x2x2x64xbf16, #tpu.memory_space<vmem>>, vector<1x1x1x2x64xbf16>
      %115 = vector.shape_cast %114 : vector<1x1x1x2x64xbf16> to vector<2x64xbf16>
      %116 = vector.shape_cast %112 : vector<2x64xbf16> to vector<1x1x1x2x64xbf16>
      tpu.vector_store %arg4[%c0_119, %113, %c1_120, %c0_121, %c0_122], %116 {strides = array<i32>} : memref<1x2x2x2x64xbf16, #tpu.memory_space<vmem>>, vector<1x1x1x2x64xbf16>,
    }
    %c2_i32_10 = arith.constant 2 : i32
    return
  }
  func.func @transform_0(%arg0: i32) -> (i32, i32, i32, i32) {
    %c0_i32 = arith.constant 0 : i32
    %c0_i32_0 = arith.constant 0 : i32
    %c0_i32_1 = arith.constant 0 : i32
    %c0_i32_2 = arith.constant 0 : i32
    return %arg0, %c0_i32, %c0_i32_0, %c0_i32_1 : i32, i32, i32, i32
  }
  func.func @transform_1(%arg0: i32) -> (i32, i32, i32, i32, i32) {
    %c0_i32 = arith.constant 0 : i32
    %c0_i32_0 = arith.constant 0 : i32
    %c0_i32_1 = arith.constant 0 : i32
    %c0_i32_2 = arith.constant 0 : i32
    %c0_i32_3 = arith.constant 0 : i32
    %c0_i32_4 = arith.constant 0 : i32
    return %c0_i32, %c0_i32_0, %c0_i32_1, %c0_i32_2, %c0_i32_3 : i32, i32, i32, i32, i32
  }
  func.func @transform_2(%arg0: i32) -> (i32, i32) {
    %c0_i32 = arith.constant 0 : i32
    %c0_i32_0 = arith.constant 0 : i32
    %c0_i32_1 = arith.constant 0 : i32
    return %c0_i32, %c0_i32_0 : i32, i32
  }
  func.func @transform_3(%arg0: i32) -> (i32, i32, i32, i32, i32) {
    %c0_i32 = arith.constant 0 : i32
    %c0_i32_0 = arith.constant 0 : i32
    %c0_i32_1 = arith.constant 0 : i32
    %c0_i32_2 = arith.constant 0 : i32
    %c0_i32_3 = arith.constant 0 : i32
    return %arg0, %c0_i32, %c0_i32_0, %c0_i32_1, %c0_i32_2 : i32, i32, i32, i32, i32
  }
}

module attributes {stable_mosaic.version = 11 : i64} {
  func.func @_tconv_kernel(%arg0: i32, %arg1: memref<1x4x4x32xbf16, #tpu.memory_space<vmem>>, %arg2: memref<2x2x3x32x32xbf16, #tpu.memory_space<vmem>>, %arg3: memref<1x32xf32, #tpu.memory_space<vmem>>, %arg4: memref<1x4x2x4x32xbf16, #tpu.memory_space<vmem>>, %arg5: memref<6x6x32xbf16, #tpu.memory_space<vmem>>) attributes {dimension_semantics = [#tpu.dimension_semantics<parallel>], iteration_bounds = array<i64: 2>, scalar_prefetch = 0 : i64, scratch_operands = 1 : i64, tpu.core_type = #tpu.core_type<tc>, window_params = [{transform_indices = @transform_0, window_bounds = array<i64: 1, 4, 4, 32>}, {pipeline_mode = #tpu.pipeline_mode<synchronous>, transform_indices = @transform_1, window_bounds = array<i64: 2, 2, 3, 32, 32>}, {pipeline_mode = #tpu.pipeline_mode<synchronous>, transform_indices = @transform_2, window_bounds = array<i64: 1, 32>}, {transform_indices = @transform_3, window_bounds = array<i64: 1, 4, 2, 4, 32>}]} {
    %cst = arith.constant 0.000000e+00 : bf16
    %0 = vector.broadcast %cst : bf16 to vector<6x6x32xbf16>
    %c0 = arith.constant 0 : index
    %c0_0 = arith.constant 0 : index
    %c0_1 = arith.constant 0 : index
    %1 = vector.load %arg5[%c0, %c0_0, %c0_1] : memref<6x6x32xbf16, #tpu.memory_space<vmem>>, vector<6x6x32xbf16>
    tpu.vector_store %arg5[%c0, %c0_0, %c0_1], %0 {strides = array<i32>} : memref<6x6x32xbf16, #tpu.memory_space<vmem>>, vector<6x6x32xbf16>,
    %c0_2 = arith.constant 0 : index
    %c0_3 = arith.constant 0 : index
    %c0_4 = arith.constant 0 : index
    %c0_5 = arith.constant 0 : index
    %2 = vector.load %arg1[%c0_2, %c0_3, %c0_4, %c0_5] : memref<1x4x4x32xbf16, #tpu.memory_space<vmem>>, vector<1x4x4x32xbf16>
    %3 = vector.shape_cast %2 : vector<1x4x4x32xbf16> to vector<4x4x32xbf16>
    %c1 = arith.constant 1 : index
    %c1_6 = arith.constant 1 : index
    %c0_7 = arith.constant 0 : index
    %4 = vector.load %arg5[%c1, %c1_6, %c0_7] : memref<6x6x32xbf16, #tpu.memory_space<vmem>>, vector<4x4x32xbf16>
    tpu.vector_store %arg5[%c1, %c1_6, %c0_7], %3 {strides = array<i32>} : memref<6x6x32xbf16, #tpu.memory_space<vmem>>, vector<4x4x32xbf16>,
    %c0_8 = arith.constant 0 : index
    %c0_9 = arith.constant 0 : index
    %5 = vector.load %arg3[%c0_8, %c0_9] : memref<1x32xf32, #tpu.memory_space<vmem>>, vector<1x32xf32>
    %c0_i32 = arith.constant 0 : i32
    %c4_i32 = arith.constant 4 : i32
    %6 = arith.addi %c0_i32, %c4_i32 : i32
    %c1_i32 = arith.constant 1 : i32
    scf.for %arg6 = %c0_i32 to %6 step %c1_i32  : i32 {
      %c0_i32_11 = arith.constant 0 : i32
      %7 = arith.addi %arg6, %c0_i32_11 : i32
      %8 = arith.index_cast %7 : i32 to index
      %c0_12 = arith.constant 0 : index
      %c0_13 = arith.constant 0 : index
      %9 = vector.load %arg5[%8, %c0_12, %c0_13] : memref<6x6x32xbf16, #tpu.memory_space<vmem>>, vector<1x4x32xbf16>
      %10 = vector.shape_cast %9 : vector<1x4x32xbf16> to vector<4x32xbf16>
      %c0_i32_14 = arith.constant 0 : i32
      %11 = arith.addi %arg6, %c0_i32_14 : i32
      %12 = arith.index_cast %11 : i32 to index
      %c1_15 = arith.constant 1 : index
      %c0_16 = arith.constant 0 : index
      %13 = vector.load %arg5[%12, %c1_15, %c0_16] : memref<6x6x32xbf16, #tpu.memory_space<vmem>>, vector<1x4x32xbf16>
      %14 = vector.shape_cast %13 : vector<1x4x32xbf16> to vector<4x32xbf16>
      %c0_i32_17 = arith.constant 0 : i32
      %15 = arith.addi %arg6, %c0_i32_17 : i32
      %16 = arith.index_cast %15 : i32 to index
      %c2 = arith.constant 2 : index
      %c0_18 = arith.constant 0 : index
      %17 = vector.load %arg5[%16, %c2, %c0_18] : memref<6x6x32xbf16, #tpu.memory_space<vmem>>, vector<1x4x32xbf16>
      %18 = vector.shape_cast %17 : vector<1x4x32xbf16> to vector<4x32xbf16>
      %c1_i32_19 = arith.constant 1 : i32
      %19 = arith.addi %arg6, %c1_i32_19 : i32
      %20 = arith.index_cast %19 : i32 to index
      %c0_20 = arith.constant 0 : index
      %c0_21 = arith.constant 0 : index
      %21 = vector.load %arg5[%20, %c0_20, %c0_21] : memref<6x6x32xbf16, #tpu.memory_space<vmem>>, vector<1x4x32xbf16>
      %22 = vector.shape_cast %21 : vector<1x4x32xbf16> to vector<4x32xbf16>
      %c1_i32_22 = arith.constant 1 : i32
      %23 = arith.addi %arg6, %c1_i32_22 : i32
      %24 = arith.index_cast %23 : i32 to index
      %c1_23 = arith.constant 1 : index
      %c0_24 = arith.constant 0 : index
      %25 = vector.load %arg5[%24, %c1_23, %c0_24] : memref<6x6x32xbf16, #tpu.memory_space<vmem>>, vector<1x4x32xbf16>
      %26 = vector.shape_cast %25 : vector<1x4x32xbf16> to vector<4x32xbf16>
      %c1_i32_25 = arith.constant 1 : i32
      %27 = arith.addi %arg6, %c1_i32_25 : i32
      %28 = arith.index_cast %27 : i32 to index
      %c2_26 = arith.constant 2 : index
      %c0_27 = arith.constant 0 : index
      %29 = vector.load %arg5[%28, %c2_26, %c0_27] : memref<6x6x32xbf16, #tpu.memory_space<vmem>>, vector<1x4x32xbf16>
      %30 = vector.shape_cast %29 : vector<1x4x32xbf16> to vector<4x32xbf16>
      %c2_i32 = arith.constant 2 : i32
      %31 = arith.addi %arg6, %c2_i32 : i32
      %32 = arith.index_cast %31 : i32 to index
      %c0_28 = arith.constant 0 : index
      %c0_29 = arith.constant 0 : index
      %33 = vector.load %arg5[%32, %c0_28, %c0_29] : memref<6x6x32xbf16, #tpu.memory_space<vmem>>, vector<1x4x32xbf16>
      %34 = vector.shape_cast %33 : vector<1x4x32xbf16> to vector<4x32xbf16>
      %c2_i32_30 = arith.constant 2 : i32
      %35 = arith.addi %arg6, %c2_i32_30 : i32
      %36 = arith.index_cast %35 : i32 to index
      %c1_31 = arith.constant 1 : index
      %c0_32 = arith.constant 0 : index
      %37 = vector.load %arg5[%36, %c1_31, %c0_32] : memref<6x6x32xbf16, #tpu.memory_space<vmem>>, vector<1x4x32xbf16>
      %38 = vector.shape_cast %37 : vector<1x4x32xbf16> to vector<4x32xbf16>
      %c2_i32_33 = arith.constant 2 : i32
      %39 = arith.addi %arg6, %c2_i32_33 : i32
      %40 = arith.index_cast %39 : i32 to index
      %c2_34 = arith.constant 2 : index
      %c0_35 = arith.constant 0 : index
      %41 = vector.load %arg5[%40, %c2_34, %c0_35] : memref<6x6x32xbf16, #tpu.memory_space<vmem>>, vector<1x4x32xbf16>
      %42 = vector.shape_cast %41 : vector<1x4x32xbf16> to vector<4x32xbf16>
      %cst_36 = arith.constant 0.000000e+00 : f32
      %43 = vector.broadcast %cst_36 : f32 to vector<4x32xf32>
      %c0_37 = arith.constant 0 : index
      %c0_38 = arith.constant 0 : index
      %c0_39 = arith.constant 0 : index
      %c0_40 = arith.constant 0 : index
      %c0_41 = arith.constant 0 : index
      %44 = vector.load %arg2[%c0_37, %c0_38, %c0_39, %c0_40, %c0_41] : memref<2x2x3x32x32xbf16, #tpu.memory_space<vmem>>, vector<1x1x1x32x32xbf16>
      %45 = vector.shape_cast %44 : vector<1x1x1x32x32xbf16> to vector<32x32xbf16>
      %cst_42 = arith.constant dense<0.000000e+00> : vector<4x32xf32>
      %46 = tpu.matmul %22, %45, %cst_42 {dimension_numbers = #tpu.dot_dimension_numbers<[1], [0], [0], [1], [0, 0, 1, 1], [], []>} : vector<4x32xbf16>, vector<32x32xbf16>, vector<4x32xf32> -> vector<4x32xf32>
      %47 = arith.addf %43, %46 : vector<4x32xf32>
      %c0_43 = arith.constant 0 : index
      %c0_44 = arith.constant 0 : index
      %c1_45 = arith.constant 1 : index
      %c0_46 = arith.constant 0 : index
      %c0_47 = arith.constant 0 : index
      %48 = vector.load %arg2[%c0_43, %c0_44, %c1_45, %c0_46, %c0_47] : memref<2x2x3x32x32xbf16, #tpu.memory_space<vmem>>, vector<1x1x1x32x32xbf16>
      %49 = vector.shape_cast %48 : vector<1x1x1x32x32xbf16> to vector<32x32xbf16>
      %cst_48 = arith.constant dense<0.000000e+00> : vector<4x32xf32>
      %50 = tpu.matmul %26, %49, %cst_48 {dimension_numbers = #tpu.dot_dimension_numbers<[1], [0], [0], [1], [0, 0, 1, 1], [], []>} : vector<4x32xbf16>, vector<32x32xbf16>, vector<4x32xf32> -> vector<4x32xf32>
      %51 = arith.addf %47, %50 : vector<4x32xf32>
      %c0_49 = arith.constant 0 : index
      %c0_50 = arith.constant 0 : index
      %c2_51 = arith.constant 2 : index
      %c0_52 = arith.constant 0 : index
      %c0_53 = arith.constant 0 : index
      %52 = vector.load %arg2[%c0_49, %c0_50, %c2_51, %c0_52, %c0_53] : memref<2x2x3x32x32xbf16, #tpu.memory_space<vmem>>, vector<1x1x1x32x32xbf16>
      %53 = vector.shape_cast %52 : vector<1x1x1x32x32xbf16> to vector<32x32xbf16>
      %cst_54 = arith.constant dense<0.000000e+00> : vector<4x32xf32>
      %54 = tpu.matmul %30, %53, %cst_54 {dimension_numbers = #tpu.dot_dimension_numbers<[1], [0], [0], [1], [0, 0, 1, 1], [], []>} : vector<4x32xbf16>, vector<32x32xbf16>, vector<4x32xf32> -> vector<4x32xf32>
      %55 = arith.addf %51, %54 : vector<4x32xf32>
      %c0_55 = arith.constant 0 : index
      %c1_56 = arith.constant 1 : index
      %c0_57 = arith.constant 0 : index
      %c0_58 = arith.constant 0 : index
      %c0_59 = arith.constant 0 : index
      %56 = vector.load %arg2[%c0_55, %c1_56, %c0_57, %c0_58, %c0_59] : memref<2x2x3x32x32xbf16, #tpu.memory_space<vmem>>, vector<1x1x1x32x32xbf16>
      %57 = vector.shape_cast %56 : vector<1x1x1x32x32xbf16> to vector<32x32xbf16>
      %cst_60 = arith.constant dense<0.000000e+00> : vector<4x32xf32>
      %58 = tpu.matmul %10, %57, %cst_60 {dimension_numbers = #tpu.dot_dimension_numbers<[1], [0], [0], [1], [0, 0, 1, 1], [], []>} : vector<4x32xbf16>, vector<32x32xbf16>, vector<4x32xf32> -> vector<4x32xf32>
      %59 = arith.addf %55, %58 : vector<4x32xf32>
      %c0_61 = arith.constant 0 : index
      %c1_62 = arith.constant 1 : index
      %c1_63 = arith.constant 1 : index
      %c0_64 = arith.constant 0 : index
      %c0_65 = arith.constant 0 : index
      %60 = vector.load %arg2[%c0_61, %c1_62, %c1_63, %c0_64, %c0_65] : memref<2x2x3x32x32xbf16, #tpu.memory_space<vmem>>, vector<1x1x1x32x32xbf16>
      %61 = vector.shape_cast %60 : vector<1x1x1x32x32xbf16> to vector<32x32xbf16>
      %cst_66 = arith.constant dense<0.000000e+00> : vector<4x32xf32>
      %62 = tpu.matmul %14, %61, %cst_66 {dimension_numbers = #tpu.dot_dimension_numbers<[1], [0], [0], [1], [0, 0, 1, 1], [], []>} : vector<4x32xbf16>, vector<32x32xbf16>, vector<4x32xf32> -> vector<4x32xf32>
      %63 = arith.addf %59, %62 : vector<4x32xf32>
      %c0_67 = arith.constant 0 : index
      %c1_68 = arith.constant 1 : index
      %c2_69 = arith.constant 2 : index
      %c0_70 = arith.constant 0 : index
      %c0_71 = arith.constant 0 : index
      %64 = vector.load %arg2[%c0_67, %c1_68, %c2_69, %c0_70, %c0_71] : memref<2x2x3x32x32xbf16, #tpu.memory_space<vmem>>, vector<1x1x1x32x32xbf16>
      %65 = vector.shape_cast %64 : vector<1x1x1x32x32xbf16> to vector<32x32xbf16>
      %cst_72 = arith.constant dense<0.000000e+00> : vector<4x32xf32>
      %66 = tpu.matmul %18, %65, %cst_72 {dimension_numbers = #tpu.dot_dimension_numbers<[1], [0], [0], [1], [0, 0, 1, 1], [], []>} : vector<4x32xbf16>, vector<32x32xbf16>, vector<4x32xf32> -> vector<4x32xf32>
      %67 = arith.addf %63, %66 : vector<4x32xf32>
      %68 = vector.broadcast %5 : vector<1x32xf32> to vector<4x32xf32>
      %69 = arith.addf %67, %68 : vector<4x32xf32>
      %cst_73 = arith.constant 0.000000e+00 : f32
      %70 = vector.broadcast %cst_73 : f32 to vector<4x32xf32>
      %71 = arith.cmpf oge, %69, %70 : vector<4x32xf32>
      %cst_74 = arith.constant 2.000000e-01 : f32
      %72 = vector.broadcast %cst_74 : f32 to vector<4x32xf32>
      %73 = arith.mulf %72, %69 : vector<4x32xf32>
      %74 = arith.select %71, %69, %73 : vector<4x32xi1>, vector<4x32xf32>
      %75 = arith.truncf %74 : vector<4x32xf32> to vector<4x32xbf16>
      %c0_75 = arith.constant 0 : index
      %76 = arith.index_cast %arg6 : i32 to index
      %c0_76 = arith.constant 0 : index
      %c0_77 = arith.constant 0 : index
      %c0_78 = arith.constant 0 : index
      %77 = vector.load %arg4[%c0_75, %76, %c0_76, %c0_77, %c0_78] : memref<1x4x2x4x32xbf16, #tpu.memory_space<vmem>>, vector<1x1x1x4x32xbf16>
      %78 = vector.shape_cast %77 : vector<1x1x1x4x32xbf16> to vector<4x32xbf16>
      %79 = vector.shape_cast %75 : vector<4x32xbf16> to vector<1x1x1x4x32xbf16>
      tpu.vector_store %arg4[%c0_75, %76, %c0_76, %c0_77, %c0_78], %79 {strides = array<i32>} : memref<1x4x2x4x32xbf16, #tpu.memory_space<vmem>>, vector<1x1x1x4x32xbf16>,
      %cst_79 = arith.constant 0.000000e+00 : f32
      %80 = vector.broadcast %cst_79 : f32 to vector<4x32xf32>
      %c1_80 = arith.constant 1 : index
      %c0_81 = arith.constant 0 : index
      %c0_82 = arith.constant 0 : index
      %c0_83 = arith.constant 0 : index
      %c0_84 = arith.constant 0 : index
      %81 = vector.load %arg2[%c1_80, %c0_81, %c0_82, %c0_83, %c0_84] : memref<2x2x3x32x32xbf16, #tpu.memory_space<vmem>>, vector<1x1x1x32x32xbf16>
      %82 = vector.shape_cast %81 : vector<1x1x1x32x32xbf16> to vector<32x32xbf16>
      %cst_85 = arith.constant dense<0.000000e+00> : vector<4x32xf32>
      %83 = tpu.matmul %34, %82, %cst_85 {dimension_numbers = #tpu.dot_dimension_numbers<[1], [0], [0], [1], [0, 0, 1, 1], [], []>} : vector<4x32xbf16>, vector<32x32xbf16>, vector<4x32xf32> -> vector<4x32xf32>
      %84 = arith.addf %80, %83 : vector<4x32xf32>
      %c1_86 = arith.constant 1 : index
      %c0_87 = arith.constant 0 : index
      %c1_88 = arith.constant 1 : index
      %c0_89 = arith.constant 0 : index
      %c0_90 = arith.constant 0 : index
      %85 = vector.load %arg2[%c1_86, %c0_87, %c1_88, %c0_89, %c0_90] : memref<2x2x3x32x32xbf16, #tpu.memory_space<vmem>>, vector<1x1x1x32x32xbf16>
      %86 = vector.shape_cast %85 : vector<1x1x1x32x32xbf16> to vector<32x32xbf16>
      %cst_91 = arith.constant dense<0.000000e+00> : vector<4x32xf32>
      %87 = tpu.matmul %38, %86, %cst_91 {dimension_numbers = #tpu.dot_dimension_numbers<[1], [0], [0], [1], [0, 0, 1, 1], [], []>} : vector<4x32xbf16>, vector<32x32xbf16>, vector<4x32xf32> -> vector<4x32xf32>
      %88 = arith.addf %84, %87 : vector<4x32xf32>
      %c1_92 = arith.constant 1 : index
      %c0_93 = arith.constant 0 : index
      %c2_94 = arith.constant 2 : index
      %c0_95 = arith.constant 0 : index
      %c0_96 = arith.constant 0 : index
      %89 = vector.load %arg2[%c1_92, %c0_93, %c2_94, %c0_95, %c0_96] : memref<2x2x3x32x32xbf16, #tpu.memory_space<vmem>>, vector<1x1x1x32x32xbf16>
      %90 = vector.shape_cast %89 : vector<1x1x1x32x32xbf16> to vector<32x32xbf16>
      %cst_97 = arith.constant dense<0.000000e+00> : vector<4x32xf32>
      %91 = tpu.matmul %42, %90, %cst_97 {dimension_numbers = #tpu.dot_dimension_numbers<[1], [0], [0], [1], [0, 0, 1, 1], [], []>} : vector<4x32xbf16>, vector<32x32xbf16>, vector<4x32xf32> -> vector<4x32xf32>
      %92 = arith.addf %88, %91 : vector<4x32xf32>
      %c1_98 = arith.constant 1 : index
      %c1_99 = arith.constant 1 : index
      %c0_100 = arith.constant 0 : index
      %c0_101 = arith.constant 0 : index
      %c0_102 = arith.constant 0 : index
      %93 = vector.load %arg2[%c1_98, %c1_99, %c0_100, %c0_101, %c0_102] : memref<2x2x3x32x32xbf16, #tpu.memory_space<vmem>>, vector<1x1x1x32x32xbf16>
      %94 = vector.shape_cast %93 : vector<1x1x1x32x32xbf16> to vector<32x32xbf16>
      %cst_103 = arith.constant dense<0.000000e+00> : vector<4x32xf32>
      %95 = tpu.matmul %22, %94, %cst_103 {dimension_numbers = #tpu.dot_dimension_numbers<[1], [0], [0], [1], [0, 0, 1, 1], [], []>} : vector<4x32xbf16>, vector<32x32xbf16>, vector<4x32xf32> -> vector<4x32xf32>
      %96 = arith.addf %92, %95 : vector<4x32xf32>
      %c1_104 = arith.constant 1 : index
      %c1_105 = arith.constant 1 : index
      %c1_106 = arith.constant 1 : index
      %c0_107 = arith.constant 0 : index
      %c0_108 = arith.constant 0 : index
      %97 = vector.load %arg2[%c1_104, %c1_105, %c1_106, %c0_107, %c0_108] : memref<2x2x3x32x32xbf16, #tpu.memory_space<vmem>>, vector<1x1x1x32x32xbf16>
      %98 = vector.shape_cast %97 : vector<1x1x1x32x32xbf16> to vector<32x32xbf16>
      %cst_109 = arith.constant dense<0.000000e+00> : vector<4x32xf32>
      %99 = tpu.matmul %26, %98, %cst_109 {dimension_numbers = #tpu.dot_dimension_numbers<[1], [0], [0], [1], [0, 0, 1, 1], [], []>} : vector<4x32xbf16>, vector<32x32xbf16>, vector<4x32xf32> -> vector<4x32xf32>
      %100 = arith.addf %96, %99 : vector<4x32xf32>
      %c1_110 = arith.constant 1 : index
      %c1_111 = arith.constant 1 : index
      %c2_112 = arith.constant 2 : index
      %c0_113 = arith.constant 0 : index
      %c0_114 = arith.constant 0 : index
      %101 = vector.load %arg2[%c1_110, %c1_111, %c2_112, %c0_113, %c0_114] : memref<2x2x3x32x32xbf16, #tpu.memory_space<vmem>>, vector<1x1x1x32x32xbf16>
      %102 = vector.shape_cast %101 : vector<1x1x1x32x32xbf16> to vector<32x32xbf16>
      %cst_115 = arith.constant dense<0.000000e+00> : vector<4x32xf32>
      %103 = tpu.matmul %30, %102, %cst_115 {dimension_numbers = #tpu.dot_dimension_numbers<[1], [0], [0], [1], [0, 0, 1, 1], [], []>} : vector<4x32xbf16>, vector<32x32xbf16>, vector<4x32xf32> -> vector<4x32xf32>
      %104 = arith.addf %100, %103 : vector<4x32xf32>
      %105 = vector.broadcast %5 : vector<1x32xf32> to vector<4x32xf32>
      %106 = arith.addf %104, %105 : vector<4x32xf32>
      %cst_116 = arith.constant 0.000000e+00 : f32
      %107 = vector.broadcast %cst_116 : f32 to vector<4x32xf32>
      %108 = arith.cmpf oge, %106, %107 : vector<4x32xf32>
      %cst_117 = arith.constant 2.000000e-01 : f32
      %109 = vector.broadcast %cst_117 : f32 to vector<4x32xf32>
      %110 = arith.mulf %109, %106 : vector<4x32xf32>
      %111 = arith.select %108, %106, %110 : vector<4x32xi1>, vector<4x32xf32>
      %112 = arith.truncf %111 : vector<4x32xf32> to vector<4x32xbf16>
      %c0_118 = arith.constant 0 : index
      %113 = arith.index_cast %arg6 : i32 to index
      %c1_119 = arith.constant 1 : index
      %c0_120 = arith.constant 0 : index
      %c0_121 = arith.constant 0 : index
      %114 = vector.load %arg4[%c0_118, %113, %c1_119, %c0_120, %c0_121] : memref<1x4x2x4x32xbf16, #tpu.memory_space<vmem>>, vector<1x1x1x4x32xbf16>
      %115 = vector.shape_cast %114 : vector<1x1x1x4x32xbf16> to vector<4x32xbf16>
      %116 = vector.shape_cast %112 : vector<4x32xbf16> to vector<1x1x1x4x32xbf16>
      tpu.vector_store %arg4[%c0_118, %113, %c1_119, %c0_120, %c0_121], %116 {strides = array<i32>} : memref<1x4x2x4x32xbf16, #tpu.memory_space<vmem>>, vector<1x1x1x4x32xbf16>,
    }
    %c4_i32_10 = arith.constant 4 : i32
    return
  }
  func.func @transform_0(%arg0: i32) -> (i32, i32, i32, i32) {
    %c0_i32 = arith.constant 0 : i32
    %c0_i32_0 = arith.constant 0 : i32
    %c0_i32_1 = arith.constant 0 : i32
    %c0_i32_2 = arith.constant 0 : i32
    return %arg0, %c0_i32, %c0_i32_0, %c0_i32_1 : i32, i32, i32, i32
  }
  func.func @transform_1(%arg0: i32) -> (i32, i32, i32, i32, i32) {
    %c0_i32 = arith.constant 0 : i32
    %c0_i32_0 = arith.constant 0 : i32
    %c0_i32_1 = arith.constant 0 : i32
    %c0_i32_2 = arith.constant 0 : i32
    %c0_i32_3 = arith.constant 0 : i32
    %c0_i32_4 = arith.constant 0 : i32
    return %c0_i32, %c0_i32_0, %c0_i32_1, %c0_i32_2, %c0_i32_3 : i32, i32, i32, i32, i32
  }
  func.func @transform_2(%arg0: i32) -> (i32, i32) {
    %c0_i32 = arith.constant 0 : i32
    %c0_i32_0 = arith.constant 0 : i32
    %c0_i32_1 = arith.constant 0 : i32
    return %c0_i32, %c0_i32_0 : i32, i32
  }
  func.func @transform_3(%arg0: i32) -> (i32, i32, i32, i32, i32) {
    %c0_i32 = arith.constant 0 : i32
    %c0_i32_0 = arith.constant 0 : i32
    %c0_i32_1 = arith.constant 0 : i32
    %c0_i32_2 = arith.constant 0 : i32
    %c0_i32_3 = arith.constant 0 : i32
    return %arg0, %c0_i32, %c0_i32_0, %c0_i32_1, %c0_i32_2 : i32, i32, i32, i32, i32
  }
}

module attributes {stable_mosaic.version = 11 : i64} {
  func.func @_tconv_kernel(%arg0: i32, %arg1: memref<1x8x8x16xbf16, #tpu.memory_space<vmem>>, %arg2: memref<2x2x3x16x16xbf16, #tpu.memory_space<vmem>>, %arg3: memref<1x16xf32, #tpu.memory_space<vmem>>, %arg4: memref<1x8x2x8x16xbf16, #tpu.memory_space<vmem>>, %arg5: memref<10x10x16xbf16, #tpu.memory_space<vmem>>) attributes {dimension_semantics = [#tpu.dimension_semantics<parallel>], iteration_bounds = array<i64: 2>, scalar_prefetch = 0 : i64, scratch_operands = 1 : i64, tpu.core_type = #tpu.core_type<tc>, window_params = [{transform_indices = @transform_0, window_bounds = array<i64: 1, 8, 8, 16>}, {pipeline_mode = #tpu.pipeline_mode<synchronous>, transform_indices = @transform_1, window_bounds = array<i64: 2, 2, 3, 16, 16>}, {pipeline_mode = #tpu.pipeline_mode<synchronous>, transform_indices = @transform_2, window_bounds = array<i64: 1, 16>}, {transform_indices = @transform_3, window_bounds = array<i64: 1, 8, 2, 8, 16>}]} {
    %cst = arith.constant 0.000000e+00 : bf16
    %0 = vector.broadcast %cst : bf16 to vector<10x10x16xbf16>
    %c0 = arith.constant 0 : index
    %c0_0 = arith.constant 0 : index
    %c0_1 = arith.constant 0 : index
    %1 = vector.load %arg5[%c0, %c0_0, %c0_1] : memref<10x10x16xbf16, #tpu.memory_space<vmem>>, vector<10x10x16xbf16>
    tpu.vector_store %arg5[%c0, %c0_0, %c0_1], %0 {strides = array<i32>} : memref<10x10x16xbf16, #tpu.memory_space<vmem>>, vector<10x10x16xbf16>,
    %c0_2 = arith.constant 0 : index
    %c0_3 = arith.constant 0 : index
    %c0_4 = arith.constant 0 : index
    %c0_5 = arith.constant 0 : index
    %2 = vector.load %arg1[%c0_2, %c0_3, %c0_4, %c0_5] : memref<1x8x8x16xbf16, #tpu.memory_space<vmem>>, vector<1x8x8x16xbf16>
    %3 = vector.shape_cast %2 : vector<1x8x8x16xbf16> to vector<8x8x16xbf16>
    %c1 = arith.constant 1 : index
    %c1_6 = arith.constant 1 : index
    %c0_7 = arith.constant 0 : index
    %4 = vector.load %arg5[%c1, %c1_6, %c0_7] : memref<10x10x16xbf16, #tpu.memory_space<vmem>>, vector<8x8x16xbf16>
    tpu.vector_store %arg5[%c1, %c1_6, %c0_7], %3 {strides = array<i32>} : memref<10x10x16xbf16, #tpu.memory_space<vmem>>, vector<8x8x16xbf16>,
    %c0_8 = arith.constant 0 : index
    %c0_9 = arith.constant 0 : index
    %5 = vector.load %arg3[%c0_8, %c0_9] : memref<1x16xf32, #tpu.memory_space<vmem>>, vector<1x16xf32>
    %c0_i32 = arith.constant 0 : i32
    %c8_i32 = arith.constant 8 : i32
    %6 = arith.addi %c0_i32, %c8_i32 : i32
    %c1_i32 = arith.constant 1 : i32
    scf.for %arg6 = %c0_i32 to %6 step %c1_i32  : i32 {
      %c0_i32_11 = arith.constant 0 : i32
      %7 = arith.addi %arg6, %c0_i32_11 : i32
      %8 = arith.index_cast %7 : i32 to index
      %c0_12 = arith.constant 0 : index
      %c0_13 = arith.constant 0 : index
      %9 = vector.load %arg5[%8, %c0_12, %c0_13] : memref<10x10x16xbf16, #tpu.memory_space<vmem>>, vector<1x8x16xbf16>
      %10 = vector.shape_cast %9 : vector<1x8x16xbf16> to vector<8x16xbf16>
      %c0_i32_14 = arith.constant 0 : i32
      %11 = arith.addi %arg6, %c0_i32_14 : i32
      %12 = arith.index_cast %11 : i32 to index
      %c1_15 = arith.constant 1 : index
      %c0_16 = arith.constant 0 : index
      %13 = vector.load %arg5[%12, %c1_15, %c0_16] : memref<10x10x16xbf16, #tpu.memory_space<vmem>>, vector<1x8x16xbf16>
      %14 = vector.shape_cast %13 : vector<1x8x16xbf16> to vector<8x16xbf16>
      %c0_i32_17 = arith.constant 0 : i32
      %15 = arith.addi %arg6, %c0_i32_17 : i32
      %16 = arith.index_cast %15 : i32 to index
      %c2 = arith.constant 2 : index
      %c0_18 = arith.constant 0 : index
      %17 = vector.load %arg5[%16, %c2, %c0_18] : memref<10x10x16xbf16, #tpu.memory_space<vmem>>, vector<1x8x16xbf16>
      %18 = vector.shape_cast %17 : vector<1x8x16xbf16> to vector<8x16xbf16>
      %c1_i32_19 = arith.constant 1 : i32
      %19 = arith.addi %arg6, %c1_i32_19 : i32
      %20 = arith.index_cast %19 : i32 to index
      %c0_20 = arith.constant 0 : index
      %c0_21 = arith.constant 0 : index
      %21 = vector.load %arg5[%20, %c0_20, %c0_21] : memref<10x10x16xbf16, #tpu.memory_space<vmem>>, vector<1x8x16xbf16>
      %22 = vector.shape_cast %21 : vector<1x8x16xbf16> to vector<8x16xbf16>
      %c1_i32_22 = arith.constant 1 : i32
      %23 = arith.addi %arg6, %c1_i32_22 : i32
      %24 = arith.index_cast %23 : i32 to index
      %c1_23 = arith.constant 1 : index
      %c0_24 = arith.constant 0 : index
      %25 = vector.load %arg5[%24, %c1_23, %c0_24] : memref<10x10x16xbf16, #tpu.memory_space<vmem>>, vector<1x8x16xbf16>
      %26 = vector.shape_cast %25 : vector<1x8x16xbf16> to vector<8x16xbf16>
      %c1_i32_25 = arith.constant 1 : i32
      %27 = arith.addi %arg6, %c1_i32_25 : i32
      %28 = arith.index_cast %27 : i32 to index
      %c2_26 = arith.constant 2 : index
      %c0_27 = arith.constant 0 : index
      %29 = vector.load %arg5[%28, %c2_26, %c0_27] : memref<10x10x16xbf16, #tpu.memory_space<vmem>>, vector<1x8x16xbf16>
      %30 = vector.shape_cast %29 : vector<1x8x16xbf16> to vector<8x16xbf16>
      %c2_i32 = arith.constant 2 : i32
      %31 = arith.addi %arg6, %c2_i32 : i32
      %32 = arith.index_cast %31 : i32 to index
      %c0_28 = arith.constant 0 : index
      %c0_29 = arith.constant 0 : index
      %33 = vector.load %arg5[%32, %c0_28, %c0_29] : memref<10x10x16xbf16, #tpu.memory_space<vmem>>, vector<1x8x16xbf16>
      %34 = vector.shape_cast %33 : vector<1x8x16xbf16> to vector<8x16xbf16>
      %c2_i32_30 = arith.constant 2 : i32
      %35 = arith.addi %arg6, %c2_i32_30 : i32
      %36 = arith.index_cast %35 : i32 to index
      %c1_31 = arith.constant 1 : index
      %c0_32 = arith.constant 0 : index
      %37 = vector.load %arg5[%36, %c1_31, %c0_32] : memref<10x10x16xbf16, #tpu.memory_space<vmem>>, vector<1x8x16xbf16>
      %38 = vector.shape_cast %37 : vector<1x8x16xbf16> to vector<8x16xbf16>
      %c2_i32_33 = arith.constant 2 : i32
      %39 = arith.addi %arg6, %c2_i32_33 : i32
      %40 = arith.index_cast %39 : i32 to index
      %c2_34 = arith.constant 2 : index
      %c0_35 = arith.constant 0 : index
      %41 = vector.load %arg5[%40, %c2_34, %c0_35] : memref<10x10x16xbf16, #tpu.memory_space<vmem>>, vector<1x8x16xbf16>
      %42 = vector.shape_cast %41 : vector<1x8x16xbf16> to vector<8x16xbf16>
      %cst_36 = arith.constant 0.000000e+00 : f32
      %43 = vector.broadcast %cst_36 : f32 to vector<8x16xf32>
      %c0_37 = arith.constant 0 : index
      %c0_38 = arith.constant 0 : index
      %c0_39 = arith.constant 0 : index
      %c0_40 = arith.constant 0 : index
      %c0_41 = arith.constant 0 : index
      %44 = vector.load %arg2[%c0_37, %c0_38, %c0_39, %c0_40, %c0_41] : memref<2x2x3x16x16xbf16, #tpu.memory_space<vmem>>, vector<1x1x1x16x16xbf16>
      %45 = vector.shape_cast %44 : vector<1x1x1x16x16xbf16> to vector<16x16xbf16>
      %cst_42 = arith.constant dense<0.000000e+00> : vector<8x16xf32>
      %46 = tpu.matmul %22, %45, %cst_42 {dimension_numbers = #tpu.dot_dimension_numbers<[1], [0], [0], [1], [0, 0, 1, 1], [], []>} : vector<8x16xbf16>, vector<16x16xbf16>, vector<8x16xf32> -> vector<8x16xf32>
      %47 = arith.addf %43, %46 : vector<8x16xf32>
      %c0_43 = arith.constant 0 : index
      %c0_44 = arith.constant 0 : index
      %c1_45 = arith.constant 1 : index
      %c0_46 = arith.constant 0 : index
      %c0_47 = arith.constant 0 : index
      %48 = vector.load %arg2[%c0_43, %c0_44, %c1_45, %c0_46, %c0_47] : memref<2x2x3x16x16xbf16, #tpu.memory_space<vmem>>, vector<1x1x1x16x16xbf16>
      %49 = vector.shape_cast %48 : vector<1x1x1x16x16xbf16> to vector<16x16xbf16>
      %cst_48 = arith.constant dense<0.000000e+00> : vector<8x16xf32>
      %50 = tpu.matmul %26, %49, %cst_48 {dimension_numbers = #tpu.dot_dimension_numbers<[1], [0], [0], [1], [0, 0, 1, 1], [], []>} : vector<8x16xbf16>, vector<16x16xbf16>, vector<8x16xf32> -> vector<8x16xf32>
      %51 = arith.addf %47, %50 : vector<8x16xf32>
      %c0_49 = arith.constant 0 : index
      %c0_50 = arith.constant 0 : index
      %c2_51 = arith.constant 2 : index
      %c0_52 = arith.constant 0 : index
      %c0_53 = arith.constant 0 : index
      %52 = vector.load %arg2[%c0_49, %c0_50, %c2_51, %c0_52, %c0_53] : memref<2x2x3x16x16xbf16, #tpu.memory_space<vmem>>, vector<1x1x1x16x16xbf16>
      %53 = vector.shape_cast %52 : vector<1x1x1x16x16xbf16> to vector<16x16xbf16>
      %cst_54 = arith.constant dense<0.000000e+00> : vector<8x16xf32>
      %54 = tpu.matmul %30, %53, %cst_54 {dimension_numbers = #tpu.dot_dimension_numbers<[1], [0], [0], [1], [0, 0, 1, 1], [], []>} : vector<8x16xbf16>, vector<16x16xbf16>, vector<8x16xf32> -> vector<8x16xf32>
      %55 = arith.addf %51, %54 : vector<8x16xf32>
      %c0_55 = arith.constant 0 : index
      %c1_56 = arith.constant 1 : index
      %c0_57 = arith.constant 0 : index
      %c0_58 = arith.constant 0 : index
      %c0_59 = arith.constant 0 : index
      %56 = vector.load %arg2[%c0_55, %c1_56, %c0_57, %c0_58, %c0_59] : memref<2x2x3x16x16xbf16, #tpu.memory_space<vmem>>, vector<1x1x1x16x16xbf16>
      %57 = vector.shape_cast %56 : vector<1x1x1x16x16xbf16> to vector<16x16xbf16>
      %cst_60 = arith.constant dense<0.000000e+00> : vector<8x16xf32>
      %58 = tpu.matmul %10, %57, %cst_60 {dimension_numbers = #tpu.dot_dimension_numbers<[1], [0], [0], [1], [0, 0, 1, 1], [], []>} : vector<8x16xbf16>, vector<16x16xbf16>, vector<8x16xf32> -> vector<8x16xf32>
      %59 = arith.addf %55, %58 : vector<8x16xf32>
      %c0_61 = arith.constant 0 : index
      %c1_62 = arith.constant 1 : index
      %c1_63 = arith.constant 1 : index
      %c0_64 = arith.constant 0 : index
      %c0_65 = arith.constant 0 : index
      %60 = vector.load %arg2[%c0_61, %c1_62, %c1_63, %c0_64, %c0_65] : memref<2x2x3x16x16xbf16, #tpu.memory_space<vmem>>, vector<1x1x1x16x16xbf16>
      %61 = vector.shape_cast %60 : vector<1x1x1x16x16xbf16> to vector<16x16xbf16>
      %cst_66 = arith.constant dense<0.000000e+00> : vector<8x16xf32>
      %62 = tpu.matmul %14, %61, %cst_66 {dimension_numbers = #tpu.dot_dimension_numbers<[1], [0], [0], [1], [0, 0, 1, 1], [], []>} : vector<8x16xbf16>, vector<16x16xbf16>, vector<8x16xf32> -> vector<8x16xf32>
      %63 = arith.addf %59, %62 : vector<8x16xf32>
      %c0_67 = arith.constant 0 : index
      %c1_68 = arith.constant 1 : index
      %c2_69 = arith.constant 2 : index
      %c0_70 = arith.constant 0 : index
      %c0_71 = arith.constant 0 : index
      %64 = vector.load %arg2[%c0_67, %c1_68, %c2_69, %c0_70, %c0_71] : memref<2x2x3x16x16xbf16, #tpu.memory_space<vmem>>, vector<1x1x1x16x16xbf16>
      %65 = vector.shape_cast %64 : vector<1x1x1x16x16xbf16> to vector<16x16xbf16>
      %cst_72 = arith.constant dense<0.000000e+00> : vector<8x16xf32>
      %66 = tpu.matmul %18, %65, %cst_72 {dimension_numbers = #tpu.dot_dimension_numbers<[1], [0], [0], [1], [0, 0, 1, 1], [], []>} : vector<8x16xbf16>, vector<16x16xbf16>, vector<8x16xf32> -> vector<8x16xf32>
      %67 = arith.addf %63, %66 : vector<8x16xf32>
      %68 = vector.broadcast %5 : vector<1x16xf32> to vector<8x16xf32>
      %69 = arith.addf %67, %68 : vector<8x16xf32>
      %cst_73 = arith.constant 0.000000e+00 : f32
      %70 = vector.broadcast %cst_73 : f32 to vector<8x16xf32>
      %71 = arith.cmpf oge, %69, %70 : vector<8x16xf32>
      %cst_74 = arith.constant 2.000000e-01 : f32
      %72 = vector.broadcast %cst_74 : f32 to vector<8x16xf32>
      %73 = arith.mulf %72, %69 : vector<8x16xf32>
      %74 = arith.select %71, %69, %73 : vector<8x16xi1>, vector<8x16xf32>
      %75 = arith.truncf %74 : vector<8x16xf32> to vector<8x16xbf16>
      %c0_75 = arith.constant 0 : index
      %76 = arith.index_cast %arg6 : i32 to index
      %c0_76 = arith.constant 0 : index
      %c0_77 = arith.constant 0 : index
      %c0_78 = arith.constant 0 : index
      %77 = vector.load %arg4[%c0_75, %76, %c0_76, %c0_77, %c0_78] : memref<1x8x2x8x16xbf16, #tpu.memory_space<vmem>>, vector<1x1x1x8x16xbf16>
      %78 = vector.shape_cast %77 : vector<1x1x1x8x16xbf16> to vector<8x16xbf16>
      %79 = vector.shape_cast %75 : vector<8x16xbf16> to vector<1x1x1x8x16xbf16>
      tpu.vector_store %arg4[%c0_75, %76, %c0_76, %c0_77, %c0_78], %79 {strides = array<i32>} : memref<1x8x2x8x16xbf16, #tpu.memory_space<vmem>>, vector<1x1x1x8x16xbf16>,
      %cst_79 = arith.constant 0.000000e+00 : f32
      %80 = vector.broadcast %cst_79 : f32 to vector<8x16xf32>
      %c1_80 = arith.constant 1 : index
      %c0_81 = arith.constant 0 : index
      %c0_82 = arith.constant 0 : index
      %c0_83 = arith.constant 0 : index
      %c0_84 = arith.constant 0 : index
      %81 = vector.load %arg2[%c1_80, %c0_81, %c0_82, %c0_83, %c0_84] : memref<2x2x3x16x16xbf16, #tpu.memory_space<vmem>>, vector<1x1x1x16x16xbf16>
      %82 = vector.shape_cast %81 : vector<1x1x1x16x16xbf16> to vector<16x16xbf16>
      %cst_85 = arith.constant dense<0.000000e+00> : vector<8x16xf32>
      %83 = tpu.matmul %34, %82, %cst_85 {dimension_numbers = #tpu.dot_dimension_numbers<[1], [0], [0], [1], [0, 0, 1, 1], [], []>} : vector<8x16xbf16>, vector<16x16xbf16>, vector<8x16xf32> -> vector<8x16xf32>
      %84 = arith.addf %80, %83 : vector<8x16xf32>
      %c1_86 = arith.constant 1 : index
      %c0_87 = arith.constant 0 : index
      %c1_88 = arith.constant 1 : index
      %c0_89 = arith.constant 0 : index
      %c0_90 = arith.constant 0 : index
      %85 = vector.load %arg2[%c1_86, %c0_87, %c1_88, %c0_89, %c0_90] : memref<2x2x3x16x16xbf16, #tpu.memory_space<vmem>>, vector<1x1x1x16x16xbf16>
      %86 = vector.shape_cast %85 : vector<1x1x1x16x16xbf16> to vector<16x16xbf16>
      %cst_91 = arith.constant dense<0.000000e+00> : vector<8x16xf32>
      %87 = tpu.matmul %38, %86, %cst_91 {dimension_numbers = #tpu.dot_dimension_numbers<[1], [0], [0], [1], [0, 0, 1, 1], [], []>} : vector<8x16xbf16>, vector<16x16xbf16>, vector<8x16xf32> -> vector<8x16xf32>
      %88 = arith.addf %84, %87 : vector<8x16xf32>
      %c1_92 = arith.constant 1 : index
      %c0_93 = arith.constant 0 : index
      %c2_94 = arith.constant 2 : index
      %c0_95 = arith.constant 0 : index
      %c0_96 = arith.constant 0 : index
      %89 = vector.load %arg2[%c1_92, %c0_93, %c2_94, %c0_95, %c0_96] : memref<2x2x3x16x16xbf16, #tpu.memory_space<vmem>>, vector<1x1x1x16x16xbf16>
      %90 = vector.shape_cast %89 : vector<1x1x1x16x16xbf16> to vector<16x16xbf16>
      %cst_97 = arith.constant dense<0.000000e+00> : vector<8x16xf32>
      %91 = tpu.matmul %42, %90, %cst_97 {dimension_numbers = #tpu.dot_dimension_numbers<[1], [0], [0], [1], [0, 0, 1, 1], [], []>} : vector<8x16xbf16>, vector<16x16xbf16>, vector<8x16xf32> -> vector<8x16xf32>
      %92 = arith.addf %88, %91 : vector<8x16xf32>
      %c1_98 = arith.constant 1 : index
      %c1_99 = arith.constant 1 : index
      %c0_100 = arith.constant 0 : index
      %c0_101 = arith.constant 0 : index
      %c0_102 = arith.constant 0 : index
      %93 = vector.load %arg2[%c1_98, %c1_99, %c0_100, %c0_101, %c0_102] : memref<2x2x3x16x16xbf16, #tpu.memory_space<vmem>>, vector<1x1x1x16x16xbf16>
      %94 = vector.shape_cast %93 : vector<1x1x1x16x16xbf16> to vector<16x16xbf16>
      %cst_103 = arith.constant dense<0.000000e+00> : vector<8x16xf32>
      %95 = tpu.matmul %22, %94, %cst_103 {dimension_numbers = #tpu.dot_dimension_numbers<[1], [0], [0], [1], [0, 0, 1, 1], [], []>} : vector<8x16xbf16>, vector<16x16xbf16>, vector<8x16xf32> -> vector<8x16xf32>
      %96 = arith.addf %92, %95 : vector<8x16xf32>
      %c1_104 = arith.constant 1 : index
      %c1_105 = arith.constant 1 : index
      %c1_106 = arith.constant 1 : index
      %c0_107 = arith.constant 0 : index
      %c0_108 = arith.constant 0 : index
      %97 = vector.load %arg2[%c1_104, %c1_105, %c1_106, %c0_107, %c0_108] : memref<2x2x3x16x16xbf16, #tpu.memory_space<vmem>>, vector<1x1x1x16x16xbf16>
      %98 = vector.shape_cast %97 : vector<1x1x1x16x16xbf16> to vector<16x16xbf16>
      %cst_109 = arith.constant dense<0.000000e+00> : vector<8x16xf32>
      %99 = tpu.matmul %26, %98, %cst_109 {dimension_numbers = #tpu.dot_dimension_numbers<[1], [0], [0], [1], [0, 0, 1, 1], [], []>} : vector<8x16xbf16>, vector<16x16xbf16>, vector<8x16xf32> -> vector<8x16xf32>
      %100 = arith.addf %96, %99 : vector<8x16xf32>
      %c1_110 = arith.constant 1 : index
      %c1_111 = arith.constant 1 : index
      %c2_112 = arith.constant 2 : index
      %c0_113 = arith.constant 0 : index
      %c0_114 = arith.constant 0 : index
      %101 = vector.load %arg2[%c1_110, %c1_111, %c2_112, %c0_113, %c0_114] : memref<2x2x3x16x16xbf16, #tpu.memory_space<vmem>>, vector<1x1x1x16x16xbf16>
      %102 = vector.shape_cast %101 : vector<1x1x1x16x16xbf16> to vector<16x16xbf16>
      %cst_115 = arith.constant dense<0.000000e+00> : vector<8x16xf32>
      %103 = tpu.matmul %30, %102, %cst_115 {dimension_numbers = #tpu.dot_dimension_numbers<[1], [0], [0], [1], [0, 0, 1, 1], [], []>} : vector<8x16xbf16>, vector<16x16xbf16>, vector<8x16xf32> -> vector<8x16xf32>
      %104 = arith.addf %100, %103 : vector<8x16xf32>
      %105 = vector.broadcast %5 : vector<1x16xf32> to vector<8x16xf32>
      %106 = arith.addf %104, %105 : vector<8x16xf32>
      %cst_116 = arith.constant 0.000000e+00 : f32
      %107 = vector.broadcast %cst_116 : f32 to vector<8x16xf32>
      %108 = arith.cmpf oge, %106, %107 : vector<8x16xf32>
      %cst_117 = arith.constant 2.000000e-01 : f32
      %109 = vector.broadcast %cst_117 : f32 to vector<8x16xf32>
      %110 = arith.mulf %109, %106 : vector<8x16xf32>
      %111 = arith.select %108, %106, %110 : vector<8x16xi1>, vector<8x16xf32>
      %112 = arith.truncf %111 : vector<8x16xf32> to vector<8x16xbf16>
      %c0_118 = arith.constant 0 : index
      %113 = arith.index_cast %arg6 : i32 to index
      %c1_119 = arith.constant 1 : index
      %c0_120 = arith.constant 0 : index
      %c0_121 = arith.constant 0 : index
      %114 = vector.load %arg4[%c0_118, %113, %c1_119, %c0_120, %c0_121] : memref<1x8x2x8x16xbf16, #tpu.memory_space<vmem>>, vector<1x1x1x8x16xbf16>
      %115 = vector.shape_cast %114 : vector<1x1x1x8x16xbf16> to vector<8x16xbf16>
      %116 = vector.shape_cast %112 : vector<8x16xbf16> to vector<1x1x1x8x16xbf16>
      tpu.vector_store %arg4[%c0_118, %113, %c1_119, %c0_120, %c0_121], %116 {strides = array<i32>} : memref<1x8x2x8x16xbf16, #tpu.memory_space<vmem>>, vector<1x1x1x8x16xbf16>,
    }
    %c8_i32_10 = arith.constant 8 : i32
    return
  }
  func.func @transform_0(%arg0: i32) -> (i32, i32, i32, i32) {
    %c0_i32 = arith.constant 0 : i32
    %c0_i32_0 = arith.constant 0 : i32
    %c0_i32_1 = arith.constant 0 : i32
    %c0_i32_2 = arith.constant 0 : i32
    return %arg0, %c0_i32, %c0_i32_0, %c0_i32_1 : i32, i32, i32, i32
  }
  func.func @transform_1(%arg0: i32) -> (i32, i32, i32, i32, i32) {
    %c0_i32 = arith.constant 0 : i32
    %c0_i32_0 = arith.constant 0 : i32
    %c0_i32_1 = arith.constant 0 : i32
    %c0_i32_2 = arith.constant 0 : i32
    %c0_i32_3 = arith.constant 0 : i32
    %c0_i32_4 = arith.constant 0 : i32
    return %c0_i32, %c0_i32_0, %c0_i32_1, %c0_i32_2, %c0_i32_3 : i32, i32, i32, i32, i32
  }
  func.func @transform_2(%arg0: i32) -> (i32, i32) {
    %c0_i32 = arith.constant 0 : i32
    %c0_i32_0 = arith.constant 0 : i32
    %c0_i32_1 = arith.constant 0 : i32
    return %c0_i32, %c0_i32_0 : i32, i32
  }
  func.func @transform_3(%arg0: i32) -> (i32, i32, i32, i32, i32) {
    %c0_i32 = arith.constant 0 : i32
    %c0_i32_0 = arith.constant 0 : i32
    %c0_i32_1 = arith.constant 0 : i32
    %c0_i32_2 = arith.constant 0 : i32
    %c0_i32_3 = arith.constant 0 : i32
    return %arg0, %c0_i32, %c0_i32_0, %c0_i32_1, %c0_i32_2 : i32, i32, i32, i32, i32
  }
}

module attributes {stable_mosaic.version = 11 : i64} {
  func.func @_tconv_kernel(%arg0: i32, %arg1: memref<1x16x16x8xbf16, #tpu.memory_space<vmem>>, %arg2: memref<2x2x3x8x8xbf16, #tpu.memory_space<vmem>>, %arg3: memref<1x8xf32, #tpu.memory_space<vmem>>, %arg4: memref<1x16x2x16x8xbf16, #tpu.memory_space<vmem>>, %arg5: memref<18x18x8xbf16, #tpu.memory_space<vmem>>) attributes {dimension_semantics = [#tpu.dimension_semantics<parallel>], iteration_bounds = array<i64: 2>, scalar_prefetch = 0 : i64, scratch_operands = 1 : i64, tpu.core_type = #tpu.core_type<tc>, window_params = [{transform_indices = @transform_0, window_bounds = array<i64: 1, 16, 16, 8>}, {pipeline_mode = #tpu.pipeline_mode<synchronous>, transform_indices = @transform_1, window_bounds = array<i64: 2, 2, 3, 8, 8>}, {pipeline_mode = #tpu.pipeline_mode<synchronous>, transform_indices = @transform_2, window_bounds = array<i64: 1, 8>}, {transform_indices = @transform_3, window_bounds = array<i64: 1, 16, 2, 16, 8>}]} {
    %cst = arith.constant 0.000000e+00 : bf16
    %0 = vector.broadcast %cst : bf16 to vector<18x18x8xbf16>
    %c0 = arith.constant 0 : index
    %c0_0 = arith.constant 0 : index
    %c0_1 = arith.constant 0 : index
    %1 = vector.load %arg5[%c0, %c0_0, %c0_1] : memref<18x18x8xbf16, #tpu.memory_space<vmem>>, vector<18x18x8xbf16>
    tpu.vector_store %arg5[%c0, %c0_0, %c0_1], %0 {strides = array<i32>} : memref<18x18x8xbf16, #tpu.memory_space<vmem>>, vector<18x18x8xbf16>,
    %c0_2 = arith.constant 0 : index
    %c0_3 = arith.constant 0 : index
    %c0_4 = arith.constant 0 : index
    %c0_5 = arith.constant 0 : index
    %2 = vector.load %arg1[%c0_2, %c0_3, %c0_4, %c0_5] : memref<1x16x16x8xbf16, #tpu.memory_space<vmem>>, vector<1x16x16x8xbf16>
    %3 = vector.shape_cast %2 : vector<1x16x16x8xbf16> to vector<16x16x8xbf16>
    %c1 = arith.constant 1 : index
    %c1_6 = arith.constant 1 : index
    %c0_7 = arith.constant 0 : index
    %4 = vector.load %arg5[%c1, %c1_6, %c0_7] : memref<18x18x8xbf16, #tpu.memory_space<vmem>>, vector<16x16x8xbf16>
    tpu.vector_store %arg5[%c1, %c1_6, %c0_7], %3 {strides = array<i32>} : memref<18x18x8xbf16, #tpu.memory_space<vmem>>, vector<16x16x8xbf16>,
    %c0_8 = arith.constant 0 : index
    %c0_9 = arith.constant 0 : index
    %5 = vector.load %arg3[%c0_8, %c0_9] : memref<1x8xf32, #tpu.memory_space<vmem>>, vector<1x8xf32>
    %c0_i32 = arith.constant 0 : i32
    %c16_i32 = arith.constant 16 : i32
    %6 = arith.addi %c0_i32, %c16_i32 : i32
    %c1_i32 = arith.constant 1 : i32
    scf.for %arg6 = %c0_i32 to %6 step %c1_i32  : i32 {
      %c0_i32_11 = arith.constant 0 : i32
      %7 = arith.addi %arg6, %c0_i32_11 : i32
      %8 = arith.index_cast %7 : i32 to index
      %c0_12 = arith.constant 0 : index
      %c0_13 = arith.constant 0 : index
      %9 = vector.load %arg5[%8, %c0_12, %c0_13] : memref<18x18x8xbf16, #tpu.memory_space<vmem>>, vector<1x16x8xbf16>
      %10 = vector.shape_cast %9 : vector<1x16x8xbf16> to vector<16x8xbf16>
      %c0_i32_14 = arith.constant 0 : i32
      %11 = arith.addi %arg6, %c0_i32_14 : i32
      %12 = arith.index_cast %11 : i32 to index
      %c1_15 = arith.constant 1 : index
      %c0_16 = arith.constant 0 : index
      %13 = vector.load %arg5[%12, %c1_15, %c0_16] : memref<18x18x8xbf16, #tpu.memory_space<vmem>>, vector<1x16x8xbf16>
      %14 = vector.shape_cast %13 : vector<1x16x8xbf16> to vector<16x8xbf16>
      %c0_i32_17 = arith.constant 0 : i32
      %15 = arith.addi %arg6, %c0_i32_17 : i32
      %16 = arith.index_cast %15 : i32 to index
      %c2 = arith.constant 2 : index
      %c0_18 = arith.constant 0 : index
      %17 = vector.load %arg5[%16, %c2, %c0_18] : memref<18x18x8xbf16, #tpu.memory_space<vmem>>, vector<1x16x8xbf16>
      %18 = vector.shape_cast %17 : vector<1x16x8xbf16> to vector<16x8xbf16>
      %c1_i32_19 = arith.constant 1 : i32
      %19 = arith.addi %arg6, %c1_i32_19 : i32
      %20 = arith.index_cast %19 : i32 to index
      %c0_20 = arith.constant 0 : index
      %c0_21 = arith.constant 0 : index
      %21 = vector.load %arg5[%20, %c0_20, %c0_21] : memref<18x18x8xbf16, #tpu.memory_space<vmem>>, vector<1x16x8xbf16>
      %22 = vector.shape_cast %21 : vector<1x16x8xbf16> to vector<16x8xbf16>
      %c1_i32_22 = arith.constant 1 : i32
      %23 = arith.addi %arg6, %c1_i32_22 : i32
      %24 = arith.index_cast %23 : i32 to index
      %c1_23 = arith.constant 1 : index
      %c0_24 = arith.constant 0 : index
      %25 = vector.load %arg5[%24, %c1_23, %c0_24] : memref<18x18x8xbf16, #tpu.memory_space<vmem>>, vector<1x16x8xbf16>
      %26 = vector.shape_cast %25 : vector<1x16x8xbf16> to vector<16x8xbf16>
      %c1_i32_25 = arith.constant 1 : i32
      %27 = arith.addi %arg6, %c1_i32_25 : i32
      %28 = arith.index_cast %27 : i32 to index
      %c2_26 = arith.constant 2 : index
      %c0_27 = arith.constant 0 : index
      %29 = vector.load %arg5[%28, %c2_26, %c0_27] : memref<18x18x8xbf16, #tpu.memory_space<vmem>>, vector<1x16x8xbf16>
      %30 = vector.shape_cast %29 : vector<1x16x8xbf16> to vector<16x8xbf16>
      %c2_i32 = arith.constant 2 : i32
      %31 = arith.addi %arg6, %c2_i32 : i32
      %32 = arith.index_cast %31 : i32 to index
      %c0_28 = arith.constant 0 : index
      %c0_29 = arith.constant 0 : index
      %33 = vector.load %arg5[%32, %c0_28, %c0_29] : memref<18x18x8xbf16, #tpu.memory_space<vmem>>, vector<1x16x8xbf16>
      %34 = vector.shape_cast %33 : vector<1x16x8xbf16> to vector<16x8xbf16>
      %c2_i32_30 = arith.constant 2 : i32
      %35 = arith.addi %arg6, %c2_i32_30 : i32
      %36 = arith.index_cast %35 : i32 to index
      %c1_31 = arith.constant 1 : index
      %c0_32 = arith.constant 0 : index
      %37 = vector.load %arg5[%36, %c1_31, %c0_32] : memref<18x18x8xbf16, #tpu.memory_space<vmem>>, vector<1x16x8xbf16>
      %38 = vector.shape_cast %37 : vector<1x16x8xbf16> to vector<16x8xbf16>
      %c2_i32_33 = arith.constant 2 : i32
      %39 = arith.addi %arg6, %c2_i32_33 : i32
      %40 = arith.index_cast %39 : i32 to index
      %c2_34 = arith.constant 2 : index
      %c0_35 = arith.constant 0 : index
      %41 = vector.load %arg5[%40, %c2_34, %c0_35] : memref<18x18x8xbf16, #tpu.memory_space<vmem>>, vector<1x16x8xbf16>
      %42 = vector.shape_cast %41 : vector<1x16x8xbf16> to vector<16x8xbf16>
      %cst_36 = arith.constant 0.000000e+00 : f32
      %43 = vector.broadcast %cst_36 : f32 to vector<16x8xf32>
      %c0_37 = arith.constant 0 : index
      %c0_38 = arith.constant 0 : index
      %c0_39 = arith.constant 0 : index
      %c0_40 = arith.constant 0 : index
      %c0_41 = arith.constant 0 : index
      %44 = vector.load %arg2[%c0_37, %c0_38, %c0_39, %c0_40, %c0_41] : memref<2x2x3x8x8xbf16, #tpu.memory_space<vmem>>, vector<1x1x1x8x8xbf16>
      %45 = vector.shape_cast %44 : vector<1x1x1x8x8xbf16> to vector<8x8xbf16>
      %cst_42 = arith.constant dense<0.000000e+00> : vector<16x8xf32>
      %46 = tpu.matmul %22, %45, %cst_42 {dimension_numbers = #tpu.dot_dimension_numbers<[1], [0], [0], [1], [0, 0, 1, 1], [], []>} : vector<16x8xbf16>, vector<8x8xbf16>, vector<16x8xf32> -> vector<16x8xf32>
      %47 = arith.addf %43, %46 : vector<16x8xf32>
      %c0_43 = arith.constant 0 : index
      %c0_44 = arith.constant 0 : index
      %c1_45 = arith.constant 1 : index
      %c0_46 = arith.constant 0 : index
      %c0_47 = arith.constant 0 : index
      %48 = vector.load %arg2[%c0_43, %c0_44, %c1_45, %c0_46, %c0_47] : memref<2x2x3x8x8xbf16, #tpu.memory_space<vmem>>, vector<1x1x1x8x8xbf16>
      %49 = vector.shape_cast %48 : vector<1x1x1x8x8xbf16> to vector<8x8xbf16>
      %cst_48 = arith.constant dense<0.000000e+00> : vector<16x8xf32>
      %50 = tpu.matmul %26, %49, %cst_48 {dimension_numbers = #tpu.dot_dimension_numbers<[1], [0], [0], [1], [0, 0, 1, 1], [], []>} : vector<16x8xbf16>, vector<8x8xbf16>, vector<16x8xf32> -> vector<16x8xf32>
      %51 = arith.addf %47, %50 : vector<16x8xf32>
      %c0_49 = arith.constant 0 : index
      %c0_50 = arith.constant 0 : index
      %c2_51 = arith.constant 2 : index
      %c0_52 = arith.constant 0 : index
      %c0_53 = arith.constant 0 : index
      %52 = vector.load %arg2[%c0_49, %c0_50, %c2_51, %c0_52, %c0_53] : memref<2x2x3x8x8xbf16, #tpu.memory_space<vmem>>, vector<1x1x1x8x8xbf16>
      %53 = vector.shape_cast %52 : vector<1x1x1x8x8xbf16> to vector<8x8xbf16>
      %cst_54 = arith.constant dense<0.000000e+00> : vector<16x8xf32>
      %54 = tpu.matmul %30, %53, %cst_54 {dimension_numbers = #tpu.dot_dimension_numbers<[1], [0], [0], [1], [0, 0, 1, 1], [], []>} : vector<16x8xbf16>, vector<8x8xbf16>, vector<16x8xf32> -> vector<16x8xf32>
      %55 = arith.addf %51, %54 : vector<16x8xf32>
      %c0_55 = arith.constant 0 : index
      %c1_56 = arith.constant 1 : index
      %c0_57 = arith.constant 0 : index
      %c0_58 = arith.constant 0 : index
      %c0_59 = arith.constant 0 : index
      %56 = vector.load %arg2[%c0_55, %c1_56, %c0_57, %c0_58, %c0_59] : memref<2x2x3x8x8xbf16, #tpu.memory_space<vmem>>, vector<1x1x1x8x8xbf16>
      %57 = vector.shape_cast %56 : vector<1x1x1x8x8xbf16> to vector<8x8xbf16>
      %cst_60 = arith.constant dense<0.000000e+00> : vector<16x8xf32>
      %58 = tpu.matmul %10, %57, %cst_60 {dimension_numbers = #tpu.dot_dimension_numbers<[1], [0], [0], [1], [0, 0, 1, 1], [], []>} : vector<16x8xbf16>, vector<8x8xbf16>, vector<16x8xf32> -> vector<16x8xf32>
      %59 = arith.addf %55, %58 : vector<16x8xf32>
      %c0_61 = arith.constant 0 : index
      %c1_62 = arith.constant 1 : index
      %c1_63 = arith.constant 1 : index
      %c0_64 = arith.constant 0 : index
      %c0_65 = arith.constant 0 : index
      %60 = vector.load %arg2[%c0_61, %c1_62, %c1_63, %c0_64, %c0_65] : memref<2x2x3x8x8xbf16, #tpu.memory_space<vmem>>, vector<1x1x1x8x8xbf16>
      %61 = vector.shape_cast %60 : vector<1x1x1x8x8xbf16> to vector<8x8xbf16>
      %cst_66 = arith.constant dense<0.000000e+00> : vector<16x8xf32>
      %62 = tpu.matmul %14, %61, %cst_66 {dimension_numbers = #tpu.dot_dimension_numbers<[1], [0], [0], [1], [0, 0, 1, 1], [], []>} : vector<16x8xbf16>, vector<8x8xbf16>, vector<16x8xf32> -> vector<16x8xf32>
      %63 = arith.addf %59, %62 : vector<16x8xf32>
      %c0_67 = arith.constant 0 : index
      %c1_68 = arith.constant 1 : index
      %c2_69 = arith.constant 2 : index
      %c0_70 = arith.constant 0 : index
      %c0_71 = arith.constant 0 : index
      %64 = vector.load %arg2[%c0_67, %c1_68, %c2_69, %c0_70, %c0_71] : memref<2x2x3x8x8xbf16, #tpu.memory_space<vmem>>, vector<1x1x1x8x8xbf16>
      %65 = vector.shape_cast %64 : vector<1x1x1x8x8xbf16> to vector<8x8xbf16>
      %cst_72 = arith.constant dense<0.000000e+00> : vector<16x8xf32>
      %66 = tpu.matmul %18, %65, %cst_72 {dimension_numbers = #tpu.dot_dimension_numbers<[1], [0], [0], [1], [0, 0, 1, 1], [], []>} : vector<16x8xbf16>, vector<8x8xbf16>, vector<16x8xf32> -> vector<16x8xf32>
      %67 = arith.addf %63, %66 : vector<16x8xf32>
      %68 = vector.broadcast %5 : vector<1x8xf32> to vector<16x8xf32>
      %69 = arith.addf %67, %68 : vector<16x8xf32>
      %cst_73 = arith.constant 0.000000e+00 : f32
      %70 = vector.broadcast %cst_73 : f32 to vector<16x8xf32>
      %71 = arith.cmpf oge, %69, %70 : vector<16x8xf32>
      %cst_74 = arith.constant 2.000000e-01 : f32
      %72 = vector.broadcast %cst_74 : f32 to vector<16x8xf32>
      %73 = arith.mulf %72, %69 : vector<16x8xf32>
      %74 = arith.select %71, %69, %73 : vector<16x8xi1>, vector<16x8xf32>
      %75 = arith.truncf %74 : vector<16x8xf32> to vector<16x8xbf16>
      %c0_75 = arith.constant 0 : index
      %76 = arith.index_cast %arg6 : i32 to index
      %c0_76 = arith.constant 0 : index
      %c0_77 = arith.constant 0 : index
      %c0_78 = arith.constant 0 : index
      %77 = vector.load %arg4[%c0_75, %76, %c0_76, %c0_77, %c0_78] : memref<1x16x2x16x8xbf16, #tpu.memory_space<vmem>>, vector<1x1x1x16x8xbf16>
      %78 = vector.shape_cast %77 : vector<1x1x1x16x8xbf16> to vector<16x8xbf16>
      %79 = vector.shape_cast %75 : vector<16x8xbf16> to vector<1x1x1x16x8xbf16>
      tpu.vector_store %arg4[%c0_75, %76, %c0_76, %c0_77, %c0_78], %79 {strides = array<i32>} : memref<1x16x2x16x8xbf16, #tpu.memory_space<vmem>>, vector<1x1x1x16x8xbf16>,
      %cst_79 = arith.constant 0.000000e+00 : f32
      %80 = vector.broadcast %cst_79 : f32 to vector<16x8xf32>
      %c1_80 = arith.constant 1 : index
      %c0_81 = arith.constant 0 : index
      %c0_82 = arith.constant 0 : index
      %c0_83 = arith.constant 0 : index
      %c0_84 = arith.constant 0 : index
      %81 = vector.load %arg2[%c1_80, %c0_81, %c0_82, %c0_83, %c0_84] : memref<2x2x3x8x8xbf16, #tpu.memory_space<vmem>>, vector<1x1x1x8x8xbf16>
      %82 = vector.shape_cast %81 : vector<1x1x1x8x8xbf16> to vector<8x8xbf16>
      %cst_85 = arith.constant dense<0.000000e+00> : vector<16x8xf32>
      %83 = tpu.matmul %34, %82, %cst_85 {dimension_numbers = #tpu.dot_dimension_numbers<[1], [0], [0], [1], [0, 0, 1, 1], [], []>} : vector<16x8xbf16>, vector<8x8xbf16>, vector<16x8xf32> -> vector<16x8xf32>
      %84 = arith.addf %80, %83 : vector<16x8xf32>
      %c1_86 = arith.constant 1 : index
      %c0_87 = arith.constant 0 : index
      %c1_88 = arith.constant 1 : index
      %c0_89 = arith.constant 0 : index
      %c0_90 = arith.constant 0 : index
      %85 = vector.load %arg2[%c1_86, %c0_87, %c1_88, %c0_89, %c0_90] : memref<2x2x3x8x8xbf16, #tpu.memory_space<vmem>>, vector<1x1x1x8x8xbf16>
      %86 = vector.shape_cast %85 : vector<1x1x1x8x8xbf16> to vector<8x8xbf16>
      %cst_91 = arith.constant dense<0.000000e+00> : vector<16x8xf32>
      %87 = tpu.matmul %38, %86, %cst_91 {dimension_numbers = #tpu.dot_dimension_numbers<[1], [0], [0], [1], [0, 0, 1, 1], [], []>} : vector<16x8xbf16>, vector<8x8xbf16>, vector<16x8xf32> -> vector<16x8xf32>
      %88 = arith.addf %84, %87 : vector<16x8xf32>
      %c1_92 = arith.constant 1 : index
      %c0_93 = arith.constant 0 : index
      %c2_94 = arith.constant 2 : index
      %c0_95 = arith.constant 0 : index
      %c0_96 = arith.constant 0 : index
      %89 = vector.load %arg2[%c1_92, %c0_93, %c2_94, %c0_95, %c0_96] : memref<2x2x3x8x8xbf16, #tpu.memory_space<vmem>>, vector<1x1x1x8x8xbf16>
      %90 = vector.shape_cast %89 : vector<1x1x1x8x8xbf16> to vector<8x8xbf16>
      %cst_97 = arith.constant dense<0.000000e+00> : vector<16x8xf32>
      %91 = tpu.matmul %42, %90, %cst_97 {dimension_numbers = #tpu.dot_dimension_numbers<[1], [0], [0], [1], [0, 0, 1, 1], [], []>} : vector<16x8xbf16>, vector<8x8xbf16>, vector<16x8xf32> -> vector<16x8xf32>
      %92 = arith.addf %88, %91 : vector<16x8xf32>
      %c1_98 = arith.constant 1 : index
      %c1_99 = arith.constant 1 : index
      %c0_100 = arith.constant 0 : index
      %c0_101 = arith.constant 0 : index
      %c0_102 = arith.constant 0 : index
      %93 = vector.load %arg2[%c1_98, %c1_99, %c0_100, %c0_101, %c0_102] : memref<2x2x3x8x8xbf16, #tpu.memory_space<vmem>>, vector<1x1x1x8x8xbf16>
      %94 = vector.shape_cast %93 : vector<1x1x1x8x8xbf16> to vector<8x8xbf16>
      %cst_103 = arith.constant dense<0.000000e+00> : vector<16x8xf32>
      %95 = tpu.matmul %22, %94, %cst_103 {dimension_numbers = #tpu.dot_dimension_numbers<[1], [0], [0], [1], [0, 0, 1, 1], [], []>} : vector<16x8xbf16>, vector<8x8xbf16>, vector<16x8xf32> -> vector<16x8xf32>
      %96 = arith.addf %92, %95 : vector<16x8xf32>
      %c1_104 = arith.constant 1 : index
      %c1_105 = arith.constant 1 : index
      %c1_106 = arith.constant 1 : index
      %c0_107 = arith.constant 0 : index
      %c0_108 = arith.constant 0 : index
      %97 = vector.load %arg2[%c1_104, %c1_105, %c1_106, %c0_107, %c0_108] : memref<2x2x3x8x8xbf16, #tpu.memory_space<vmem>>, vector<1x1x1x8x8xbf16>
      %98 = vector.shape_cast %97 : vector<1x1x1x8x8xbf16> to vector<8x8xbf16>
      %cst_109 = arith.constant dense<0.000000e+00> : vector<16x8xf32>
      %99 = tpu.matmul %26, %98, %cst_109 {dimension_numbers = #tpu.dot_dimension_numbers<[1], [0], [0], [1], [0, 0, 1, 1], [], []>} : vector<16x8xbf16>, vector<8x8xbf16>, vector<16x8xf32> -> vector<16x8xf32>
      %100 = arith.addf %96, %99 : vector<16x8xf32>
      %c1_110 = arith.constant 1 : index
      %c1_111 = arith.constant 1 : index
      %c2_112 = arith.constant 2 : index
      %c0_113 = arith.constant 0 : index
      %c0_114 = arith.constant 0 : index
      %101 = vector.load %arg2[%c1_110, %c1_111, %c2_112, %c0_113, %c0_114] : memref<2x2x3x8x8xbf16, #tpu.memory_space<vmem>>, vector<1x1x1x8x8xbf16>
      %102 = vector.shape_cast %101 : vector<1x1x1x8x8xbf16> to vector<8x8xbf16>
      %cst_115 = arith.constant dense<0.000000e+00> : vector<16x8xf32>
      %103 = tpu.matmul %30, %102, %cst_115 {dimension_numbers = #tpu.dot_dimension_numbers<[1], [0], [0], [1], [0, 0, 1, 1], [], []>} : vector<16x8xbf16>, vector<8x8xbf16>, vector<16x8xf32> -> vector<16x8xf32>
      %104 = arith.addf %100, %103 : vector<16x8xf32>
      %105 = vector.broadcast %5 : vector<1x8xf32> to vector<16x8xf32>
      %106 = arith.addf %104, %105 : vector<16x8xf32>
      %cst_116 = arith.constant 0.000000e+00 : f32
      %107 = vector.broadcast %cst_116 : f32 to vector<16x8xf32>
      %108 = arith.cmpf oge, %106, %107 : vector<16x8xf32>
      %cst_117 = arith.constant 2.000000e-01 : f32
      %109 = vector.broadcast %cst_117 : f32 to vector<16x8xf32>
      %110 = arith.mulf %109, %106 : vector<16x8xf32>
      %111 = arith.select %108, %106, %110 : vector<16x8xi1>, vector<16x8xf32>
      %112 = arith.truncf %111 : vector<16x8xf32> to vector<16x8xbf16>
      %c0_118 = arith.constant 0 : index
      %113 = arith.index_cast %arg6 : i32 to index
      %c1_119 = arith.constant 1 : index
      %c0_120 = arith.constant 0 : index
      %c0_121 = arith.constant 0 : index
      %114 = vector.load %arg4[%c0_118, %113, %c1_119, %c0_120, %c0_121] : memref<1x16x2x16x8xbf16, #tpu.memory_space<vmem>>, vector<1x1x1x16x8xbf16>
      %115 = vector.shape_cast %114 : vector<1x1x1x16x8xbf16> to vector<16x8xbf16>
      %116 = vector.shape_cast %112 : vector<16x8xbf16> to vector<1x1x1x16x8xbf16>
      tpu.vector_store %arg4[%c0_118, %113, %c1_119, %c0_120, %c0_121], %116 {strides = array<i32>} : memref<1x16x2x16x8xbf16, #tpu.memory_space<vmem>>, vector<1x1x1x16x8xbf16>,
    }
    %c16_i32_10 = arith.constant 16 : i32
    return
  }
  func.func @transform_0(%arg0: i32) -> (i32, i32, i32, i32) {
    %c0_i32 = arith.constant 0 : i32
    %c0_i32_0 = arith.constant 0 : i32
    %c0_i32_1 = arith.constant 0 : i32
    %c0_i32_2 = arith.constant 0 : i32
    return %arg0, %c0_i32, %c0_i32_0, %c0_i32_1 : i32, i32, i32, i32
  }
  func.func @transform_1(%arg0: i32) -> (i32, i32, i32, i32, i32) {
    %c0_i32 = arith.constant 0 : i32
    %c0_i32_0 = arith.constant 0 : i32
    %c0_i32_1 = arith.constant 0 : i32
    %c0_i32_2 = arith.constant 0 : i32
    %c0_i32_3 = arith.constant 0 : i32
    %c0_i32_4 = arith.constant 0 : i32
    return %c0_i32, %c0_i32_0, %c0_i32_1, %c0_i32_2, %c0_i32_3 : i32, i32, i32, i32, i32
  }
  func.func @transform_2(%arg0: i32) -> (i32, i32) {
    %c0_i32 = arith.constant 0 : i32
    %c0_i32_0 = arith.constant 0 : i32
    %c0_i32_1 = arith.constant 0 : i32
    return %c0_i32, %c0_i32_0 : i32, i32
  }
  func.func @transform_3(%arg0: i32) -> (i32, i32, i32, i32, i32) {
    %c0_i32 = arith.constant 0 : i32
    %c0_i32_0 = arith.constant 0 : i32
    %c0_i32_1 = arith.constant 0 : i32
    %c0_i32_2 = arith.constant 0 : i32
    %c0_i32_3 = arith.constant 0 : i32
    return %arg0, %c0_i32, %c0_i32_0, %c0_i32_1, %c0_i32_2 : i32, i32, i32, i32, i32
  }
}

module attributes {stable_mosaic.version = 11 : i64} {
  func.func @_gemm_kernel(%arg0: i32, %arg1: i32, %arg2: memref<512x4xbf16, #tpu.memory_space<vmem>>, %arg3: memref<4x3xbf16, #tpu.memory_space<vmem>>, %arg4: memref<1x3xf32, #tpu.memory_space<vmem>>, %arg5: memref<512x3xf32, #tpu.memory_space<vmem>>) attributes {dimension_semantics = [#tpu.dimension_semantics<parallel>, #tpu.dimension_semantics<parallel>], iteration_bounds = array<i64: 4, 1>, scalar_prefetch = 0 : i64, scratch_operands = 0 : i64, tpu.core_type = #tpu.core_type<tc>, window_params = [{transform_indices = @transform_0, window_bounds = array<i64: 512, 4>}, {transform_indices = @transform_1, window_bounds = array<i64: 4, 3>}, {transform_indices = @transform_2, window_bounds = array<i64: 1, 3>}, {transform_indices = @transform_3, window_bounds = array<i64: 512, 3>}]} {
    %c0 = arith.constant 0 : index
    %c0_0 = arith.constant 0 : index
    %0 = vector.load %arg2[%c0, %c0_0] : memref<512x4xbf16, #tpu.memory_space<vmem>>, vector<512x4xbf16>
    %c0_1 = arith.constant 0 : index
    %c0_2 = arith.constant 0 : index
    %1 = vector.load %arg3[%c0_1, %c0_2] : memref<4x3xbf16, #tpu.memory_space<vmem>>, vector<4x3xbf16>
    %cst = arith.constant dense<0.000000e+00> : vector<512x3xf32>
    %2 = tpu.matmul %0, %1, %cst {dimension_numbers = #tpu.dot_dimension_numbers<[1], [0], [0], [1], [0, 0, 1, 1], [], []>} : vector<512x4xbf16>, vector<4x3xbf16>, vector<512x3xf32> -> vector<512x3xf32>
    %c0_3 = arith.constant 0 : index
    %c0_4 = arith.constant 0 : index
    %3 = vector.load %arg4[%c0_3, %c0_4] : memref<1x3xf32, #tpu.memory_space<vmem>>, vector<1x3xf32>
    %4 = vector.broadcast %3 : vector<1x3xf32> to vector<512x3xf32>
    %5 = arith.addf %2, %4 : vector<512x3xf32>
    %6 = math.tanh %5 : vector<512x3xf32>
    %c0_5 = arith.constant 0 : index
    %c0_6 = arith.constant 0 : index
    %7 = vector.load %arg5[%c0_5, %c0_6] : memref<512x3xf32, #tpu.memory_space<vmem>>, vector<512x3xf32>
    tpu.vector_store %arg5[%c0_5, %c0_6], %6 {strides = array<i32>} : memref<512x3xf32, #tpu.memory_space<vmem>>, vector<512x3xf32>,
    return
  }
  func.func @transform_0(%arg0: i32, %arg1: i32) -> (i32, i32) {
    %c0_i32 = arith.constant 0 : i32
    %c0_i32_0 = arith.constant 0 : i32
    return %arg0, %c0_i32 : i32, i32
  }
  func.func @transform_1(%arg0: i32, %arg1: i32) -> (i32, i32) {
    %c0_i32 = arith.constant 0 : i32
    %c0_i32_0 = arith.constant 0 : i32
    return %c0_i32, %arg1 : i32, i32
  }
  func.func @transform_2(%arg0: i32, %arg1: i32) -> (i32, i32) {
    %c0_i32 = arith.constant 0 : i32
    %c0_i32_0 = arith.constant 0 : i32
    return %c0_i32, %arg1 : i32, i32
  }
  func.func @transform_3(%arg0: i32, %arg1: i32) -> (i32, i32) {
    %c0_i32 = arith.constant 0 : i32
    return %arg0, %arg1 : i32, i32
  }
}

</mosaic_0001>

<bundles_post_ra>
// kernel: _lambda_.7
= control target key start
LH: loop header
LB: loop body
LE: loop exit
PB: predicated region body
PF: predicated region fallthrough
CT: control target
= control target key end

     0   :  { %vm25_vm0 = vcmask 1043456   ;;  %vm21_vm1 = vcmask 64512   ;;  %s85_s1 = inlined_call_operand.vmem [shape: bf16[8,128], index: 1, kind: input, shape index: {}]   ;;  %s86_s0 = inlined_call_operand.vmem [shape: bf16[2,8], index: 0, kind: input, shape index: {}]   ;;  %s87_s2 = inlined_call_operand.vmem [shape: f32[1,128], index: 2, kind: input, shape index: {}]   ;;  %s88_s3 = inlined_call_operand.vmem [shape: bf16[2,128], index: 3, kind: output, shape index: {}]  }
   0x1   :  { %v16_v0 = vld [vmem:[%s85_s1] sm:$0xf] }
   0x2   :  { %v27_v1 = vsel %vm25_vm0, %v16_v0, 0  ;;  %v15_v2 = vld [vmem:[%s86_s0] sm:$0x1] }
   0x3   :  { %36 = vmatpush.bf16.msra.mxu0 %v27_v1  ;;  %v52_v3 = vld [vmem:[%s87_s2] ss:$0 sm:$0xff] }
   0x6   :  { %51 = vmatmul.msk.bf16.vlgmr.msra.gmra.mxu0 %vm21_vm1, %v15_v2 }
  0x83   :  { %v38_v4 = vpop.f32.mrf.mxu0 }
  0x84   :  { %v39_v5 = vadd.f32 %v52_v3, %v38_v4 }
  0x86   :  { %vm42_vm2 = vcmp.ge.f32.partialorder %v39_v5, 0.0  ;;  %v43_v6 = vmul.f32 0.2, %v39_v5 }
  0x88   :  { %v44_v7 = vsel %vm42_vm2, %v39_v5, %v43_v6 }
  0x89   :  { %v45_v8 = vpack.c.bf16 %v44_v7, %v44_v7 }
  0x8b   :  { %46 = vst [vmem:[%s88_s3] sm:$0x1] %v45_v8  ;;  %v40_v9 = vpop.f32.mrf.mxu0 }

// kernel: _lambda_.8
= control target key start
LH: loop header
LB: loop body
LE: loop exit
PB: predicated region body
PF: predicated region fallthrough
CT: control target
= control target key end

     0   :  { %8 = vsyncpa [#allocation4], 0  ;;  %s1863_s12 = smov 0   ;;  %s1931_s0 = inlined_call_operand.vmem [shape: bf16[2,1,1,128], index: 0, kind: input, shape index: {}]   ;;  %s1932_s1 = inlined_call_operand.hbm [shape: bf16[2,2,3,128,128], index: 1, kind: input, shape index: {}]   ;;  %s1933_s2 = inlined_call_operand.vmem [shape: f32[1,128], index: 2, kind: input, shape index: {}]   ;;  %s1934_s3 = inlined_call_operand.vmem [shape: bf16[2,1,2,1,128], index: 3, kind: output, shape index: {}]  }
   0x1 LB: > { %s124_s15 = sshll.u32 %s1932_s1, 4  ;;  %s1872_s16 = sadd.s32 4294967295, %s1838_s12   ;;  %s1838_s12 = sphi %s1863_s12, %s14_s12   ;;  %s125_s15 = int_to_ptr.hbm [resolvable:$true] %s124_s15 }
   0x2   : > { %p1287_p0 = scmp.ge.s32.totalorder %s1838_s12, 1  ;;  %p113_p1 = scmp.lt.s32.totalorder %s1838_s12, 3 }
   0x3   : > { %p1785_p2 = scmp.eq.s32.totalorder %s1872_s16, 0  ;;  %s1840_s17 = smov [#allocation3]  }
   0x4   : > { %p114_p3 = pnand %p1287_p0, %p113_p1  ;;  %s126_s18 = sshll.u32 %s1840_s17, 4  ;;  %s127_s18 = int_to_ptr.vmem [resolvable:$true] %s126_s18 }
   0x5   : > { %s1841_s19 = smov 64   ;;  %s1842_s20 = smov 4  }
   0x6   : > { %p1781_p4 = pneg %p114_p3  ;;  %151 = sbr.rel (%p114_p3) target bundleno = 255 (0xff), region = 32 }
   0x8   : > { %p1782_p5 = pnand %p1785_p2, %p1781_p4 }
   0xa   : > { %1784 = dma.hbm_to_vmem [thread:$0]  (!%p1782_p5), %s125_s15, 12288, %s127_s18, [#allocation4], %s1841_s19, %s1841_s19, %s1842_s20  }
   0xb   : > { %1833 = dma.done.wait (%p1785_p2), [#allocation4], 12288  }
   0xc   : > { %1835 = vsyncadd (%p1785_p2), [#allocation4], 4294955008  ;;  %v1696_v0 = vld [vmem:[#allocation3 + $0x78] sm:$0xff]  ;;  %v1695_v4 = vld [vmem:[#allocation3 + $0x70] sm:$0xff]  ;;  %p173_p6 = scmp.lt.s32.totalorder %s1872_s16, 1  ;;  %vm181_vm0 = vcmask 1041408  }
   0xd   : > { %v1688_v1 = vld [vmem:[#allocation3 + $0x38] sm:$0xff]  ;;  %302 = vmatpush.bf16.msra.mxu0 %v1696_v0  ;;  %v1687_v5 = vld [vmem:[#allocation3 + $0x30] sm:$0xff]  ;;  %v1694_v8 = vld [vmem:[#allocation3 + $0x68] sm:$0xff]  ;;  %vm182_vm1 = vsmask.f32 1280  ;;  %vm201_vm3 = vcmask 1040384  }
   0xe   : > { %v1704_v2 = vld [vmem:[#allocation3 + $0xb8] sm:$0xff]  ;;  %363 = vmatpush.bf16.msra.mxu1 %v1688_v1  ;;  %v1703_v6 = vld [vmem:[#allocation3 + $0xb0] sm:$0xff]  ;;  %v1686_v9 = vld [vmem:[#allocation3 + $0x28] sm:$0xff]  ;;  %s1940_s16 = smov (!%p173_p6, %s1872_s16), 1  ;;  %vm202_vm4 = vsmask.f32 7938 }
   0xf   : > { %v1712_v3 = vld [vmem:[#allocation3 + $0xf8] sm:$0xff]  ;;  %447 = vmatpush.bf16.msra.mxu2 %v1704_v2  ;;  %v1711_v7 = vld [vmem:[#allocation3 + $0xf0] sm:$0xff]  ;;  %v1702_v10 = vld [vmem:[#allocation3 + $0xa8] sm:$0xff]  ;;  %s175_s23 = scalar_lea.vmem %s1931_s0, %s1940_s16  ;;  %s1292_s26 = sshll.u32 %s1940_s16, 1  ;;  %vm715_vm6 = vsmask.f32 256 }
  0x10   : > { %526 = vmatpush.bf16.msra.mxu3 %v1712_v3  ;;  %v1710_v11 = vld [vmem:[#allocation3 + $0xe8] sm:$0xff]  ;;  %v1693_v12 = vld [vmem:[#allocation3 + $0x60] sm:$0xff]  ;;  %v1692_v16 = vld [vmem:[#allocation3 + $0x58] sm:$0xff]  ;;  %s1913_s29 = scalar_lea.vmem %s1934_s3, %s1292_s26 }
  0x11   : > { %303 = vmatpush.bf16.msra.mxu0 %v1695_v4  ;;  %v1685_v13 = vld [vmem:[#allocation3 + $0x20] sm:$0xff]  ;;  %v1684_v17 = vld [vmem:[#allocation3 + $0x18] sm:$0xff]  ;;  %vm1885_vm2 = vmand %vm181_vm0, %vm182_vm1 }
  0x12   : > { %364 = vmatpush.bf16.msra.mxu1 %v1687_v5  ;;  %v1701_v14 = vld [vmem:[#allocation3 + $0xa0] sm:$0xff]  ;;  %v1700_v18 = vld [vmem:[#allocation3 + $0x98] sm:$0xff]  ;;  %v1691_v21 = vld [vmem:[#allocation3 + $0x50] sm:$0xff] }
  0x13   : > { %448 = vmatpush.bf16.msra.mxu2 %v1703_v6  ;;  %v1709_v15 = vld [vmem:[#allocation3 + $0xe0] sm:$0xff]  ;;  %v1708_v19 = vld [vmem:[#allocation3 + $0xd8] sm:$0xff]  ;;  %v193_v23 = vld [vmem:[%s175_s23] sm:$0x1] }
  0x14   : > { %527 = vmatpush.bf16.msra.mxu3 %v1711_v7  ;;  %v187_v22 = vld [vmem:[#allocation2 + $0x2] sm:$0x3]  ;;  %v1683_v24 = vld [vmem:[#allocation3 + $0x10] sm:$0xff]  ;;  %195 = vst [vmem:[#allocation1] ss:$2 sm:$0xff] %v193_v23  ;;  %v1690_v30 = vld [vmem:[#allocation3 + $0x48] sm:$0xff] }
  0x15   : > { %304 = vmatpush.bf16.msra.mxu0 %v1694_v8  ;;  %v188_v25 = vsel %vm1885_vm2, 0, %v187_v22  ;;  %v184_v26 = vld [vmem:[#allocation2] sm:$0x3]  ;;  %v1699_v27 = vld [vmem:[#allocation3 + $0x90] sm:$0xff]  ;;  %v1682_v31 = vld [vmem:[#allocation3 + $0x8] sm:$0xff] }
  0x16   : > { %365 = vmatpush.bf16.msra.mxu1 %v1686_v9  ;;  %v1707_v28 = vld [vmem:[#allocation3 + $0xd0] sm:$0xff]  ;;  %189 = vst [vmem:[#allocation2 + $0x2] sm:$0x3] %v188_v25  ;;  %v185_v29 = vsel %vm1885_vm2, 0, %v184_v26  ;;  %v1698_v32 = vld [vmem:[#allocation3 + $0x88] sm:$0xff]  ;;  %vm203_vm5 = vmand %vm201_vm3, %vm202_vm4 }
  0x17   : > { %449 = vmatpush.bf16.msra.mxu2 %v1702_v10  ;;  %186 = vst [vmem:[#allocation2] sm:$0x3] %v185_v29  ;;  %v1706_v33 = vld [vmem:[#allocation3 + $0xc8] sm:$0xff]  ;;  %v1689_v35 = vld [vmem:[#allocation3 + $0x40] sm:$0xff]  ;;  %v190_v41 = vld [vmem:[#allocation2 + $0x4] sm:$0x3] }
  0x18   : > { %528 = vmatpush.bf16.msra.mxu3 %v1710_v11  ;;  %v1681_v36 = vld [vmem:[#allocation3] sm:$0xff]  ;;  %v1720_v42 = vld [vmem:[#allocation3 + $0x138] sm:$0xff]  ;;  %v191_v45 = vsel %vm1885_vm2, 0, %v190_v41  ;;  %v1719_v48 = vld [vmem:[#allocation3 + $0x130] sm:$0xff] }
  0x19   : > { %305 = vmatpush.bf16.msra.mxu0 %v1693_v12  ;;  %v1697_v39 = vld [vmem:[#allocation3 + $0x80] sm:$0xff]  ;;  %v1728_v43 = vld [vmem:[#allocation3 + $0x178] sm:$0xff]  ;;  %192 = vst [vmem:[#allocation2 + $0x4] sm:$0x3] %v191_v45  ;;  %v1727_v49 = vld [vmem:[#allocation3 + $0x170] sm:$0xff] }
  0x1a   : > { %366 = vmatpush.bf16.msra.mxu1 %v1685_v13  ;;  %v1705_v40 = vld [vmem:[#allocation3 + $0xc0] sm:$0xff]  ;;  %v1744_v46 = vld [vmem:[#allocation3 + $0x1f8] sm:$0xff]  ;;  %v1743_v50 = vld [vmem:[#allocation3 + $0x1f0] sm:$0xff] }
  0x1b   : > { %450 = vmatpush.bf16.msra.mxu2 %v1701_v14  ;;  %v196_v34 = vld [vmem:[#allocation1] sm:$0xff]  ;;  %v1718_v53 = vld [vmem:[#allocation3 + $0x128] sm:$0xff]  ;;  %v1717_v58 = vld [vmem:[#allocation3 + $0x120] sm:$0xff] }
  0x1c   : > { %529 = vmatpush.bf16.msra.mxu3 %v1709_v15  ;;  %v197_v37 = vshll.u32 %v196_v34, 16  ;;  %v1736_v47 = vld [vmem:[#allocation3 + $0x1b8] sm:$0xff]  ;;  %v1735_v51 = vld [vmem:[#allocation3 + $0x1b0] sm:$0xff]  ;;  %v1726_v54 = vld [vmem:[#allocation3 + $0x168] sm:$0xff] }
  0x1d   : > { %306 = vmatpush.bf16.msra.mxu0 %v1692_v16  ;;  %v204_v38 = vld [vmem:[#allocation2 + $0x2] sm:$0x1]  ;;  %v1742_v56 = vld [vmem:[#allocation3 + $0x1e8] sm:$0xff]  ;;  %v1725_v59 = vld [vmem:[#allocation3 + $0x160] sm:$0xff] }
  0x1e   : > { %367 = vmatpush.bf16.msra.mxu1 %v1684_v17  ;;  %v205_v44 = vsel %vm203_vm5, %v197_v37, %v204_v38  ;;  %v208_v52 = vld [vmem:[#allocation2] sm:$0x1]  ;;  %v1734_v57 = vld [vmem:[#allocation3 + $0x1a8] sm:$0xff]  ;;  %v1741_v60 = vld [vmem:[#allocation3 + $0x1e0] sm:$0xff] }
  0x1f   : > { %451 = vmatpush.bf16.msra.mxu2 %v1700_v18  ;;  %206 = vst [vmem:[#allocation2 + $0x2] sm:$0x1] %v205_v44  ;;  %v1733_v61 = vld [vmem:[#allocation3 + $0x1a0] sm:$0xff]  ;;  %v1900_v62 = vld [vmem:[#allocation2 + $0x2] sm:$0x2]  ;;  %v1715_v5 = vld [vmem:[#allocation3 + $0x110] sm:$0xff] }
  0x20   : > { %530 = vmatpush.bf16.msra.mxu3 %v1708_v19  ;;  %v1716_v63 = vld [vmem:[#allocation3 + $0x118] sm:$0xff]  ;;  %v1723_v6 = vld [vmem:[#allocation3 + $0x150] sm:$0xff]  ;;  %v1714_v10 = vld [vmem:[#allocation3 + $0x108] sm:$0xff] }
  0x21   : > { %307 = vmatpush.bf16.msra.mxu0 %v1691_v21  ;;  %v1724_v0 = vld [vmem:[#allocation3 + $0x158] sm:$0xff]  ;;  %v1739_v7 = vld [vmem:[#allocation3 + $0x1d0] sm:$0xff]  ;;  %v1722_v11 = vld [vmem:[#allocation3 + $0x148] sm:$0xff] }
  0x22   : > { %368 = vmatpush.bf16.msra.mxu1 %v1683_v24  ;;  %v1740_v2 = vld [vmem:[#allocation3 + $0x1d8] sm:$0xff]  ;;  %v1731_v8 = vld [vmem:[#allocation3 + $0x190] sm:$0xff]  ;;  %v1738_v13 = vld [vmem:[#allocation3 + $0x1c8] sm:$0xff] }
  0x23   : > { %452 = vmatpush.bf16.msra.mxu2 %v1699_v27  ;;  %v1732_v3 = vld [vmem:[#allocation3 + $0x198] sm:$0xff]  ;;  %v1730_v14 = vld [vmem:[#allocation3 + $0x188] sm:$0xff]  ;;  %v1713_v15 = vld [vmem:[#allocation3 + $0x100] sm:$0xff] }
  0x24   : > { %531 = vmatpush.bf16.msra.mxu3 %v1707_v28  ;;  %v1721_v16 = vld [vmem:[#allocation3 + $0x140] sm:$0xff]  ;;  %v1752_v19 = vld [vmem:[#allocation3 + $0x238] sm:$0xff]  ;;  %v1751_v26 = vld [vmem:[#allocation3 + $0x230] sm:$0xff] }
  0x25   : > { %308 = vmatpush.bf16.msra.mxu0 %v1690_v30  ;;  %v1737_v17 = vld [vmem:[#allocation3 + $0x1c0] sm:$0xff]  ;;  %v1760_v20 = vld [vmem:[#allocation3 + $0x278] sm:$0xff]  ;;  %v1759_v27 = vld [vmem:[#allocation3 + $0x270] sm:$0xff] }
  0x26   : > { %369 = vmatpush.bf16.msra.mxu1 %v1682_v31  ;;  %v1896_v55 = vld [vmem:[#allocation2 + $0x2] sm:$0x1]  ;;  %v1729_v18 = vld [vmem:[#allocation3 + $0x180] sm:$0xff]  ;;  %v209_v21 = vld [vmem:[#allocation2] sm:$0x2] }
  0x27   : > { %453 = vmatpush.bf16.msra.mxu2 %v1698_v32  ;;  %249 = vst [vmem:[#allocation1] ss:$4 sm:$0xff] %v1896_v55  ;;  %v1768_v22 = vld [vmem:[#allocation3 + $0x2b8] sm:$0xff]  ;;  %v1767_v28 = vld [vmem:[#allocation3 + $0x2b0] sm:$0xff]  ;;  %v1750_v31 = vld [vmem:[#allocation3 + $0x228] sm:$0xff] }
  0x28   : > { %532 = vmatpush.bf16.msra.mxu3 %v1706_v33  ;;  %v1776_v23 = vld [vmem:[#allocation3 + $0x2f8] sm:$0xff]  ;;  %v1775_v29 = vld [vmem:[#allocation3 + $0x2f0] sm:$0xff]  ;;  %v1758_v32 = vld [vmem:[#allocation3 + $0x268] sm:$0xff] }
  0x29   : > { %309 = vmatpush.bf16.msra.mxu0 %v1689_v35  ;;  %v213_v30 = vld [vmem:[#allocation2 + $0x4] sm:$0x1]  ;;  %v1766_v33 = vld [vmem:[#allocation3 + $0x2a8] sm:$0xff]  ;;  %v1749_v37 = vld [vmem:[#allocation3 + $0x220] sm:$0xff] }
  0x2a   : > { %370 = vmatpush.bf16.msra.mxu1 %v1681_v36  ;;  %v1774_v35 = vld [vmem:[#allocation3 + $0x2e8] sm:$0xff]  ;;  %v1757_v38 = vld [vmem:[#allocation3 + $0x260] sm:$0xff]  ;;  %v214_v41 = vld [vmem:[#allocation2 + $0x4] sm:$0x2] }
  0x2b   : > { %454 = vmatpush.bf16.msra.mxu2 %v1697_v39  ;;  %v1765_v39 = vld [vmem:[#allocation3 + $0x2a0] sm:$0xff]  ;;  %v1764_v45 = vld [vmem:[#allocation3 + $0x298] sm:$0xff]  ;;  %vm1916_vm8 = vmand %vm201_vm3, %vm715_vm6 }
  0x2c   : > { %533 = vmatpush.bf16.msra.mxu3 %v1705_v40  ;;  %v1773_v40 = vld [vmem:[#allocation3 + $0x2e0] sm:$0xff] }
  0x2d   : > { %611 = vmatpush.bf16.msrb.mxu0 %v1720_v42  ;;  %371 = vmatmul.bf16.vlgmr.msra.gmra.mxu1 %v1896_v55  ;;  %v1748_v42 = vld [vmem:[#allocation3 + $0x218] sm:$0xff] }
  0x2e   : > { %696 = vmatpush.bf16.msrb.mxu1 %v1728_v43  ;;  %v250_v1 = vld.sshfl [vmem:[#allocation1] sm:$0xff pattern:$0x73625140] }
  0x2f   : > { %808 = vmatpush.bf16.msrb.mxu2 %v1744_v46  ;;  %534 = vmatmul.bf16.vlgmr.msra.gmra.mxu3 %v208_v52  ;;  %v251_v4 = vshrl.u32 %v250_v1, 16  ;;  %394 = vst [vmem:[#allocation1] ss:$4 sm:$0xff] %v1900_v62  ;;  %v1756_v43 = vld [vmem:[#allocation3 + $0x258] sm:$0xff] }
  0x30   : > { %869 = vmatpush.bf16.msrb.mxu3 %v1736_v47  ;;  %v1772_v46 = vld [vmem:[#allocation3 + $0x2d8] sm:$0xff] }
  0x31   : > { %612 = vmatpush.bf16.msrb.mxu0 %v1719_v48  ;;  %v1747_v48 = vld [vmem:[#allocation3 + $0x210] sm:$0xff] }
  0x32   : > { %697 = vmatpush.bf16.msrb.mxu1 %v1727_v49  ;;  %310 = vmatmul.bf16.vlgmr.msra.gmra.mxu0 %v251_v4  ;;  %v1755_v49 = vld [vmem:[#allocation3 + $0x250] sm:$0xff] }
  0x33   : > { %809 = vmatpush.bf16.msrb.mxu2 %v1743_v50  ;;  %v1763_v50 = vld [vmem:[#allocation3 + $0x290] sm:$0xff] }
  0x34   : > { %870 = vmatpush.bf16.msrb.mxu3 %v1735_v51  ;;  %v1771_v51 = vld [vmem:[#allocation3 + $0x2d0] sm:$0xff] }
  0x35   : > { %613 = vmatpush.bf16.msrb.mxu0 %v1718_v53  ;;  %v1754_v53 = vld [vmem:[#allocation3 + $0x248] sm:$0xff] }
  0x36   : > { %698 = vmatpush.bf16.msrb.mxu1 %v1726_v54  ;;  %v395_v9 = vld.sshfl [vmem:[#allocation1] sm:$0xff pattern:$0x73625140]  ;;  %v1762_v54 = vld [vmem:[#allocation3 + $0x288] sm:$0xff] }
  0x37   : > { %810 = vmatpush.bf16.msrb.mxu2 %v1742_v56  ;;  %v397_v12 = vrot.slane %v395_v9, 1  ;;  %558 = vst [vmem:[#allocation1] ss:$4 sm:$0xff] %v208_v52  ;;  %v1746_v52 = vld [vmem:[#allocation3 + $0x208] sm:$0xff] }
  0x38   : > { %871 = vmatpush.bf16.msrb.mxu3 %v1734_v57  ;;  %v1770_v56 = vld [vmem:[#allocation3 + $0x2c8] sm:$0xff] }
  0x39   : > { %614 = vmatpush.bf16.msrb.mxu0 %v1717_v58  ;;  %455 = vmatmul.bf16.vlgmr.msra.gmra.mxu2 %v397_v12  ;;  %v1745_v58 = vld [vmem:[#allocation3 + $0x200] sm:$0xff] }
  0x3a   : > { %699 = vmatpush.bf16.msrb.mxu1 %v1725_v59  ;;  %v1753_v59 = vld [vmem:[#allocation3 + $0x240] sm:$0xff] }
  0x3b   : > { %811 = vmatpush.bf16.msrb.mxu2 %v1741_v60  ;;  %v1761_v60 = vld [vmem:[#allocation3 + $0x280] sm:$0xff] }
  0x3c   : > { %872 = vmatpush.bf16.msrb.mxu3 %v1733_v61  ;;  %v1769_v61 = vld [vmem:[#allocation3 + $0x2c0] sm:$0xff] }
  0x3d   : > { %615 = vmatpush.bf16.msrb.mxu0 %v1716_v63 }
  0x3e   : > { %700 = vmatpush.bf16.msrb.mxu1 %v1724_v0  ;;  %v559_v24 = vld.sshfl [vmem:[#allocation1] sm:$0xff pattern:$0x73625140] }
  0x3f   : > { %812 = vmatpush.bf16.msrb.mxu2 %v1740_v2  ;;  %v560_v25 = vshrl.u32 %v559_v24, 16  ;;  %643 = vst [vmem:[#allocation1] ss:$4 sm:$0xff] %v209_v21  ;;  %v717_v24 = vld [vmem:[%s1913_s29] sm:$0x1] }
  0x40   : > { %873 = vmatpush.bf16.msrb.mxu3 %v1732_v3 }
  0x41   : > { %616 = vmatpush.bf16.msrb.mxu0 %v1715_v5 }
  0x42   : > { %701 = vmatpush.bf16.msrb.mxu1 %v1723_v6 }
  0x43   : > { %813 = vmatpush.bf16.msrb.mxu2 %v1739_v7 }
  0x44   : > { %874 = vmatpush.bf16.msrb.mxu3 %v1731_v8 }
  0x45   : > { %617 = vmatpush.bf16.msrb.mxu0 %v1714_v10 }
  0x46   : > { %702 = vmatpush.bf16.msrb.mxu1 %v1722_v11  ;;  %v644_v34 = vld.sshfl [vmem:[#allocation1] sm:$0xff pattern:$0x73625140] }
  0x47   : > { %814 = vmatpush.bf16.msrb.mxu2 %v1738_v13  ;;  %v646_v36 = vrot.slane %v644_v34, 1  ;;  %755 = vst [vmem:[#allocation1] ss:$4 sm:$0xff] %v213_v30 }
  0x48   : > { %875 = vmatpush.bf16.msrb.mxu3 %v1730_v14 }
  0x49   : > { %618 = vmatpush.bf16.msrb.mxu0 %v1713_v15 }
  0x4a   : > { %703 = vmatpush.bf16.msrb.mxu1 %v1721_v16 }
  0x4b   : > { %815 = vmatpush.bf16.msrb.mxu2 %v1737_v17 }
  0x4c   : > { %876 = vmatpush.bf16.msrb.mxu3 %v1729_v18  ;;  %619 = vmatmul.bf16.vlgmr.msrb.gmra.mxu0 %v560_v25 }
  0x4d   : > { %953 = vmatpush.bf16.msra.mxu0 %v1752_v19  ;;  %704 = vmatmul.bf16.vlgmr.msrb.gmra.mxu1 %v646_v36 }
  0x4e   : > { %1032 = vmatpush.bf16.msra.mxu1 %v1760_v20  ;;  %v756_v44 = vld.sshfl [vmem:[#allocation1] sm:$0xff pattern:$0x73625140] }
  0x4f   : > { %1116 = vmatpush.bf16.msra.mxu2 %v1768_v22  ;;  %877 = vmatmul.bf16.vlgmr.msrb.gmra.mxu3 %v213_v30  ;;  %v757_v47 = vshrl.u32 %v756_v44, 16  ;;  %900 = vst [vmem:[#allocation1] ss:$4 sm:$0xff] %v214_v41 }
  0x50   : > { %1200 = vmatpush.bf16.msra.mxu3 %v1776_v23 }
  0x51   : > { %954 = vmatpush.bf16.msra.mxu0 %v1751_v26  ;;  %816 = vmatmul.bf16.vlgmr.msrb.gmra.mxu2 %v757_v47 }
  0x52   : > { %1033 = vmatpush.bf16.msra.mxu1 %v1759_v27 }
  0x53   : > { %1117 = vmatpush.bf16.msra.mxu2 %v1767_v28 }
  0x54   : > { %1201 = vmatpush.bf16.msra.mxu3 %v1775_v29 }
  0x55   : > { %955 = vmatpush.bf16.msra.mxu0 %v1750_v31 }
  0x56   : > { %1034 = vmatpush.bf16.msra.mxu1 %v1758_v32  ;;  %v901_v57 = vld.sshfl [vmem:[#allocation1] sm:$0xff pattern:$0x73625140] }
  0x57   : > { %1118 = vmatpush.bf16.msra.mxu2 %v1766_v33  ;;  %1063 = vst [vmem:[#allocation1] ss:$4 sm:$0xff] %v1896_v55  ;;  %v903_v63 = vrot.slane %v901_v57, 1 }
  0x58   : > { %1202 = vmatpush.bf16.msra.mxu3 %v1774_v35 }
  0x59   : > { %956 = vmatpush.bf16.msra.mxu0 %v1749_v37 }
  0x5a   : > { %1035 = vmatpush.bf16.msra.mxu1 %v1757_v38 }
  0x5b   : > { %1119 = vmatpush.bf16.msra.mxu2 %v1765_v39 }
  0x5c   : > { %1203 = vmatpush.bf16.msra.mxu3 %v1773_v40 }
  0x5d   : > { %957 = vmatpush.bf16.msra.mxu0 %v1748_v42 }
  0x5e   : > { %1036 = vmatpush.bf16.msra.mxu1 %v1756_v43  ;;  %v1064_v0 = vld.sshfl [vmem:[#allocation1] sm:$0xff pattern:$0x73625140] }
  0x5f   : > { %1120 = vmatpush.bf16.msra.mxu2 %v1764_v45  ;;  %v1065_v1 = vshrl.u32 %v1064_v0, 16  ;;  %1147 = vst [vmem:[#allocation1] ss:$4 sm:$0xff] %v1900_v62  ;;  %v207_v62 = vld [vmem:[%s1933_s2] sm:$0x1] }
  0x60   : > { %1204 = vmatpush.bf16.msra.mxu3 %v1772_v46  ;;  %v1677_v46 = vld [vmem:[%s1913_s29 + $0x1] sm:$0x1] }
  0x61   : > { %958 = vmatpush.bf16.msra.mxu0 %v1747_v48 }
  0x62   : > { %1037 = vmatpush.bf16.msra.mxu1 %v1755_v49 }
  0x63   : > { %1121 = vmatpush.bf16.msra.mxu2 %v1763_v50 }
  0x64   : > { %1205 = vmatpush.bf16.msra.mxu3 %v1771_v51 }
  0x65   : > { %959 = vmatpush.bf16.msra.mxu0 %v1746_v52 }
  0x66   : > { %1038 = vmatpush.bf16.msra.mxu1 %v1754_v53  ;;  %v1148_v2 = vld.sshfl [vmem:[#allocation1] sm:$0xff pattern:$0x73625140] }
  0x67   : > { %1122 = vmatpush.bf16.msra.mxu2 %v1762_v54  ;;  %v1150_v3 = vrot.slane %v1148_v2, 1 }
  0x68   : > { %1206 = vmatpush.bf16.msra.mxu3 %v1770_v56 }
  0x69   : > { %960 = vmatpush.bf16.msra.mxu0 %v1745_v58 }
  0x6a   : > { %1039 = vmatpush.bf16.msra.mxu1 %v1753_v59 }
  0x6b   : > { %1123 = vmatpush.bf16.msra.mxu2 %v1761_v60 }
  0x6c   : > { %1207 = vmatpush.bf16.msra.mxu3 %v1769_v61  ;;  %961 = vmatmul.bf16.vlgmr.msra.gmra.mxu0 %v903_v63 }
  0x6d   : > { %1040 = vmatmul.bf16.vlgmr.msra.gmra.mxu1 %v1896_v55 }
  0x6e   : > { %1124 = vmatmul.bf16.vlgmr.msra.gmra.mxu2 %v1065_v1 }
  0x6f   : > { %1208 = vmatmul.bf16.vlgmr.msra.gmra.mxu3 %v1150_v3 }
  0xaa   : > { %v372_v4 = vpop.f32.mrf.mxu1 }
  0xaf   : > { %v311_v7 = vpop.f32.mrf.mxu0 }
  0xb0   : > { %v373_v10 = vadd.f32 %v372_v4, %v311_v7 }
  0xb2   : > { %v535_v5 = vpop.f32.mrf.mxu3  ;;  %v374_v6 = vpop.f32.mrf.mxu1 }
  0xb7   : > { %v313_v9 = vpop.f32.mrf.mxu0 }
  0xba   : > { %v537_v8 = vpop.f32.mrf.mxu3 }
  0xbc   : > { %v456_v11 = vpop.f32.mrf.mxu2 }
  0xbd   : > { %v460_v12 = vadd.f32 %v456_v11, %v373_v10 }
  0xbf   : > { %v539_v13 = vadd.f32 %v535_v5, %v460_v12 }
  0xc4   : > { %v458_v15 = vpop.f32.mrf.mxu2 }
  0xc9   : > { %v620_v14 = vpop.f32.mrf.mxu0 }
  0xca   : > { %v624_v55 = vadd.f32 %v620_v14, %v539_v13  ;;  %v705_v17 = vpop.f32.mrf.mxu1 }
  0xcc   : > { %v709_v18 = vadd.f32 %v705_v17, %v624_v55 }
  0xce   : > { %v710_v20 = vadd.f32 %v709_v18, %v207_v62 }
  0xd0   : > { %vm711_vm7 = vcmp.ge.f32.partialorder %v710_v20, 0.0  ;;  %v712_v21 = vmul.f32 0.2, %v710_v20 }
  0xd1   : > { %v622_v19 = vpop.f32.mrf.mxu0 }
  0xd2   : > { %v878_v16 = vpop.f32.mrf.mxu3  ;;  %v713_v22 = vsel %vm711_vm7, %v710_v20, %v712_v21  ;;  %v707_v27 = vpop.f32.mrf.mxu1 }
  0xd3   : > { %v714_v26 = vpack.c.bf16 %v713_v22, %v713_v22 }
  0xd4   : > { %v817_v29 = vpop.f32.mrf.mxu2 }
  0xd5   : > { %v718_v28 = vsel %vm1916_vm8, %v714_v26, %v717_v24  ;;  %v879_v33 = vadd.f32 %v878_v16, %v817_v29 }
  0xd6   : > { %719 = vst [vmem:[%s1913_s29] sm:$0x1] %v718_v28 }
  0xda   : > { %v880_v25 = vpop.f32.mrf.mxu3 }
  0xdc   : > { %v819_v30 = vpop.f32.mrf.mxu2 }
  0xe9   : > { %v962_v31 = vpop.f32.mrf.mxu0 }
  0xea   : > { %v1041_v32 = vpop.f32.mrf.mxu1  ;;  %v966_v34 = vadd.f32 %v962_v31, %v879_v33 }
  0xec   : > { %v1045_v38 = vadd.f32 %v1041_v32, %v966_v34 }
  0xf1   : > { %v1125_v35 = vpop.f32.mrf.mxu2  ;;  %v964_v36 = vpop.f32.mrf.mxu0 }
  0xf2   : > { %v1043_v37 = vpop.f32.mrf.mxu1  ;;  %v1129_v39 = vadd.f32 %v1125_v35, %v1045_v38  ;;  %v1209_v40 = vpop.f32.mrf.mxu3 }
  0xf4   : > { %v1213_v42 = vadd.f32 %v1209_v40, %v1129_v39 }
  0xf6   : > { %v1214_v43 = vadd.f32 %v1213_v42, %v207_v62 }
  0xf8   : > { %vm1215_vm9 = vcmp.ge.f32.partialorder %v1214_v43, 0.0  ;;  %v1216_v44 = vmul.f32 0.2, %v1214_v43 }
  0xf9   : > { %v1127_v41 = vpop.f32.mrf.mxu2 }
  0xfa   : > { %v1217_v45 = vsel %vm1215_vm9, %v1214_v43, %v1216_v44  ;;  %v1211_v48 = vpop.f32.mrf.mxu3 }
  0xfb   : > { %v1218_v47 = vpack.c.bf16 %v1217_v45, %v1217_v45 }
  0xfd   : > { %v1221_v49 = vsel %vm1916_vm8, %v1218_v47, %v1677_v46 }
  0xfe   : > { %1678 = vst [vmem:[%s1913_s29 + $0x1] sm:$0x1] %v1221_v49 }
  0xff PF: > { %s14_s12 = sadd.s32 1, %s1838_s12  }
 0x100   : > { %p11_p7 = scmp.ge.s32.totalorder %s14_s12, 4  }
 0x102   :  { %13 = sbr.rel (!%p11_p7) target bundleno = 1 (0x1), region = 81 }
 0x107   :  { %1242 = vsyncpa [#allocation4], 1 }
 0x108   :  { %1244 = vsyncpa [#allocation4 + $0x1], 1 }

// kernel: _lambda_.10
= control target key start
LH: loop header
LB: loop body
LE: loop exit
PB: predicated region body
PF: predicated region fallthrough
CT: control target
= control target key end

     0   :  { %8 = vsyncpa [#allocation4], 0  ;;  %s1095_s12 = smov 0   ;;  %s1188_s0 = inlined_call_operand.vmem [shape: bf16[2,4,4,32], index: 0, kind: input, shape index: {}]   ;;  %s1189_s1 = inlined_call_operand.hbm [shape: bf16[2,2,3,32,32], index: 1, kind: input, shape index: {}]   ;;  %s1190_s2 = inlined_call_operand.vmem [shape: f32[1,32], index: 2, kind: input, shape index: {}]   ;;  %s1191_s3 = inlined_call_operand.vmem [shape: bf16[2,4,2,4,32], index: 3, kind: output, shape index: {}]  }
   0x1 LB: > { %s124_s15 = sshll.u32 %s1189_s1, 4  ;;  %s828_s16 = sadd.s32 4294967295, %s1065_s12   ;;  %s1065_s12 = sphi %s1095_s12, %s14_s12   ;;  %s125_s15 = int_to_ptr.hbm [resolvable:$true] %s124_s15 }
   0x2   : > { %p830_p0 = scmp.ge.s32.totalorder %s1065_s12, 1  ;;  %p113_p1 = scmp.lt.s32.totalorder %s1065_s12, 3 }
   0x3   : > { %p999_p2 = scmp.eq.s32.totalorder %s828_s16, 0  ;;  %s1071_s17 = smov [#allocation3]  }
   0x4   : > { %p114_p3 = pnand %p830_p0, %p113_p1  ;;  %s126_s18 = sshll.u32 %s1071_s17, 4  ;;  %s127_s18 = int_to_ptr.vmem [resolvable:$true] %s126_s18 }
   0x5   : > { %s1072_s19 = smov 64   ;;  %s1073_s20 = smov 4  }
   0x6   : > { %p995_p4 = pneg %p114_p3  ;;  %153 = sbr.rel (%p114_p3) target bundleno = 230 (0xe6), region = 32 }
   0x8   : > { %p996_p5 = pnand %p999_p2, %p995_p4 }
   0xa   : > { %998 = dma.hbm_to_vmem [thread:$0]  (!%p996_p5), %s125_s15, 3072, %s127_s18, [#allocation4], %s1072_s19, %s1072_s19, %s1073_s20  }
   0xb   : > { %1060 = dma.done.wait (%p999_p2), [#allocation4], 3072  }
   0xc   : > { %1062 = vsyncadd (%p999_p2), [#allocation4], 4294964224  ;;  %p178_p6 = scmp.lt.s32.totalorder %s828_s16, 1  ;;  %vm189_vm0 = vcmask 256000   ;;  %v1074_v0 = vmov 0   ;;  %s1138_s4 = smov 0  }
   0xd   : > { %191 = vst.msk [vmem:[#allocation2 + $0x4] sm:$0x7] %vm189_vm0, %v1074_v0  ;;  %v1123_v1 = vld [vmem:[%s1190_s2] sm:$0x1]  ;;  %vm245_vm1 = vsmask.f32 2306 }
   0xe   : > { %s1195_s16 = smov (!%p178_p6, %s828_s16), 1  ;;  %190 = vst.msk [vmem:[#allocation2] sm:$0x7] %vm189_vm0, %v1074_v0  ;;  %vm1126_vm2 = vmand %vm189_vm0, %vm245_vm1 }
   0xf   : > { %192 = vst.msk [vmem:[#allocation2 + $0x8] sm:$0x7] %vm189_vm0, %v1074_v0  ;;  %s963_s21 = sshll.u32 %s1195_s16, 3  ;;  %s964_s22 = sshll.u32 %s1195_s16, 4 }
  0x10   : > { %193 = vst.msk [vmem:[#allocation2 + $0xc] sm:$0x7] %vm189_vm0, %v1074_v0  ;;  %s182_s25 = scalar_lea.vmem %s1188_s0, %s963_s21  ;;  %s1116_s28 = scalar_lea.vmem %s1191_s3, %s964_s22 }
  0x11   : > { %194 = vst.msk [vmem:[#allocation2 + $0x10] sm:$0x7] %vm189_vm0, %v1074_v0  ;;  %v196_v2 = vld [vmem:[%s182_s25] sm:$0x3]  ;;  %v197_v3 = vld [vmem:[%s182_s25 + $0x2] sm:$0x3] }
  0x12   : > { %195 = vst.msk [vmem:[#allocation2 + $0x14] sm:$0x7] %vm189_vm0, %v1074_v0  ;;  %v198_v4 = vld [vmem:[%s182_s25 + $0x4] sm:$0x3]  ;;  %v199_v5 = vld [vmem:[%s182_s25 + $0x6] sm:$0x3] }
  0x13   : > { %201 = vst [vmem:[#allocation1] ss:$2 sm:$0xff] %v196_v2 }
  0x14   : > { %205 = vst [vmem:[#allocation1 + $0x10] ss:$2 sm:$0xff] %v197_v3  ;;  %v247_v16 = vld [vmem:[#allocation2 + $0x4] sm:$0x7] }
  0x15   : > { %209 = vst [vmem:[#allocation1 + $0x20] ss:$2 sm:$0xff] %v198_v4 }
  0x16   : > { %213 = vst [vmem:[#allocation1 + $0x30] ss:$2 sm:$0xff] %v199_v5  ;;  %v250_v21 = vld [vmem:[#allocation2 + $0x8] sm:$0x7] }
  0x17   : > { %v253_v25 = vld [vmem:[#allocation2 + $0xc] sm:$0x7] }
  0x18   : > { %v256_v30 = vld [vmem:[#allocation2 + $0x10] sm:$0x7] }
  0x1a   : > { %v202_v6 = vld.sshfl [vmem:[#allocation1] sm:$0xff pattern:$0x75643120] }
  0x1b   : > { %v215_v7 = vshrl.u32 %v202_v6, 16  ;;  %v206_v8 = vld.sshfl [vmem:[#allocation1 + $0x10] sm:$0xff pattern:$0x75643120]  ;;  %v218_v12 = vshll.u32 %v202_v6, 16 }
  0x1c   : > { %v221_v9 = vshrl.u32 %v206_v8, 16  ;;  %v210_v10 = vld.sshfl [vmem:[#allocation1 + $0x20] sm:$0xff pattern:$0x75643120]  ;;  %v224_v18 = vshll.u32 %v206_v8, 16 }
  0x1d   : > { %v217_v11 = vrot.slane %v215_v7, 7  ;;  %v227_v13 = vshrl.u32 %v210_v10, 16  ;;  %v214_v14 = vld.sshfl [vmem:[#allocation1 + $0x30] sm:$0xff pattern:$0x75643120]  ;;  %v230_v23 = vshll.u32 %v210_v10, 16 }
  0x1e   : > { %v223_v17 = vrot.slane %v221_v9, 7  ;;  %v233_v19 = vshrl.u32 %v214_v14, 16  ;;  %v236_v27 = vshll.u32 %v214_v14, 16 }
  0x1f   : > { %v220_v20 = vor.u32 %v218_v12, %v217_v11  ;;  %v229_v22 = vrot.slane %v227_v13, 7 }
  0x20   : > { %v226_v24 = vor.u32 %v224_v18, %v223_v17  ;;  %v235_v26 = vrot.slane %v233_v19, 7 }
  0x21   : > { %v248_v28 = vsel %vm1126_vm2, %v220_v20, %v247_v16  ;;  %v232_v29 = vor.u32 %v230_v23, %v229_v22 }
  0x22   : > { %249 = vst [vmem:[#allocation2 + $0x4] sm:$0x7] %v248_v28  ;;  %v251_v31 = vsel %vm1126_vm2, %v226_v24, %v250_v21  ;;  %v238_v32 = vor.u32 %v236_v27, %v235_v26 }
  0x23   : > { %252 = vst [vmem:[#allocation2 + $0x8] sm:$0x7] %v251_v31  ;;  %v254_v33 = vsel %vm1126_vm2, %v232_v29, %v253_v25 }
  0x24   : > { %255 = vst [vmem:[#allocation2 + $0xc] sm:$0x7] %v254_v33  ;;  %v257_v34 = vsel %vm1126_vm2, %v238_v32, %v256_v30 }
  0x25   : > { %258 = vst [vmem:[#allocation2 + $0x10] sm:$0x7] %v257_v34 }
  0x26 LB: >> { %v966_v35 = vld [vmem:[#allocation3 + $0x8] sm:$0xff]  ;;  %v972_v36 = vld [vmem:[#allocation3 + $0x38] sm:$0xff]  ;;  %v965_v39 = vld [vmem:[#allocation3] sm:$0xff]  ;;  %s839_s5 = sshll.u32 %s1069_s4, 2  ;;  %vm314_vm3 = vcmask 261120   ;;  %vm524_vm5 = vcmask 254976   ;;  %s1069_s4 = sphi %s1138_s4, %s265_s4  }
  0x27   : >> { %v970_v37 = vld [vmem:[#allocation3 + $0x28] sm:$0xff]  ;;  %v968_v38 = vld [vmem:[#allocation3 + $0x18] sm:$0xff]  ;;  %352 = vmatpush.bf16.msra.mxu1 %v966_v35  ;;  %423 = vmatpush.bf16.msra.mxu3 %v972_v36  ;;  %v971_v40 = vld [vmem:[#allocation3 + $0x30] sm:$0xff]  ;;  %s1146_s6 = scalar_lea.vmem [#allocation2], %s839_s5  ;;  %s523_s7 = scalar_lea.vmem %s1116_s28, %s839_s5 }
  0x28   : >> { %389 = vmatpush.bf16.msra.mxu2 %v970_v37  ;;  %324 = vmatpush.bf16.msra.mxu0 %v968_v38  ;;  %v969_v41 = vld [vmem:[#allocation3 + $0x20] sm:$0xff]  ;;  %v967_v42 = vld [vmem:[#allocation3 + $0x10] sm:$0xff]  ;;  %v981_v44 = vld [vmem:[#allocation3 + $0x78] sm:$0xff]  ;;  %s265_s4 = sadd.s32 1, %s1069_s4  }
  0x29   : >> { %v974_v45 = vld [vmem:[#allocation3 + $0x48] sm:$0xff]  ;;  %v976_v52 = vld [vmem:[#allocation3 + $0x58] sm:$0xff]  ;;  %v980_v56 = vld [vmem:[#allocation3 + $0x70] sm:$0xff]  ;;  %p262_p7 = scmp.ge.s32.totalorder %s265_s4, 4  }
  0x2a   : >> { %v979_v48 = vld [vmem:[#allocation3 + $0x68] sm:$0xff]  ;;  %v973_v57 = vld [vmem:[#allocation3 + $0x40] sm:$0xff]  ;;  %v975_v0 = vld [vmem:[#allocation3 + $0x50] sm:$0xff] }
  0x2b   : >> { %353 = vmatpush.bf16.msra.mxu1 %v965_v39  ;;  %424 = vmatpush.bf16.msra.mxu3 %v971_v40  ;;  %v987_v60 = vld [vmem:[#allocation3 + $0xa8] sm:$0xff]  ;;  %v978_v2 = vld [vmem:[#allocation3 + $0x60] sm:$0xff]  ;;  %v989_v5 = vld [vmem:[#allocation3 + $0xb8] sm:$0xff] }
  0x2c   : >> { %v843_v43 = vld [vmem:[%s1146_s6 + $0x4] sm:$0x6]  ;;  %v268_v50 = vld [vmem:[%s1146_s6] sm:$0x3]  ;;  %390 = vmatpush.bf16.msra.mxu2 %v969_v41  ;;  %325 = vmatpush.bf16.msra.mxu0 %v967_v42  ;;  %v846_v54 = vld [vmem:[%s1146_s6 + $0x8] sm:$0x7] }
  0x2d   : >> { %v365_v46 = vunpack.c.l.b16 %v843_v43  ;;  %v842_v47 = vld [vmem:[%s1146_s6 + $0x4] sm:$0x7]  ;;  %v537_v58 = vunpack.c.l.b16 %v846_v54  ;;  %v269_v61 = vld [vmem:[%s1146_s6] sm:$0x7]  ;;  %v985_v6 = vld [vmem:[#allocation3 + $0x98] sm:$0xff] }
  0x2e   : >> { %v1151_v49 = vld [vmem:[%s1146_s6 + $0x4] sm:$0x3]  ;;  %v293_v51 = vunpack.c.l.b16 %v842_v47  ;;  %883 = vmatmul.msk.bf16.vlgmr.msra.gmra.mxu3 %vm314_vm3, %v268_v50  ;;  %v270_v3 = vld [vmem:[%s1146_s6] sm:$0x6]  ;;  %v437_v8 = vunpack.c.l.b16 %v269_v61  ;;  %v983_v10 = vld [vmem:[#allocation3 + $0x88] sm:$0xff]  ;;  %v514_v47 = vperm.slane %v1123_v1, 0 }
  0x2f   : >> { %v1154_v53 = vpack.c.b16 %v365_v46, %v365_v46  ;;  %865 = vmatmul.msk.bf16.vlgmr.msra.gmra.mxu1 %vm314_vm3, %v1151_v49  ;;  %595 = vmatpush.bf16.msrb.mxu3 %v979_v48  ;;  %v538_v4 = vpack.c.b16 %v537_v58, %v537_v58  ;;  %v481_v9 = vunpack.c.l.b16 %v270_v3  ;;  %v986_v11 = vld [vmem:[#allocation3 + $0xa0] sm:$0xff]  ;;  %v984_v14 = vld [vmem:[#allocation3 + $0x90] sm:$0xff]  ;;  %v845_v23 = vld [vmem:[%s1146_s6 + $0x8] sm:$0x3] }
  0x30   : >> { %567 = vmatpush.bf16.msrb.mxu2 %v981_v44  ;;  %v294_v55 = vpack.c.b16 %v293_v51, %v293_v51  ;;  %467 = vmatpush.bf16.msrb.mxu0 %v974_v45  ;;  %v988_v15 = vld [vmem:[#allocation3 + $0xb0] sm:$0xff]  ;;  %v438_v16 = vpack.c.b16 %v437_v8, %v437_v8  ;;  %v982_v18 = vld [vmem:[#allocation3 + $0x80] sm:$0xff]  ;;  %v847_v28 = vld [vmem:[%s1146_s6 + $0x8] sm:$0x6] }
  0x31   : >> { %v367_v59 = vrot.slane %v1154_v53, 1  ;;  %505 = vmatpush.bf16.msrb.mxu1 %v976_v52  ;;  %v542_v13 = vshll.u32 %v538_v4, 16  ;;  %v482_v17 = vpack.c.b16 %v481_v9, %v481_v9  ;;  %v540_v19 = vshrl.u32 %v538_v4, 16 }
  0x32   : >> { %v296_v62 = vshrl.u32 %v294_v55, 16  ;;  %v298_v63 = vshll.u32 %v294_v55, 16  ;;  %v442_v21 = vshll.u32 %v438_v16, 16  ;;  %v440_v25 = vshrl.u32 %v438_v16, 16 }
  0x33   : >> { %874 = vmatmul.msk.bf16.vlgmr.msra.gmra.mxu2 %vm314_vm3, %v367_v59  ;;  %596 = vmatpush.bf16.msrb.mxu3 %v978_v2  ;;  %v544_v20 = vrot.slane %v542_v13, 1  ;;  %v483_v22 = vrot.slane %v482_v17, 1  ;;  %v608_v29 = vunpack.c.l.b16 %v847_v28 }
  0x34   : >> { %v300_v7 = vrot.slane %v298_v63, 1  ;;  %568 = vmatpush.bf16.msrb.mxu2 %v980_v56  ;;  %468 = vmatpush.bf16.msrb.mxu0 %v973_v57  ;;  %v444_v26 = vrot.slane %v442_v21, 1 }
  0x35   : >> { %506 = vmatpush.bf16.msrb.mxu1 %v975_v0  ;;  %v545_v24 = vor.u32 %v544_v20, %v540_v19  ;;  %v609_v30 = vpack.c.b16 %v608_v29, %v608_v29 }
  0x36   : >> { %v301_v12 = vor.u32 %v300_v7, %v296_v62  ;;  %v445_v27 = vor.u32 %v444_v26, %v440_v25 }
  0x37   : >> { %725 = vmatpush.bf16.msra.mxu3 %v989_v5  ;;  %v610_v31 = vrot.slane %v609_v30, 1 }
  0x38   : >> { %694 = vmatpush.bf16.msra.mxu2 %v987_v60  ;;  %856 = vmatmul.msk.bf16.vlgmr.msra.gmra.mxu0 %vm314_vm3, %v301_v12 }
  0x39   : >> { %663 = vmatpush.bf16.msra.mxu1 %v985_v6  ;;  %632 = vmatpush.bf16.msra.mxu0 %v983_v10 }
  0x3b   : >> { %726 = vmatpush.bf16.msra.mxu3 %v988_v15 }
  0x3c   : >> { %695 = vmatpush.bf16.msra.mxu2 %v986_v11 }
  0x3d   : >> { %664 = vmatpush.bf16.msra.mxu1 %v984_v14  ;;  %633 = vmatpush.bf16.msra.mxu0 %v982_v18 }
  0x3e   : >> { %921 = vmatmul.msk.bf16.vlgmr.msrb.gmra.mxu3 %vm314_vm3, %v845_v23 }
  0x3f   : >> { %901 = vmatmul.msk.bf16.vlgmr.msrb.gmra.mxu1 %vm314_vm3, %v483_v22 }
  0x43   : >> { %912 = vmatmul.msk.bf16.vlgmr.msrb.gmra.mxu2 %vm314_vm3, %v545_v24 }
  0x48   : >> { %892 = vmatmul.msk.bf16.vlgmr.msrb.gmra.mxu0 %vm314_vm3, %v445_v27 }
  0x4e   : >> { %957 = vmatmul.msk.bf16.vlgmr.msra.gmra.mxu3 %vm314_vm3, %v367_v59 }
  0x4f   : >> { %939 = vmatmul.msk.bf16.vlgmr.msra.gmra.mxu1 %vm314_vm3, %v1151_v49 }
  0x53   : >> { %948 = vmatmul.msk.bf16.vlgmr.msra.gmra.mxu2 %vm314_vm3, %v301_v12 }
  0x58   : >> { %930 = vmatmul.msk.bf16.vlgmr.msra.gmra.mxu0 %vm314_vm3, %v610_v31 }
  0xac   : >> { %v355_v32 = vpop.f32.mrf.mxu1 }
  0xb1   : >> { %v426_v33 = vpop.f32.mrf.mxu3 }
  0xb4   : >> { %v357_v36 = vpop.f32.mrf.mxu1 }
  0xb5   : >> { %v327_v34 = vpop.f32.mrf.mxu0 }
  0xb6   : >> { %v392_v35 = vpop.f32.mrf.mxu2  ;;  %v356_v37 = vadd.f32 %v355_v32, %v327_v34 }
  0xb8   : >> { %v396_v42 = vadd.f32 %v392_v35, %v356_v37 }
  0xb9   : >> { %v428_v38 = vpop.f32.mrf.mxu3 }
  0xba   : >> { %v430_v43 = vadd.f32 %v426_v33, %v396_v42 }
  0xbc   : >> { %v508_v41 = vpop.f32.mrf.mxu1 }
  0xbd   : >> { %v329_v39 = vpop.f32.mrf.mxu0 }
  0xbe   : >> { %v394_v40 = vpop.f32.mrf.mxu2 }
  0xc1   : >> { %v598_v44 = vpop.f32.mrf.mxu3 }
  0xc4   : >> { %v510_v49 = vpop.f32.mrf.mxu1 }
  0xc5   : >> { %v470_v45 = vpop.f32.mrf.mxu0 }
  0xc6   : >> { %v474_v46 = vadd.f32 %v470_v45, %v430_v43  ;;  %v570_v48 = vpop.f32.mrf.mxu2 }
  0xc7   : >> { %v599_v59 = vadd.f32 %v598_v44, %v570_v48 }
  0xc8   : >> { %v512_v50 = vadd.f32 %v508_v41, %v474_v46 }
  0xc9   : >> { %v600_v53 = vpop.f32.mrf.mxu3 }
  0xca   : >> { %v516_v51 = vadd.f32 %v514_v47, %v512_v50 }
  0xcc   : >> { %vm517_vm4 = vcmp.ge.f32.partialorder %v516_v51, 0.0  ;;  %v518_v52 = vmul.f32 0.2, %v516_v51  ;;  %v666_v57 = vpop.f32.mrf.mxu1 }
  0xcd   : >> { %v472_v54 = vpop.f32.mrf.mxu0 }
  0xce   : >> { %v519_v55 = vsel %vm517_vm4, %v516_v51, %v518_v52  ;;  %v572_v56 = vpop.f32.mrf.mxu2 }
  0xcf   : >> { %v520_v58 = vpack.c.bf16 %v519_v55, %v519_v55 }
  0xd1   : >> { %525 = vst.msk [vmem:[%s523_s7] sm:$0x3] %vm524_vm5, %v520_v58  ;;  %v728_v60 = vpop.f32.mrf.mxu3 }
  0xd4   : >> { %v668_v0 = vpop.f32.mrf.mxu1 }
  0xd5   : >> { %v635_v61 = vpop.f32.mrf.mxu0 }
  0xd6   : >> { %v639_v62 = vadd.f32 %v635_v61, %v599_v59  ;;  %v697_v63 = vpop.f32.mrf.mxu2 }
  0xd8   : >> { %v670_v2 = vadd.f32 %v666_v57, %v639_v62 }
  0xd9   : >> { %v730_v5 = vpop.f32.mrf.mxu3 }
  0xda   : >> { %v701_v3 = vadd.f32 %v697_v63, %v670_v2 }
  0xdc   : >> { %v732_v4 = vadd.f32 %v728_v60, %v701_v3 }
  0xdd   : >> { %v637_v6 = vpop.f32.mrf.mxu0 }
  0xde   : >> { %v733_v7 = vadd.f32 %v732_v4, %v514_v47  ;;  %v699_v8 = vpop.f32.mrf.mxu2 }
  0xe0   : >> { %vm734_vm6 = vcmp.ge.f32.partialorder %v733_v7, 0.0  ;;  %v735_v9 = vmul.f32 0.2, %v733_v7 }
  0xe1   : > { %264 = sbr.rel (!%p262_p7) target bundleno = 38 (0x26), region = 94 }
  0xe2   : >> { %v736_v10 = vsel %vm734_vm6, %v733_v7, %v735_v9 }
  0xe3   : >> { %v737_v11 = vpack.c.bf16 %v736_v10, %v736_v10 }
  0xe5   : >> { %960 = vst.msk [vmem:[%s523_s7 + $0x2] sm:$0x3] %vm524_vm5, %v737_v11 }
  0xe6 PF: > { %s14_s12 = sadd.s32 1, %s1065_s12  }
  0xe7   : > { %p11_p8 = scmp.ge.s32.totalorder %s14_s12, 4  }
  0xe9   :  { %13 = sbr.rel (!%p11_p8) target bundleno = 1 (0x1), region = 105 }
  0xee   :  { %763 = vsyncpa [#allocation4], 1 }
  0xef   :  { %765 = vsyncpa [#allocation4 + $0x1], 1 }

// kernel: _lambda_.9
= control target key start
LH: loop header
LB: loop body
LE: loop exit
PB: predicated region body
PF: predicated region fallthrough
CT: control target
= control target key end

     0   :  { %8 = vsyncpa [#allocation4], 0  ;;  %s1375_s12 = smov 0   ;;  %s1459_s0 = inlined_call_operand.vmem [shape: bf16[2,2,2,64], index: 0, kind: input, shape index: {}]   ;;  %s1460_s1 = inlined_call_operand.hbm [shape: bf16[2,2,3,64,64], index: 1, kind: input, shape index: {}]   ;;  %s1461_s2 = inlined_call_operand.vmem [shape: f32[1,64], index: 2, kind: input, shape index: {}]   ;;  %s1462_s3 = inlined_call_operand.vmem [shape: bf16[2,2,2,2,64], index: 3, kind: output, shape index: {}]  }
   0x1 LB: > { %s124_s15 = sshll.u32 %s1460_s1, 4  ;;  %s996_s16 = sadd.s32 4294967295, %s1345_s12   ;;  %s1345_s12 = sphi %s1375_s12, %s14_s12   ;;  %s125_s15 = int_to_ptr.hbm [resolvable:$true] %s124_s15 }
   0x2   : > { %p998_p0 = scmp.ge.s32.totalorder %s1345_s12, 1  ;;  %p113_p1 = scmp.lt.s32.totalorder %s1345_s12, 3 }
   0x3   : > { %p1279_p2 = scmp.eq.s32.totalorder %s996_s16, 0  ;;  %s1351_s17 = smov [#allocation3]  }
   0x4   : > { %p114_p3 = pnand %p998_p0, %p113_p1  ;;  %s126_s18 = sshll.u32 %s1351_s17, 4  ;;  %s127_s18 = int_to_ptr.vmem [resolvable:$true] %s126_s18 }
   0x5   : > { %s1352_s19 = smov 64   ;;  %s1353_s20 = smov 4  }
   0x6   : > { %p1275_p4 = pneg %p114_p3  ;;  %152 = sbr.rel (%p114_p3) target bundleno = 250 (0xfa), region = 32 }
   0x8   : > { %p1276_p5 = pnand %p1279_p2, %p1275_p4 }
   0xa   : > { %1278 = dma.hbm_to_vmem [thread:$0]  (!%p1276_p5), %s125_s15, 6144, %s127_s18, [#allocation4], %s1352_s19, %s1352_s19, %s1353_s20  }
   0xb   : > { %1340 = dma.done.wait (%p1279_p2), [#allocation4], 6144  }
   0xc   : > { %1342 = vsyncadd (%p1279_p2), [#allocation4], 4294961152  ;;  %p175_p6 = scmp.lt.s32.totalorder %s996_s16, 1  ;;  %vm184_vm0 = vcmask 517120   ;;  %v1354_v0 = vmov 0   ;;  %s1404_s4 = smov 0  }
   0xd   : > { %186 = vst.msk [vmem:[#allocation2 + $0x2] sm:$0x3] %vm184_vm0, %v1354_v0  ;;  %v1401_v1 = vld [vmem:[%s1461_s2] sm:$0x1]  ;;  %vm214_vm1 = vsmask.f32 1282 }
   0xe   : > { %s1464_s16 = smov (!%p175_p6, %s996_s16), 1  ;;  %185 = vst.msk [vmem:[#allocation2] sm:$0x3] %vm184_vm0, %v1354_v0  ;;  %vm215_vm2 = vmand %vm184_vm0, %vm214_vm1 }
   0xf   : > { %187 = vst.msk [vmem:[#allocation2 + $0x4] sm:$0x3] %vm184_vm0, %v1354_v0  ;;  %s1003_s21 = sshll.u32 %s1464_s16, 1  ;;  %s1004_s22 = sshll.u32 %s1464_s16, 2 }
  0x10   : > { %188 = vst.msk [vmem:[#allocation2 + $0x6] sm:$0x3] %vm184_vm0, %v1354_v0  ;;  %s178_s25 = scalar_lea.vmem %s1459_s0, %s1003_s21  ;;  %s1396_s28 = scalar_lea.vmem %s1462_s3, %s1004_s22 }
  0x11   : > { %v189_v2 = vld [vmem:[%s178_s25] sm:$0x1]  ;;  %v190_v3 = vld [vmem:[%s178_s25 + $0x1] sm:$0x1] }
  0x12   : > { %192 = vst [vmem:[#allocation1] ss:$2 sm:$0xff] %v189_v2 }
  0x13   : > { %196 = vst [vmem:[#allocation1 + $0x10] ss:$2 sm:$0xff] %v190_v3 }
  0x14   : > { %v216_v10 = vld [vmem:[#allocation2 + $0x2] sm:$0x3] }
  0x16   : > { %v219_v14 = vld [vmem:[#allocation2 + $0x4] sm:$0x3] }
  0x19   : > { %v193_v4 = vld [vmem:[#allocation1] sm:$0xff] }
  0x1a   : > { %v198_v5 = vshrl.u32 %v193_v4, 16  ;;  %v197_v6 = vld [vmem:[#allocation1 + $0x10] sm:$0xff]  ;;  %v201_v9 = vshll.u32 %v193_v4, 16 }
  0x1b   : > { %v204_v7 = vshrl.u32 %v197_v6, 16  ;;  %v207_v12 = vshll.u32 %v197_v6, 16 }
  0x1c   : > { %v200_v8 = vrot.slane %v198_v5, 7 }
  0x1d   : > { %v206_v11 = vrot.slane %v204_v7, 7 }
  0x1e   : > { %v203_v13 = vor.u32 %v201_v9, %v200_v8 }
  0x1f   : > { %v209_v15 = vor.u32 %v207_v12, %v206_v11 }
  0x20   : > { %v217_v16 = vsel %vm215_vm2, %v203_v13, %v216_v10 }
  0x21   : > { %218 = vst [vmem:[#allocation2 + $0x2] sm:$0x3] %v217_v16  ;;  %v220_v17 = vsel %vm215_vm2, %v209_v15, %v219_v14 }
  0x22   : > { %221 = vst [vmem:[#allocation2 + $0x4] sm:$0x3] %v220_v17 }
  0x23 LB: >> { %v1230_v18 = vld [vmem:[#allocation3 + $0x38] sm:$0xff]  ;;  %v1229_v22 = vld [vmem:[#allocation3 + $0x30] sm:$0xff]  ;;  %s1005_s5 = sshll.u32 %s1349_s4, 1  ;;  %v1228_v27 = vld [vmem:[#allocation3 + $0x28] sm:$0xff]  ;;  %vm296_vm3 = vcmask 523264   ;;  %vm582_vm5 = vcmask 516096   ;;  %s1349_s4 = sphi %s1404_s4, %s228_s4  }
  0x24   : >> { %v1226_v19 = vld [vmem:[#allocation3 + $0x18] sm:$0xff]  ;;  %304 = vmatpush.bf16.msra.mxu0 %v1230_v18  ;;  %v1225_v23 = vld [vmem:[#allocation3 + $0x10] sm:$0xff]  ;;  %s1412_s6 = scalar_lea.vmem [#allocation2], %s1005_s5  ;;  %v1224_v28 = vld [vmem:[#allocation3 + $0x8] sm:$0xff]  ;;  %s581_s7 = scalar_lea.vmem %s1396_s28, %s1005_s5 }
  0x25   : >> { %v1234_v20 = vld [vmem:[#allocation3 + $0x58] sm:$0xff]  ;;  %344 = vmatpush.bf16.msra.mxu1 %v1226_v19  ;;  %v1233_v24 = vld [vmem:[#allocation3 + $0x50] sm:$0xff]  ;;  %v1232_v29 = vld [vmem:[#allocation3 + $0x48] sm:$0xff]  ;;  %s228_s4 = sadd.s32 1, %s1349_s4  }
  0x26   : >> { %v1238_v21 = vld [vmem:[#allocation3 + $0x78] sm:$0xff]  ;;  %398 = vmatpush.bf16.msra.mxu2 %v1234_v20  ;;  %v1237_v25 = vld [vmem:[#allocation3 + $0x70] sm:$0xff]  ;;  %v1236_v30 = vld [vmem:[#allocation3 + $0x68] sm:$0xff]  ;;  %p225_p7 = scmp.ge.s32.totalorder %s228_s4, 2  }
  0x27   : >> { %448 = vmatpush.bf16.msra.mxu3 %v1238_v21  ;;  %v1227_v31 = vld [vmem:[#allocation3 + $0x20] sm:$0xff]  ;;  %v1242_v36 = vld [vmem:[#allocation3 + $0x98] sm:$0xff]  ;;  %v1245_v46 = vld [vmem:[#allocation3 + $0xb0] sm:$0xff] }
  0x28   : >> { %305 = vmatpush.bf16.msra.mxu0 %v1229_v22  ;;  %v1223_v32 = vld [vmem:[#allocation3] sm:$0xff]  ;;  %v1246_v37 = vld [vmem:[#allocation3 + $0xb8] sm:$0xff]  ;;  %v1241_v47 = vld [vmem:[#allocation3 + $0x90] sm:$0xff] }
  0x29   : >> { %v1415_v26 = vld [vmem:[%s1412_s6 + $0x2] sm:$0x3]  ;;  %345 = vmatpush.bf16.msra.mxu1 %v1225_v23  ;;  %v1231_v33 = vld [vmem:[#allocation3 + $0x40] sm:$0xff]  ;;  %v1250_v40 = vld [vmem:[#allocation3 + $0xd8] sm:$0xff] }
  0x2a   : >> { %264 = vst [vmem:[#allocation1] ss:$4 sm:$0xff] %v1415_v26  ;;  %399 = vmatpush.bf16.msra.mxu2 %v1233_v24  ;;  %v1235_v34 = vld [vmem:[#allocation3 + $0x60] sm:$0xff]  ;;  %v1419_v35 = vld [vmem:[%s1412_s6 + $0x2] sm:$0x2]  ;;  %v1254_v43 = vld [vmem:[#allocation3 + $0xf8] sm:$0xff] }
  0x2b   : >> { %449 = vmatpush.bf16.msra.mxu3 %v1237_v25  ;;  %v1422_v39 = vld [vmem:[%s1412_s6 + $0x2] sm:$0x1]  ;;  %v231_v44 = vld [vmem:[%s1412_s6] sm:$0x1]  ;;  %v1244_v52 = vld [vmem:[#allocation3 + $0xa8] sm:$0xff] }
  0x2c   : >> { %306 = vmatpush.bf16.msra.mxu0 %v1228_v27  ;;  %v1249_v48 = vld [vmem:[#allocation3 + $0xd0] sm:$0xff]  ;;  %v1240_v54 = vld [vmem:[#allocation3 + $0x88] sm:$0xff]  ;;  %v1243_v58 = vld [vmem:[#allocation3 + $0xa0] sm:$0xff] }
  0x2d   : >> { %346 = vmatpush.bf16.msra.mxu1 %v1224_v28  ;;  %v1253_v50 = vld [vmem:[#allocation3 + $0xf0] sm:$0xff]  ;;  %v1248_v55 = vld [vmem:[#allocation3 + $0xc8] sm:$0xff]  ;;  %v1239_v59 = vld [vmem:[#allocation3 + $0x80] sm:$0xff] }
  0x2e   : >> { %400 = vmatpush.bf16.msra.mxu2 %v1232_v29  ;;  %v232_v51 = vld [vmem:[%s1412_s6] sm:$0x3]  ;;  %v1252_v57 = vld [vmem:[#allocation3 + $0xe8] sm:$0xff]  ;;  %v1247_v60 = vld [vmem:[#allocation3 + $0xc0] sm:$0xff] }
  0x2f   : >> { %450 = vmatpush.bf16.msra.mxu3 %v1236_v30  ;;  %v1258_v61 = vld [vmem:[#allocation3 + $0x118] sm:$0xff]  ;;  %v1251_v62 = vld [vmem:[#allocation3 + $0xe0] sm:$0xff]  ;;  %v233_v63 = vld [vmem:[%s1412_s6] sm:$0x2] }
  0x30   : >> { %307 = vmatpush.bf16.msra.mxu0 %v1227_v31  ;;  %v1262_v0 = vld [vmem:[#allocation3 + $0x138] sm:$0xff]  ;;  %v1257_v7 = vld [vmem:[#allocation3 + $0x110] sm:$0xff]  ;;  %v1256_v14 = vld [vmem:[#allocation3 + $0x108] sm:$0xff] }
  0x31   : >> { %v265_v38 = vld.sshfl [vmem:[#allocation1] sm:$0xff pattern:$0x73625140]  ;;  %347 = vmatpush.bf16.msra.mxu1 %v1223_v32  ;;  %v1266_v2 = vld [vmem:[#allocation3 + $0x158] sm:$0xff]  ;;  %v1260_v16 = vld [vmem:[#allocation3 + $0x128] sm:$0xff] }
  0x32   : >> { %v266_v41 = vshrl.u32 %v265_v38, 16  ;;  %v268_v42 = vshll.u32 %v265_v38, 16  ;;  %363 = vst [vmem:[#allocation1] ss:$4 sm:$0xff] %v1419_v35  ;;  %401 = vmatpush.bf16.msra.mxu2 %v1231_v33  ;;  %v1270_v3 = vld [vmem:[#allocation3 + $0x178] sm:$0xff]  ;;  %v1261_v9 = vld [vmem:[#allocation3 + $0x130] sm:$0xff] }
  0x33   : >> { %451 = vmatpush.bf16.msra.mxu3 %v1235_v34  ;;  %v1011_v8 = vld [vmem:[%s1412_s6 + $0x4] sm:$0x1]  ;;  %v1264_v17 = vld [vmem:[#allocation3 + $0x148] sm:$0xff]  ;;  %v1255_v21 = vld [vmem:[#allocation3 + $0x100] sm:$0xff] }
  0x34   : >> { %v270_v45 = vrot.slane %v268_v42, 1  ;;  %507 = vmatpush.bf16.msrb.mxu0 %v1242_v36  ;;  %1047 = vmatmul.msk.bf16.vlgmr.msra.gmra.mxu1 %vm296_vm3, %v1422_v39  ;;  %v1265_v10 = vld [vmem:[#allocation3 + $0x150] sm:$0xff]  ;;  %v1268_v18 = vld [vmem:[#allocation3 + $0x168] sm:$0xff]  ;;  %v1259_v22 = vld [vmem:[#allocation3 + $0x120] sm:$0xff] }
  0x35   : >> { %562 = vmatpush.bf16.msrb.mxu1 %v1246_v37  ;;  %v1269_v12 = vld [vmem:[#allocation3 + $0x170] sm:$0xff]  ;;  %v1263_v23 = vld [vmem:[#allocation3 + $0x140] sm:$0xff] }
  0x36   : >> { %v271_v49 = vor.u32 %v270_v45, %v266_v41  ;;  %1081 = vmatmul.msk.bf16.vlgmr.msra.gmra.mxu3 %vm296_vm3, %v231_v44  ;;  %642 = vmatpush.bf16.msrb.mxu2 %v1254_v43  ;;  %v1012_v15 = vld [vmem:[%s1412_s6 + $0x4] sm:$0x3]  ;;  %v1267_v24 = vld [vmem:[#allocation3 + $0x160] sm:$0xff] }
  0x37   : >> { %682 = vmatpush.bf16.msrb.mxu3 %v1250_v40  ;;  %v1013_v25 = vld [vmem:[%s1412_s6 + $0x4] sm:$0x2] }
  0x38   : >> { %1030 = vmatmul.msk.bf16.vlgmr.msra.gmra.mxu0 %vm296_vm3, %v271_v49 }
  0x39   : >> { %563 = vmatpush.bf16.msrb.mxu1 %v1245_v46  ;;  %v364_v53 = vld.sshfl [vmem:[#allocation1] sm:$0xff pattern:$0x73625140]  ;;  %508 = vmatpush.bf16.msrb.mxu0 %v1241_v47 }
  0x3a   : >> { %v366_v56 = vrot.slane %v364_v53, 1  ;;  %468 = vst [vmem:[#allocation1] ss:$4 sm:$0xff] %v232_v51  ;;  %643 = vmatpush.bf16.msrb.mxu2 %v1253_v50  ;;  %v573_v53 = vperm.slane %v1401_v1, 0 }
  0x3b   : >> { %683 = vmatpush.bf16.msrb.mxu3 %v1249_v48 }
  0x3c   : >> { %1064 = vmatmul.msk.bf16.vlgmr.msra.gmra.mxu2 %vm296_vm3, %v366_v56 }
  0x3d   : >> { %564 = vmatpush.bf16.msrb.mxu1 %v1244_v52  ;;  %509 = vmatpush.bf16.msrb.mxu0 %v1240_v54 }
  0x3e   : >> { %644 = vmatpush.bf16.msrb.mxu2 %v1252_v57 }
  0x3f   : >> { %684 = vmatpush.bf16.msrb.mxu3 %v1248_v55 }
  0x41   : >> { %565 = vmatpush.bf16.msrb.mxu1 %v1243_v58  ;;  %510 = vmatpush.bf16.msrb.mxu0 %v1239_v59  ;;  %v469_v4 = vld.sshfl [vmem:[#allocation1] sm:$0xff pattern:$0x73625140] }
  0x42   : >> { %v470_v5 = vshrl.u32 %v469_v4, 16  ;;  %v472_v6 = vshll.u32 %v469_v4, 16  ;;  %527 = vst [vmem:[#allocation1] ss:$4 sm:$0xff] %v233_v63  ;;  %645 = vmatpush.bf16.msrb.mxu2 %v1251_v62 }
  0x43   : >> { %685 = vmatpush.bf16.msrb.mxu3 %v1247_v60 }
  0x44   : >> { %v474_v11 = vrot.slane %v472_v6, 1 }
  0x45   : >> { %736 = vmatpush.bf16.msra.mxu0 %v1258_v61  ;;  %783 = vmatpush.bf16.msra.mxu1 %v1262_v0 }
  0x46   : >> { %841 = vmatpush.bf16.msra.mxu2 %v1266_v2  ;;  %v475_v13 = vor.u32 %v474_v11, %v470_v5  ;;  %1150 = vmatmul.msk.bf16.vlgmr.msrb.gmra.mxu3 %vm296_vm3, %v1011_v8 }
  0x47   : >> { %895 = vmatpush.bf16.msra.mxu3 %v1270_v3 }
  0x48   : >> { %1098 = vmatmul.msk.bf16.vlgmr.msrb.gmra.mxu0 %vm296_vm3, %v475_v13 }
  0x49   : >> { %737 = vmatpush.bf16.msra.mxu0 %v1257_v7  ;;  %784 = vmatpush.bf16.msra.mxu1 %v1261_v9  ;;  %v528_v19 = vld.sshfl [vmem:[#allocation1] sm:$0xff pattern:$0x73625140] }
  0x4a   : >> { %842 = vmatpush.bf16.msra.mxu2 %v1265_v10  ;;  %v530_v20 = vrot.slane %v528_v19, 1  ;;  %603 = vst [vmem:[#allocation1] ss:$4 sm:$0xff] %v1012_v15 }
  0x4b   : >> { %896 = vmatpush.bf16.msra.mxu3 %v1269_v12 }
  0x4c   : >> { %1115 = vmatmul.msk.bf16.vlgmr.msrb.gmra.mxu1 %vm296_vm3, %v530_v20 }
  0x4d   : >> { %738 = vmatpush.bf16.msra.mxu0 %v1256_v14  ;;  %785 = vmatpush.bf16.msra.mxu1 %v1260_v16 }
  0x4e   : >> { %843 = vmatpush.bf16.msra.mxu2 %v1264_v17 }
  0x4f   : >> { %897 = vmatpush.bf16.msra.mxu3 %v1268_v18 }
  0x51   : >> { %739 = vmatpush.bf16.msra.mxu0 %v1255_v21  ;;  %786 = vmatpush.bf16.msra.mxu1 %v1259_v22  ;;  %v604_v27 = vld.sshfl [vmem:[#allocation1] sm:$0xff pattern:$0x73625140] }
  0x52   : >> { %844 = vmatpush.bf16.msra.mxu2 %v1263_v23  ;;  %v605_v28 = vshrl.u32 %v604_v27, 16  ;;  %v607_v29 = vshll.u32 %v604_v27, 16  ;;  %701 = vst [vmem:[#allocation1] ss:$4 sm:$0xff] %v1013_v25 }
  0x53   : >> { %898 = vmatpush.bf16.msra.mxu3 %v1267_v24 }
  0x54   : >> { %v609_v30 = vrot.slane %v607_v29, 1 }
  0x56   : >> { %v610_v31 = vor.u32 %v609_v30, %v605_v28 }
  0x58   : >> { %1133 = vmatmul.msk.bf16.vlgmr.msrb.gmra.mxu2 %vm296_vm3, %v610_v31 }
  0x59   : >> { %v702_v32 = vld.sshfl [vmem:[#allocation1] sm:$0xff pattern:$0x73625140] }
  0x5a   : >> { %v704_v33 = vrot.slane %v702_v32, 1  ;;  %802 = vst [vmem:[#allocation1] ss:$4 sm:$0xff] %v1415_v26 }
  0x5c   : >> { %1167 = vmatmul.msk.bf16.vlgmr.msra.gmra.mxu0 %vm296_vm3, %v704_v33  ;;  %1184 = vmatmul.msk.bf16.vlgmr.msra.gmra.mxu1 %vm296_vm3, %v1422_v39 }
  0x61   : >> { %v803_v34 = vld.sshfl [vmem:[#allocation1] sm:$0xff pattern:$0x73625140] }
  0x62   : >> { %v804_v36 = vshrl.u32 %v803_v34, 16  ;;  %v806_v37 = vshll.u32 %v803_v34, 16  ;;  %860 = vst [vmem:[#allocation1] ss:$4 sm:$0xff] %v1419_v35 }
  0x64   : >> { %v808_v38 = vrot.slane %v806_v37, 1 }
  0x66   : >> { %v809_v40 = vor.u32 %v808_v38, %v804_v36 }
  0x68   : >> { %1201 = vmatmul.msk.bf16.vlgmr.msra.gmra.mxu2 %vm296_vm3, %v809_v40 }
  0x69   : >> { %v861_v41 = vld.sshfl [vmem:[#allocation1] sm:$0xff pattern:$0x73625140] }
  0x6a   : >> { %v863_v42 = vrot.slane %v861_v41, 1 }
  0x6c   : >> { %1218 = vmatmul.msk.bf16.vlgmr.msra.gmra.mxu3 %vm296_vm3, %v863_v42 }
  0xb1   : >> { %v349_v43 = vpop.f32.mrf.mxu1 }
  0xb5   : >> { %v309_v26 = vpop.f32.mrf.mxu0 }
  0xb6   : >> { %v350_v46 = vadd.f32 %v349_v43, %v309_v26 }
  0xb9   : >> { %v453_v44 = vpop.f32.mrf.mxu3  ;;  %v351_v45 = vpop.f32.mrf.mxu1 }
  0xbd   : >> { %v311_v47 = vpop.f32.mrf.mxu0 }
  0xbf   : >> { %v403_v39 = vpop.f32.mrf.mxu2 }
  0xc0   : >> { %v407_v48 = vadd.f32 %v403_v39, %v350_v46 }
  0xc1   : >> { %v455_v49 = vpop.f32.mrf.mxu3 }
  0xc2   : >> { %v457_v35 = vadd.f32 %v453_v44, %v407_v48 }
  0xc5   : >> { %v512_v50 = vpop.f32.mrf.mxu0 }
  0xc6   : >> { %v516_v51 = vadd.f32 %v512_v50, %v457_v35 }
  0xc7   : >> { %v405_v52 = vpop.f32.mrf.mxu2 }
  0xc9   : >> { %v567_v54 = vpop.f32.mrf.mxu1  ;;  %v687_v55 = vpop.f32.mrf.mxu3 }
  0xca   : >> { %v571_v56 = vadd.f32 %v567_v54, %v516_v51 }
  0xcc   : >> { %v575_v57 = vadd.f32 %v573_v53, %v571_v56 }
  0xcd   : >> { %v514_v58 = vpop.f32.mrf.mxu0 }
  0xce   : >> { %vm576_vm4 = vcmp.ge.f32.partialorder %v575_v57, 0.0  ;;  %v577_v59 = vmul.f32 0.2, %v575_v57 }
  0xd0   : >> { %v578_v60 = vsel %vm576_vm4, %v575_v57, %v577_v59 }
  0xd1   : >> { %v579_v61 = vpack.c.bf16 %v578_v60, %v578_v60  ;;  %v569_v62 = vpop.f32.mrf.mxu1  ;;  %v689_v63 = vpop.f32.mrf.mxu3 }
  0xd3   : >> { %583 = vst.msk [vmem:[%s581_s7] sm:$0x1] %vm582_vm5, %v579_v61 }
  0xd9   : >> { %v741_v0 = vpop.f32.mrf.mxu0  ;;  %v788_v2 = vpop.f32.mrf.mxu1 }
  0xdb   : >> { %v647_v3 = vpop.f32.mrf.mxu2 }
  0xdc   : >> { %v688_v7 = vadd.f32 %v687_v55, %v647_v3 }
  0xde   : >> { %v745_v8 = vadd.f32 %v741_v0, %v688_v7 }
  0xe0   : >> { %v792_v10 = vadd.f32 %v788_v2, %v745_v8 }
  0xe1   : >> { %v743_v4 = vpop.f32.mrf.mxu0  ;;  %v790_v5 = vpop.f32.mrf.mxu1 }
  0xe3   : >> { %v649_v6 = vpop.f32.mrf.mxu2 }
  0xeb   : >> { %v846_v9 = vpop.f32.mrf.mxu2 }
  0xec   : >> { %v850_v11 = vadd.f32 %v846_v9, %v792_v10 }
  0xef   : >> { %v900_v12 = vpop.f32.mrf.mxu3 }
  0xf0   : >> { %v904_v13 = vadd.f32 %v900_v12, %v850_v11 }
  0xf2   : >> { %v905_v14 = vadd.f32 %v904_v13, %v573_v53 }
  0xf3   : >> { %v848_v15 = vpop.f32.mrf.mxu2 }
  0xf4   : >> { %vm906_vm6 = vcmp.ge.f32.partialorder %v905_v14, 0.0  ;;  %v907_v16 = vmul.f32 0.2, %v905_v14 }
  0xf5   : > { %227 = sbr.rel (!%p225_p7) target bundleno = 35 (0x23), region = 92 }
  0xf6   : >> { %v908_v17 = vsel %vm906_vm6, %v905_v14, %v907_v16 }
  0xf7   : >> { %v909_v18 = vpack.c.bf16 %v908_v17, %v908_v17  ;;  %v902_v19 = vpop.f32.mrf.mxu3 }
  0xf9   : >> { %1220 = vst.msk [vmem:[%s581_s7 + $0x1] sm:$0x1] %vm582_vm5, %v909_v18 }
  0xfa PF: > { %s14_s12 = sadd.s32 1, %s1345_s12  }
  0xfb   : > { %p11_p8 = scmp.ge.s32.totalorder %s14_s12, 4  }
  0xfd   :  { %13 = sbr.rel (!%p11_p8) target bundleno = 1 (0x1), region = 103 }
 0x102   :  { %932 = vsyncpa [#allocation4], 1 }
 0x103   :  { %934 = vsyncpa [#allocation4 + $0x1], 1 }

// kernel: _lambda_.11
= control target key start
LH: loop header
LB: loop body
LE: loop exit
PB: predicated region body
PF: predicated region fallthrough
CT: control target
= control target key end

     0   :  { %s983_s12 = smov 0   ;;  %s1177_s0 = inlined_call_operand.vmem [shape: bf16[2,8,8,16], index: 0, kind: input, shape index: {}]   ;;  %s1178_s1 = inlined_call_operand.vmem [shape: bf16[2,2,3,16,16], index: 1, kind: input, shape index: {}]   ;;  %s1179_s2 = inlined_call_operand.vmem [shape: f32[1,16], index: 2, kind: input, shape index: {}]   ;;  %s1180_s3 = inlined_call_operand.vmem [shape: bf16[2,8,2,8,16], index: 3, kind: output, shape index: {}]  }
   0x1 LB: > { %s805_s13 = sadd.s32 4294967295, %s956_s12   ;;  %p809_p0 = scmp.ge.s32.totalorder %s956_s12, 1  ;;  %s956_s12 = sphi %s983_s12, %s13_s12  }
   0x2   : > { %p137_p1 = scmp.lt.s32.totalorder %s956_s12, 3 }
   0x4   : > { %p138_p2 = pnand %p809_p0, %p137_p1 }
   0x5   : > { %p161_p3 = scmp.lt.s32.totalorder (!%p138_p2), %s805_s13, 1  ;;  %s1098_s24 = smov (!%p138_p2), 0  }
   0x6   : > { %141 = sbr.rel (%p138_p2) target bundleno = 239 (0xef), region = 32 }
   0xb   : > { %vm172_vm0 = vcmask 125952   ;;  %v994_v0 = vld [vmem:[%s1179_s2] sm:$0x1]  ;;  %v962_v1 = vmov 0   ;;  %s1186_s13 = smov (!%p161_p3, %s805_s13), 1  ;;  %vm174_vm1 = vcmask 122880  }
   0xc   : > { %176 = vst.msk [vmem:[#allocation2 + $0x8] sm:$0xf] %vm172_vm0, %v962_v1  ;;  %s912_s16 = sshll.u32 %s1186_s13, 5  ;;  %s913_s17 = sshll.u32 %s1186_s13, 6  ;;  %vm284_vm2 = vsmask.f32 7938 }
   0xd   : > { %173 = vst.msk [vmem:[#allocation2] sm:$0xf] %vm172_vm0, %v962_v1  ;;  %s1009_s20 = scalar_lea.vmem %s1177_s0, %s912_s16  ;;  %s1014_s23 = scalar_lea.vmem %s1180_s3, %s913_s17  ;;  %vm290_vm3 = vsmask.f32 256  ;;  %vm1043_vm4 = vmand %vm172_vm0, %vm284_vm2 }
   0xe   : > { %178 = vst.msk [vmem:[#allocation2 + $0x10] sm:$0xf] %vm172_vm0, %v962_v1  ;;  %v194_v2 = vld [vmem:[%s1009_s20] sm:$0xf]  ;;  %v195_v3 = vld [vmem:[%s1009_s20 + $0x4] sm:$0xf]  ;;  %vm1051_vm5 = vmand %vm174_vm1, %vm290_vm3 }
   0xf   : > { %180 = vst.msk [vmem:[#allocation2 + $0x18] sm:$0xf] %vm172_vm0, %v962_v1  ;;  %v203_v4 = vshrl.u32 %v194_v2, 16  ;;  %v211_v5 = vshrl.u32 %v195_v3, 16  ;;  %v196_v6 = vld [vmem:[%s1009_s20 + $0x8] sm:$0xf] }
  0x10   : > { %182 = vst.msk [vmem:[#allocation2 + $0x20] sm:$0xf] %vm172_vm0, %v962_v1  ;;  %v206_v7 = vshll.u32 %v194_v2, 16  ;;  %v219_v9 = vshrl.u32 %v196_v6, 16  ;;  %v197_v10 = vld [vmem:[%s1009_s20 + $0xc] sm:$0xf] }
  0x11   : > { %184 = vst.msk [vmem:[#allocation2 + $0x28] sm:$0xf] %vm172_vm0, %v962_v1  ;;  %v205_v8 = vrot.slane %v203_v4, 7  ;;  %v213_v11 = vrot.slane %v211_v5, 7  ;;  %v214_v12 = vshll.u32 %v195_v3, 16  ;;  %v227_v13 = vshrl.u32 %v197_v10, 16 }
  0x12   : > { %186 = vst.msk [vmem:[#allocation2 + $0x30] sm:$0xf] %vm172_vm0, %v962_v1  ;;  %v198_v15 = vld [vmem:[%s1009_s20 + $0x10] sm:$0xf]  ;;  %v221_v17 = vrot.slane %v219_v9, 7  ;;  %v222_v18 = vshll.u32 %v196_v6, 16 }
  0x13   : > { %188 = vst.msk [vmem:[#allocation2 + $0x38] sm:$0xf] %vm172_vm0, %v962_v1  ;;  %v286_v14 = vld [vmem:[#allocation2 + $0x8] sm:$0xf]  ;;  %v208_v16 = vor.u32 %v206_v7, %v205_v8  ;;  %v235_v19 = vshrl.u32 %v198_v15, 16  ;;  %v209_v21 = vrot.slane %v205_v8, 4  ;;  %v216_v24 = vor.u32 %v214_v12, %v213_v11 }
  0x14   : > { %190 = vst.msk [vmem:[#allocation2 + $0x40] sm:$0xf] %vm172_vm0, %v962_v1  ;;  %v229_v25 = vrot.slane %v227_v13, 7  ;;  %v230_v26 = vshll.u32 %v197_v10, 16  ;;  %v199_v27 = vld [vmem:[%s1009_s20 + $0x14] sm:$0xf]  ;;  %v224_v33 = vor.u32 %v222_v18, %v221_v17 }
  0x15   : > { %192 = vst.msk [vmem:[#allocation2 + $0x48] sm:$0xf] %vm172_vm0, %v962_v1  ;;  %v295_v22 = vld [vmem:[#allocation2 + $0x10] sm:$0xf]  ;;  %v217_v28 = vrot.slane %v213_v11, 4  ;;  %v243_v30 = vshrl.u32 %v199_v27, 16  ;;  %v287_v31 = vsel %vm1043_vm4, %v208_v16, %v286_v14 }
  0x16   : > { %177 = vst.msk [vmem:[#allocation2 + $0xc] sm:$0x1] %vm174_vm1, %v962_v1  ;;  %v301_v29 = vld [vmem:[#allocation2 + $0x18] sm:$0xf]  ;;  %v237_v34 = vrot.slane %v235_v19, 7  ;;  %v238_v35 = vshll.u32 %v198_v15, 16  ;;  %v296_v41 = vsel %vm1043_vm4, %v216_v24, %v295_v22  ;;  %v232_v43 = vor.u32 %v230_v26, %v229_v25 }
  0x17   : > { %175 = vst.msk [vmem:[#allocation2 + $0x4] sm:$0x1] %vm174_vm1, %v962_v1  ;;  %v225_v37 = vrot.slane %v221_v17, 4  ;;  %v307_v38 = vld [vmem:[#allocation2 + $0x20] sm:$0xf]  ;;  %v246_v39 = vshll.u32 %v199_v27, 16  ;;  %v302_v49 = vsel %vm1043_vm4, %v224_v33, %v301_v29 }
  0x18   : > { %179 = vst.msk [vmem:[#allocation2 + $0x14] sm:$0x1] %vm174_vm1, %v962_v1  ;;  %v200_v40 = vld [vmem:[%s1009_s20 + $0x18] sm:$0xf]  ;;  %v245_v44 = vrot.slane %v243_v30, 7  ;;  %v233_v48 = vrot.slane %v229_v25, 4  ;;  %v240_v51 = vor.u32 %v238_v35, %v237_v34  ;;  %v308_v57 = vsel %vm1043_vm4, %v232_v43, %v307_v38 }
  0x19   : > { %181 = vst.msk [vmem:[#allocation2 + $0x1c] sm:$0x1] %vm174_vm1, %v962_v1  ;;  %v251_v45 = vshrl.u32 %v200_v40, 16  ;;  %v254_v53 = vshll.u32 %v200_v40, 16  ;;  %v313_v55 = vld [vmem:[#allocation2 + $0x28] sm:$0xf] }
  0x1a   : > { %183 = vst.msk [vmem:[#allocation2 + $0x24] sm:$0x1] %vm174_vm1, %v962_v1  ;;  %v241_v56 = vrot.slane %v237_v34, 4  ;;  %v248_v59 = vor.u32 %v246_v39, %v245_v44  ;;  %v319_v60 = vld [vmem:[#allocation2 + $0x30] sm:$0xf]  ;;  %v249_v62 = vrot.slane %v245_v44, 4 }
  0x1b   : > { %185 = vst.msk [vmem:[#allocation2 + $0x2c] sm:$0x1] %vm174_vm1, %v962_v1  ;;  %v253_v52 = vrot.slane %v251_v45, 7  ;;  %v201_v63 = vld [vmem:[%s1009_s20 + $0x1c] sm:$0xf] }
  0x1c   : > { %187 = vst.msk [vmem:[#allocation2 + $0x34] sm:$0x1] %vm174_vm1, %v962_v1  ;;  %v259_v4 = vshrl.u32 %v201_v63, 16  ;;  %v262_v5 = vshll.u32 %v201_v63, 16  ;;  %v325_v7 = vld [vmem:[#allocation2 + $0x38] sm:$0xf]  ;;  %v320_v9 = vsel %vm1043_vm4, %v248_v59, %v319_v60 }
  0x1d   : > { %189 = vst.msk [vmem:[#allocation2 + $0x3c] sm:$0x1] %vm174_vm1, %v962_v1  ;;  %v292_v32 = vld [vmem:[#allocation2 + $0xc] sm:$0x1]  ;;  %v256_v3 = vor.u32 %v254_v53, %v253_v52  ;;  %v257_v8 = vrot.slane %v253_v52, 4 }
  0x1e   : > { %191 = vst.msk [vmem:[#allocation2 + $0x44] sm:$0x1] %vm174_vm1, %v962_v1  ;;  %v293_v36 = vsel %vm1051_vm5, %v209_v21, %v292_v32  ;;  %v261_v11 = vrot.slane %v259_v4, 7  ;;  %v331_v13 = vld [vmem:[#allocation2 + $0x40] sm:$0xf] }
  0x1f   : > { %193 = vst.msk [vmem:[#allocation2 + $0x4c] sm:$0x1] %vm174_vm1, %v962_v1  ;;  %v298_v42 = vld [vmem:[#allocation2 + $0x14] sm:$0x1]  ;;  %v314_v1 = vsel %vm1043_vm4, %v240_v51, %v313_v55  ;;  %v326_v14 = vsel %vm1043_vm4, %v256_v3, %v325_v7 }
  0x20   : > { %288 = vst [vmem:[#allocation2 + $0x8] sm:$0xf] %v287_v31  ;;  %v299_v46 = vsel %vm1051_vm5, %v217_v28, %v298_v42  ;;  %v304_v47 = vld [vmem:[#allocation2 + $0x1c] sm:$0x1]  ;;  %v264_v15 = vor.u32 %v262_v5, %v261_v11  ;;  %v265_v16 = vrot.slane %v261_v11, 4 }
  0x21   : > { %294 = vst [vmem:[#allocation2 + $0xc] sm:$0x1] %v293_v36  ;;  %v310_v50 = vld [vmem:[#allocation2 + $0x24] sm:$0x1]  ;;  %v305_v54 = vsel %vm1051_vm5, %v225_v37, %v304_v47 }
  0x22   : > { %297 = vst [vmem:[#allocation2 + $0x10] sm:$0xf] %v296_v41  ;;  %v316_v58 = vld [vmem:[#allocation2 + $0x2c] sm:$0x1]  ;;  %v311_v61 = vsel %vm1051_vm5, %v233_v48, %v310_v50  ;;  %v332_v19 = vsel %vm1043_vm4, %v264_v15, %v331_v13 }
  0x23   : > { %300 = vst [vmem:[#allocation2 + $0x14] sm:$0x1] %v299_v46  ;;  %v322_v2 = vld [vmem:[#allocation2 + $0x34] sm:$0x1]  ;;  %v317_v6 = vsel %vm1051_vm5, %v241_v56, %v316_v58 }
  0x24   : > { %303 = vst [vmem:[#allocation2 + $0x18] sm:$0xf] %v302_v49  ;;  %v328_v10 = vld [vmem:[#allocation2 + $0x3c] sm:$0x1]  ;;  %v323_v12 = vsel %vm1051_vm5, %v249_v62, %v322_v2 }
  0x25   : > { %306 = vst [vmem:[#allocation2 + $0x1c] sm:$0x1] %v305_v54  ;;  %v334_v17 = vld [vmem:[#allocation2 + $0x44] sm:$0x1]  ;;  %v329_v18 = vsel %vm1051_vm5, %v257_v8, %v328_v10 }
  0x26   : > { %309 = vst [vmem:[#allocation2 + $0x20] sm:$0xf] %v308_v57  ;;  %v335_v21 = vsel %vm1051_vm5, %v265_v16, %v334_v17 }
  0x27   : > { %312 = vst [vmem:[#allocation2 + $0x24] sm:$0x1] %v311_v61 }
  0x28   : > { %315 = vst [vmem:[#allocation2 + $0x28] sm:$0xf] %v314_v1 }
  0x29   : > { %318 = vst [vmem:[#allocation2 + $0x2c] sm:$0x1] %v317_v6 }
  0x2a   : > { %321 = vst [vmem:[#allocation2 + $0x30] sm:$0xf] %v320_v9 }
  0x2b   : > { %324 = vst [vmem:[#allocation2 + $0x34] sm:$0x1] %v323_v12 }
  0x2c   : > { %327 = vst [vmem:[#allocation2 + $0x38] sm:$0xf] %v326_v14 }
  0x2d   : > { %330 = vst [vmem:[#allocation2 + $0x3c] sm:$0x1] %v329_v18 }
  0x2e   : > { %333 = vst [vmem:[#allocation2 + $0x40] sm:$0xf] %v332_v19 }
  0x2f   : > { %336 = vst [vmem:[#allocation2 + $0x44] sm:$0x1] %v335_v21 }
  0x30 LB: >> { %v918_v20 = vld [vmem:[%s1178_s1 + $0x18] sm:$0xff]  ;;  %v915_v22 = vld [vmem:[%s1178_s1] sm:$0xff]  ;;  %v917_v23 = vld [vmem:[%s1178_s1 + $0x10] sm:$0xff]  ;;  %s914_s10 = sshll.u32 %s960_s24, 3  ;;  %vm387_vm6 = vcmask 130048   ;;  %s343_s24 = sadd.s32 1, %s960_s24   ;;  %s960_s24 = sphi %s1098_s24, %s343_s24  }
  0x31   : >> { %v916_v24 = vld [vmem:[%s1178_s1 + $0x8] sm:$0xff]  ;;  %v923_v25 = vld [vmem:[%s1178_s1 + $0x38] sm:$0xff]  ;;  %v919_v26 = vld [vmem:[%s1178_s1 + $0x20] sm:$0xff]  ;;  %475 = vmatpush.bf16.msra.mxu3 %v918_v20  ;;  %420 = vmatpush.bf16.msra.mxu1 %v915_v22  ;;  %s1136_s20 = scalar_lea.vmem [#allocation2], %s914_s10  ;;  %s559_s27 = scalar_lea.vmem %s1014_s23, %s914_s10 }
  0x32   : >> { %v922_v27 = vld [vmem:[%s1178_s1 + $0x30] sm:$0xff]  ;;  %v920_v28 = vld [vmem:[%s1178_s1 + $0x28] sm:$0xff]  ;;  %449 = vmatpush.bf16.msra.mxu2 %v917_v23  ;;  %398 = vmatpush.bf16.msra.mxu0 %v916_v24  ;;  %v927_v29 = vld [vmem:[%s1178_s1 + $0x58] sm:$0xff]  ;;  %p340_p4 = scmp.ge.s32.totalorder %s343_s24, 8  }
  0x33   : >> { %v925_v30 = vld [vmem:[%s1178_s1 + $0x48] sm:$0xff]  ;;  %v926_v48 = vld [vmem:[%s1178_s1 + $0x50] sm:$0xff]  ;;  %v924_v56 = vld [vmem:[%s1178_s1 + $0x40] sm:$0xff] }
  0x35   : >> { %617 = vmatpush.bf16.msrb.mxu3 %v922_v27  ;;  %543 = vmatpush.bf16.msrb.mxu1 %v920_v28 }
  0x36   : >> { %v347_v31 = vld [vmem:[%s1136_s20] sm:$0xf]  ;;  %v817_v32 = vld [vmem:[%s1136_s20 + $0x8] sm:$0xf]  ;;  %595 = vmatpush.bf16.msrb.mxu2 %v923_v25  ;;  %513 = vmatpush.bf16.msrb.mxu0 %v919_v26  ;;  %v818_v33 = vld [vmem:[%s1136_s20 + $0xc] sm:$0x1] }
  0x37   : >> { %849 = vmatmul.msk.bf16.vlgmr.msra.gmra.mxu3 %vm387_vm6, %v347_v31  ;;  %v371_v34 = vunpack.c.l.b16 %v817_v32  ;;  %835 = vmatmul.msk.bf16.vlgmr.msra.gmra.mxu1 %vm387_vm6, %v817_v32  ;;  %v819_v35 = vld [vmem:[%s1136_s20 + $0x8] sm:$0xe]  ;;  %v821_v36 = vld [vmem:[%s1136_s20 + $0x10] sm:$0xf]  ;;  %v348_v37 = vld [vmem:[%s1136_s20 + $0x4] sm:$0x1]  ;;  %v372_v38 = vunpack.c.l.b16 %v818_v33  ;;  %v487_v52 = vunpack.c.l.b16 %v347_v31 }
  0x38   : >> { %v430_v39 = vunpack.c.l.b16 %v819_v35  ;;  %v822_v40 = vld [vmem:[%s1136_s20 + $0x14] sm:$0x1]  ;;  %v349_v41 = vld [vmem:[%s1136_s20] sm:$0xe]  ;;  %v569_v44 = vunpack.c.l.b16 %v821_v36  ;;  %v488_v46 = vunpack.c.l.b16 %v348_v37  ;;  %v823_v5 = vld [vmem:[%s1136_s20 + $0x10] sm:$0xe] }
  0x39   : >> { %715 = vmatpush.bf16.msra.mxu3 %v927_v29  ;;  %669 = vmatpush.bf16.msra.mxu1 %v925_v30  ;;  %v373_v42 = vpack.c.b16 %v372_v38, %v371_v34  ;;  %v570_v45 = vunpack.c.l.b16 %v822_v40  ;;  %v524_v47 = vunpack.c.l.b16 %v349_v41  ;;  %v627_v6 = vunpack.c.l.b16 %v823_v5 }
  0x3a   : >> { %v431_v43 = vpack.c.b16 %v372_v38, %v430_v39  ;;  %v489_v58 = vpack.c.b16 %v488_v46, %v487_v52  ;;  %v551_v25 = vperm.slane %v994_v0, 0 }
  0x3b   : >> { %v375_v50 = vshrl.u32 %v373_v42, 16  ;;  %v377_v51 = vshll.u32 %v373_v42, 16  ;;  %v571_v54 = vpack.c.b16 %v570_v45, %v569_v44  ;;  %v525_v55 = vpack.c.b16 %v488_v46, %v524_v47 }
  0x3c   : >> { %v432_v49 = vrot.slane %v431_v43, 1  ;;  %v493_v61 = vshll.u32 %v489_v58, 16  ;;  %v491_v1 = vshrl.u32 %v489_v58, 16  ;;  %v628_v7 = vpack.c.b16 %v570_v45, %v627_v6 }
  0x3d   : >> { %v379_v53 = vrot.slane %v377_v51, 1  ;;  %v575_v59 = vshll.u32 %v571_v54, 16  ;;  %v526_v60 = vrot.slane %v525_v55, 1  ;;  %v573_v62 = vshrl.u32 %v571_v54, 16 }
  0x3e   : >> { %842 = vmatmul.msk.bf16.vlgmr.msra.gmra.mxu2 %vm387_vm6, %v432_v49  ;;  %v495_v2 = vrot.slane %v493_v61, 1  ;;  %v629_v8 = vrot.slane %v628_v7, 1 }
  0x3f   : >> { %692 = vmatpush.bf16.msra.mxu2 %v926_v48  ;;  %v380_v57 = vor.u32 %v379_v53, %v375_v50  ;;  %v577_v63 = vrot.slane %v575_v59, 1 }
  0x40   : >> { %v496_v4 = vor.u32 %v495_v2, %v491_v1 }
  0x41   : >> { %830 = vmatmul.msk.bf16.vlgmr.msra.gmra.mxu0 %vm387_vm6, %v380_v57  ;;  %v578_v3 = vor.u32 %v577_v63, %v573_v62 }
  0x42   : >> { %646 = vmatpush.bf16.msra.mxu0 %v924_v56 }
  0x47   : >> { %878 = vmatmul.msk.bf16.vlgmr.msrb.gmra.mxu3 %vm387_vm6, %v821_v36  ;;  %863 = vmatmul.msk.bf16.vlgmr.msrb.gmra.mxu1 %vm387_vm6, %v526_v60 }
  0x4e   : >> { %873 = vmatmul.msk.bf16.vlgmr.msrb.gmra.mxu2 %vm387_vm6, %v578_v3 }
  0x51   : >> { %856 = vmatmul.msk.bf16.vlgmr.msrb.gmra.mxu0 %vm387_vm6, %v496_v4 }
  0x57   : >> { %906 = vmatmul.msk.bf16.vlgmr.msra.gmra.mxu3 %vm387_vm6, %v432_v49  ;;  %892 = vmatmul.msk.bf16.vlgmr.msra.gmra.mxu1 %vm387_vm6, %v817_v32 }
  0x5e   : >> { %899 = vmatmul.msk.bf16.vlgmr.msra.gmra.mxu2 %vm387_vm6, %v380_v57 }
  0x61   : >> { %885 = vmatmul.msk.bf16.vlgmr.msra.gmra.mxu0 %vm387_vm6, %v629_v8 }
  0xb4   : >> { %v422_v9 = vpop.f32.mrf.mxu1 }
  0xba   : >> { %v477_v10 = vpop.f32.mrf.mxu3 }
  0xbc   : >> { %v424_v11 = vpop.f32.mrf.mxu1 }
  0xbe   : >> { %v400_v12 = vpop.f32.mrf.mxu0 }
  0xbf   : >> { %v423_v16 = vadd.f32 %v422_v9, %v400_v12 }
  0xc1   : >> { %v451_v13 = vpop.f32.mrf.mxu2 }
  0xc2   : >> { %v479_v14 = vpop.f32.mrf.mxu3  ;;  %v455_v19 = vadd.f32 %v451_v13, %v423_v16 }
  0xc4   : >> { %v545_v15 = vpop.f32.mrf.mxu1  ;;  %v481_v22 = vadd.f32 %v477_v10, %v455_v19 }
  0xc6   : >> { %v402_v17 = vpop.f32.mrf.mxu0 }
  0xc9   : >> { %v453_v18 = vpop.f32.mrf.mxu2 }
  0xca   : >> { %v619_v21 = vpop.f32.mrf.mxu3 }
  0xcc   : >> { %v547_v20 = vpop.f32.mrf.mxu1 }
  0xce   : >> { %v515_v23 = vpop.f32.mrf.mxu0 }
  0xcf   : >> { %v519_v24 = vadd.f32 %v515_v23, %v481_v22 }
  0xd1   : >> { %v597_v26 = vpop.f32.mrf.mxu2  ;;  %v549_v27 = vadd.f32 %v545_v15, %v519_v24 }
  0xd2   : >> { %v621_v28 = vpop.f32.mrf.mxu3  ;;  %v620_v38 = vadd.f32 %v619_v21, %v597_v26 }
  0xd3   : >> { %v553_v29 = vadd.f32 %v551_v25, %v549_v27 }
  0xd4   : >> { %v671_v30 = vpop.f32.mrf.mxu1 }
  0xd5   : >> { %vm554_vm7 = vcmp.ge.f32.partialorder %v553_v29, 0.0  ;;  %v555_v31 = vmul.f32 0.2, %v553_v29 }
  0xd6   : >> { %v517_v32 = vpop.f32.mrf.mxu0 }
  0xd7   : >> { %v556_v33 = vsel %vm554_vm7, %v553_v29, %v555_v31 }
  0xd8   : >> { %v557_v34 = vpack.c.bf16 %v556_v33, %v556_v33 }
  0xd9   : >> { %v599_v35 = vpop.f32.mrf.mxu2 }
  0xda   : >> { %v717_v36 = vpop.f32.mrf.mxu3  ;;  %560 = vst.msk [vmem:[%s559_s27] sm:$0xf] %vm172_vm0, %v557_v34 }
  0xdc   : >> { %v673_v37 = vpop.f32.mrf.mxu1 }
  0xde   : >> { %v648_v39 = vpop.f32.mrf.mxu0 }
  0xdf   : >> { %v652_v40 = vadd.f32 %v648_v39, %v620_v38 }
  0xe1   : >> { %v694_v41 = vpop.f32.mrf.mxu2  ;;  %v675_v42 = vadd.f32 %v671_v30, %v652_v40 }
  0xe2   : >> { %v719_v43 = vpop.f32.mrf.mxu3 }
  0xe3   : >> { %v698_v44 = vadd.f32 %v694_v41, %v675_v42 }
  0xe5   : >> { %v721_v45 = vadd.f32 %v717_v36, %v698_v44 }
  0xe6   : >> { %v650_v46 = vpop.f32.mrf.mxu0 }
  0xe7   : >> { %v722_v47 = vadd.f32 %v721_v45, %v551_v25 }
  0xe9   : >> { %v696_v48 = vpop.f32.mrf.mxu2  ;;  %vm723_vm8 = vcmp.ge.f32.partialorder %v722_v47, 0.0  ;;  %v724_v49 = vmul.f32 0.2, %v722_v47 }
  0xea   : > { %342 = sbr.rel (!%p340_p4) target bundleno = 48 (0x30), region = 86 }
  0xeb   : >> { %v725_v50 = vsel %vm723_vm8, %v722_v47, %v724_v49 }
  0xec   : >> { %v726_v51 = vpack.c.bf16 %v725_v50, %v725_v50 }
  0xee   : >> { %909 = vst.msk [vmem:[%s559_s27 + $0x4] sm:$0xf] %vm172_vm0, %v726_v51 }
  0xef PF: > { %s13_s12 = sadd.s32 1, %s956_s12  }
  0xf0   : > { %p10_p5 = scmp.ge.s32.totalorder %s13_s12, 4  }
  0xf2   :  { %12 = sbr.rel (!%p10_p5) target bundleno = 1 (0x1), region = 97 }

// kernel: _lambda_.13
= control target key start
LH: loop header
LB: loop body
LE: loop exit
PB: predicated region body
PF: predicated region fallthrough
CT: control target
= control target key end

     0   :  { %s1361_s12 = smov 0   ;;  %s1363_s13 = smov 0   ;;  %s1666_s0 = inlined_call_operand.vmem [shape: bf16[2048,4], index: 0, kind: input, shape index: {}]   ;;  %s1667_s1 = inlined_call_operand.vmem [shape: bf16[4,3], index: 1, kind: input, shape index: {}]   ;;  %s1668_s2 = inlined_call_operand.vmem [shape: f32[1,3], index: 2, kind: input, shape index: {}]   ;;  %s1669_s3 = inlined_call_operand.vmem [shape: f32[2048,3], index: 3, kind: output, shape index: {}]  }
   0x1   :  { %s1365_s14 = smov 0  }
   0x2 LB: > { %s25_s15 = sadd.s32 1, %s1335_s13  ;;  %p962_p0 = scmp.ge.s32.totalorder %s1339_s14, 1  ;;  %s1339_s14 = sphi %s1365_s14, %s13_s14   ;;  %s1335_s13 = sphi %s1363_s13, %s1671_s13   ;;  %s1331_s12 = sphi %s1361_s12, %s1670_s12  }
   0x3   : > { %p27_p1 = scmp.ge.s32.totalorder %s25_s15, 4  ;;  %p169_p2 = scmp.lt.s32.totalorder %s1339_s14, 5 }
   0x5   : > { %s1673_s15 = smov (%p27_p1, %s25_s15), 0  ;;  %p170_p3 = pnand %p962_p0, %p169_p2 }
   0x6   : > { %s963_s18 = sshll.u32 (!%p170_p3), %s1331_s12, 6 }
   0x7   : > { %173 = sbr.rel (%p170_p3) target bundleno = 281 (0x119), region = 32  ;;  %p204_p4 = scmp.lt.s32.totalorder (!%p170_p3), %s963_s18, 255 }
   0xc   : > { %v290_v0 = vld [vmem:[%s1667_s1] sm:$0x3]  ;;  %vm552_vm0 = vcmask 1041408   ;;  %s1675_s18 = smov (!%p204_p4, %s963_s18), 255  ;;  %vm455_vm1 = vcmask 31744   ;;  %vm789_vm2 = vcmask 23552  }
   0xd   : > { %v554_v1 = vsel %vm552_vm0, %v290_v0, 0  ;;  %s964_s19 = sshll.u32 %s1675_s18, 2  ;;  %v1457_v34 = vld [vmem:[%s1668_s2] ss:$0 sm:$0xff]  ;;  %s966_s25 = sshll.u32 %s1675_s18, 3 }
   0xe   : > { %563 = vmatpush.bf16.msra.mxu0 %v554_v1  ;;  %1161 = vmatpush.bf16.msra.mxu1 %v554_v1  ;;  %s1388_s22 = scalar_lea.vmem %s1666_s0, %s964_s19  ;;  %s1465_s28 = scalar_lea.vmem %s1669_s3, %s966_s25 }
   0xf   : > { %1162 = vmatpush.bf16.msra.mxu2 %v554_v1  ;;  %1163 = vmatpush.bf16.msra.mxu3 %v554_v1  ;;  %v1129_v2 = vld [vmem:[%s1388_s22] sm:$0xff]  ;;  %v1130_v6 = vld [vmem:[%s1388_s22 + $0x8] sm:$0xff]  ;;  %v1131_v10 = vld [vmem:[%s1388_s22 + $0x10] sm:$0xff] }
  0x10   : > { %v1137_v3 = vld [vmem:[%s1388_s22 + $0x40] sm:$0xff]  ;;  %v1138_v7 = vld [vmem:[%s1388_s22 + $0x48] sm:$0xff]  ;;  %v1139_v11 = vld [vmem:[%s1388_s22 + $0x50] sm:$0xff] }
  0x11   : > { %v1145_v4 = vld [vmem:[%s1388_s22 + $0x80] sm:$0xff]  ;;  %1095 = vmatmul.msk.bf16.vlgmr.msra.gmra.mxu0 %vm455_vm1, %v1129_v2  ;;  %1103 = vmatmul.msk.bf16.vlgmr.msra.gmra.mxu1 %vm455_vm1, %v1137_v3  ;;  %v1146_v8 = vld [vmem:[%s1388_s22 + $0x88] sm:$0xff]  ;;  %v1147_v12 = vld [vmem:[%s1388_s22 + $0x90] sm:$0xff] }
  0x12   : > { %v1153_v5 = vld [vmem:[%s1388_s22 + $0xc0] sm:$0xff]  ;;  %1111 = vmatmul.msk.bf16.vlgmr.msra.gmra.mxu2 %vm455_vm1, %v1145_v4  ;;  %v1154_v9 = vld [vmem:[%s1388_s22 + $0xc8] sm:$0xff]  ;;  %v1155_v13 = vld [vmem:[%s1388_s22 + $0xd0] sm:$0xff] }
  0x13   : > { %1119 = vmatmul.msk.bf16.vlgmr.msra.gmra.mxu3 %vm455_vm1, %v1153_v5  ;;  %v1132_v14 = vld [vmem:[%s1388_s22 + $0x18] sm:$0xff]  ;;  %v1133_v18 = vld [vmem:[%s1388_s22 + $0x20] sm:$0xff]  ;;  %v1134_v22 = vld [vmem:[%s1388_s22 + $0x28] sm:$0xff] }
  0x14   : > { %v1140_v15 = vld [vmem:[%s1388_s22 + $0x58] sm:$0xff]  ;;  %v1141_v19 = vld [vmem:[%s1388_s22 + $0x60] sm:$0xff]  ;;  %v1142_v23 = vld [vmem:[%s1388_s22 + $0x68] sm:$0xff] }
  0x15   : > { %v1148_v16 = vld [vmem:[%s1388_s22 + $0x98] sm:$0xff]  ;;  %v1149_v20 = vld [vmem:[%s1388_s22 + $0xa0] sm:$0xff]  ;;  %v1150_v24 = vld [vmem:[%s1388_s22 + $0xa8] sm:$0xff] }
  0x16   : > { %v1156_v17 = vld [vmem:[%s1388_s22 + $0xd8] sm:$0xff]  ;;  %v1157_v21 = vld [vmem:[%s1388_s22 + $0xe0] sm:$0xff]  ;;  %v1158_v25 = vld [vmem:[%s1388_s22 + $0xe8] sm:$0xff] }
  0x17   : > { %v1135_v26 = vld [vmem:[%s1388_s22 + $0x30] sm:$0xff]  ;;  %v1136_v30 = vld [vmem:[%s1388_s22 + $0x38] sm:$0xff] }
  0x18   : > { %v1143_v27 = vld [vmem:[%s1388_s22 + $0x70] sm:$0xff]  ;;  %v1144_v31 = vld [vmem:[%s1388_s22 + $0x78] sm:$0xff] }
  0x19   : > { %v1151_v28 = vld [vmem:[%s1388_s22 + $0xb0] sm:$0xff]  ;;  %v1152_v32 = vld [vmem:[%s1388_s22 + $0xb8] sm:$0xff] }
  0x1a   : > { %v1159_v29 = vld [vmem:[%s1388_s22 + $0xf0] sm:$0xff]  ;;  %v1160_v33 = vld [vmem:[%s1388_s22 + $0xf8] sm:$0xff] }
  0x21   : > { %1096 = vmatmul.msk.bf16.gmra.mxu0 %vm455_vm1, %v1130_v6  ;;  %1104 = vmatmul.msk.bf16.gmra.mxu1 %vm455_vm1, %v1138_v7 }
  0x22   : > { %1112 = vmatmul.msk.bf16.gmra.mxu2 %vm455_vm1, %v1146_v8 }
  0x23   : > { %1120 = vmatmul.msk.bf16.gmra.mxu3 %vm455_vm1, %v1154_v9 }
  0x31   : > { %1097 = vmatmul.msk.bf16.gmra.mxu0 %vm455_vm1, %v1131_v10  ;;  %1105 = vmatmul.msk.bf16.gmra.mxu1 %vm455_vm1, %v1139_v11 }
  0x32   : > { %1113 = vmatmul.msk.bf16.gmra.mxu2 %vm455_vm1, %v1147_v12 }
  0x33   : > { %1121 = vmatmul.msk.bf16.gmra.mxu3 %vm455_vm1, %v1155_v13 }
  0x41   : > { %1098 = vmatmul.msk.bf16.gmra.mxu0 %vm455_vm1, %v1132_v14  ;;  %1106 = vmatmul.msk.bf16.gmra.mxu1 %vm455_vm1, %v1140_v15 }
  0x42   : > { %1114 = vmatmul.msk.bf16.gmra.mxu2 %vm455_vm1, %v1148_v16 }
  0x43   : > { %1122 = vmatmul.msk.bf16.gmra.mxu3 %vm455_vm1, %v1156_v17 }
  0x51   : > { %1099 = vmatmul.msk.bf16.gmra.mxu0 %vm455_vm1, %v1133_v18  ;;  %1107 = vmatmul.msk.bf16.gmra.mxu1 %vm455_vm1, %v1141_v19 }
  0x52   : > { %1115 = vmatmul.msk.bf16.gmra.mxu2 %vm455_vm1, %v1149_v20 }
  0x53   : > { %1123 = vmatmul.msk.bf16.gmra.mxu3 %vm455_vm1, %v1157_v21 }
  0x61   : > { %1100 = vmatmul.msk.bf16.gmra.mxu0 %vm455_vm1, %v1134_v22  ;;  %1108 = vmatmul.msk.bf16.gmra.mxu1 %vm455_vm1, %v1142_v23 }
  0x62   : > { %1116 = vmatmul.msk.bf16.gmra.mxu2 %vm455_vm1, %v1150_v24 }
  0x63   : > { %1124 = vmatmul.msk.bf16.gmra.mxu3 %vm455_vm1, %v1158_v25 }
  0x71   : > { %1101 = vmatmul.msk.bf16.gmra.mxu0 %vm455_vm1, %v1135_v26  ;;  %1109 = vmatmul.msk.bf16.gmra.mxu1 %vm455_vm1, %v1143_v27 }
  0x72   : > { %1117 = vmatmul.msk.bf16.gmra.mxu2 %vm455_vm1, %v1151_v28 }
  0x73   : > { %1125 = vmatmul.msk.bf16.gmra.mxu3 %vm455_vm1, %v1159_v29 }
  0x81   : > { %1102 = vmatmul.msk.bf16.gmra.mxu0 %vm455_vm1, %v1136_v30  ;;  %1110 = vmatmul.msk.bf16.gmra.mxu1 %vm455_vm1, %v1144_v31 }
  0x82   : > { %1118 = vmatmul.msk.bf16.gmra.mxu2 %vm455_vm1, %v1152_v32 }
  0x83   : > { %1126 = vmatmul.msk.bf16.gmra.mxu3 %vm455_vm1, %v1160_v33 }
  0x8e   : > { %v565_v35 = vpop.f32.mrf.mxu0  ;;  %v605_v36 = vpop.f32.mrf.mxu1 }
  0x8f   : > { %v566_v37 = vadd.f32 %v1457_v34, %v565_v35  ;;  %v606_v38 = vadd.f32 %v1457_v34, %v605_v36 }
  0x91   : > { %1189 = vtanh.f32 %v566_v37 }
  0x92   : > { %1191 = vtanh.f32 %v606_v38 }
  0x95   : > { %v645_v39 = vpop.f32.mrf.mxu2 }
  0x96   : > { %v685_v40 = vpop.f32.mrf.mxu3  ;;  %v646_v41 = vadd.f32 %v1457_v34, %v645_v39  ;;  %v567_v43 = vpop.f32.mrf.mxu0 }
  0x97   : > { %v686_v42 = vadd.f32 %v1457_v34, %v685_v40  ;;  %v607_v44 = vpop.f32.mrf.mxu1  ;;  %v1190_v45 = vpop.eup %1189  ;;  %v568_v46 = vadd.f32 %v1457_v34, %v567_v43 }
  0x98   : > { %v608_v47 = vadd.f32 %v1457_v34, %v607_v44  ;;  %v1192_v48 = vpop.eup %1191  ;;  %790 = vst.msk [vmem:[%s1465_s28] sm:$0xff] %vm789_vm2, %v1190_v45  ;;  %1193 = vtanh.f32 %v646_v41 }
  0x99   : > { %806 = vst.msk [vmem:[%s1465_s28 + $0x80] sm:$0xff] %vm789_vm2, %v1192_v48  ;;  %1195 = vtanh.f32 %v686_v42 }
  0x9a   : > { %1197 = vtanh.f32 %v568_v46 }
  0x9b   : > { %1199 = vtanh.f32 %v608_v47 }
  0x9d   : > { %v647_v49 = vpop.f32.mrf.mxu2 }
  0x9e   : > { %v687_v50 = vpop.f32.mrf.mxu3  ;;  %v1194_v51 = vpop.eup %1193  ;;  %v648_v52 = vadd.f32 %v1457_v34, %v647_v49 }
  0x9f   : > { %v688_v53 = vadd.f32 %v1457_v34, %v687_v50  ;;  %v570_v54 = vpop.f32.mrf.mxu0  ;;  %v610_v55 = vpop.f32.mrf.mxu1  ;;  %822 = vst.msk [vmem:[%s1465_s28 + $0x100] sm:$0xff] %vm789_vm2, %v1194_v51 }
  0xa0   : > { %v1196_v56 = vpop.eup %1195  ;;  %v571_v57 = vadd.f32 %v1457_v34, %v570_v54  ;;  %v611_v58 = vadd.f32 %v1457_v34, %v610_v55  ;;  %1201 = vtanh.f32 %v648_v52 }
  0xa1   : > { %v1198_v59 = vpop.eup %1197  ;;  %838 = vst.msk [vmem:[%s1465_s28 + $0x180] sm:$0xff] %vm789_vm2, %v1196_v56  ;;  %1203 = vtanh.f32 %v688_v53 }
  0xa2   : > { %v1200_v60 = vpop.eup %1199  ;;  %791 = vst.msk [vmem:[%s1465_s28 + $0x8] sm:$0xff] %vm789_vm2, %v1198_v59  ;;  %1205 = vtanh.f32 %v571_v57 }
  0xa3   : > { %807 = vst.msk [vmem:[%s1465_s28 + $0x88] sm:$0xff] %vm789_vm2, %v1200_v60  ;;  %1207 = vtanh.f32 %v611_v58 }
  0xa5   : > { %v650_v61 = vpop.f32.mrf.mxu2 }
  0xa6   : > { %v690_v62 = vpop.f32.mrf.mxu3  ;;  %v1202_v63 = vpop.eup %1201  ;;  %v651_v0 = vadd.f32 %v1457_v34, %v650_v61 }
  0xa7   : > { %v691_v1 = vadd.f32 %v1457_v34, %v690_v62  ;;  %v572_v2 = vpop.f32.mrf.mxu0  ;;  %v612_v3 = vpop.f32.mrf.mxu1  ;;  %823 = vst.msk [vmem:[%s1465_s28 + $0x108] sm:$0xff] %vm789_vm2, %v1202_v63 }
  0xa8   : > { %v1204_v4 = vpop.eup %1203  ;;  %v573_v5 = vadd.f32 %v1457_v34, %v572_v2  ;;  %v613_v6 = vadd.f32 %v1457_v34, %v612_v3  ;;  %1209 = vtanh.f32 %v651_v0 }
  0xa9   : > { %v1206_v7 = vpop.eup %1205  ;;  %839 = vst.msk [vmem:[%s1465_s28 + $0x188] sm:$0xff] %vm789_vm2, %v1204_v4  ;;  %1211 = vtanh.f32 %v691_v1 }
  0xaa   : > { %v1208_v8 = vpop.eup %1207  ;;  %792 = vst.msk [vmem:[%s1465_s28 + $0x10] sm:$0xff] %vm789_vm2, %v1206_v7  ;;  %1213 = vtanh.f32 %v573_v5 }
  0xab   : > { %808 = vst.msk [vmem:[%s1465_s28 + $0x90] sm:$0xff] %vm789_vm2, %v1208_v8  ;;  %1215 = vtanh.f32 %v613_v6 }
  0xad   : > { %v652_v9 = vpop.f32.mrf.mxu2 }
  0xae   : > { %v692_v10 = vpop.f32.mrf.mxu3  ;;  %v1210_v11 = vpop.eup %1209  ;;  %v653_v12 = vadd.f32 %v1457_v34, %v652_v9 }
  0xaf   : > { %v693_v13 = vadd.f32 %v1457_v34, %v692_v10  ;;  %v575_v14 = vpop.f32.mrf.mxu0  ;;  %v615_v15 = vpop.f32.mrf.mxu1  ;;  %824 = vst.msk [vmem:[%s1465_s28 + $0x110] sm:$0xff] %vm789_vm2, %v1210_v11 }
  0xb0   : > { %v1212_v16 = vpop.eup %1211  ;;  %v576_v17 = vadd.f32 %v1457_v34, %v575_v14  ;;  %v616_v18 = vadd.f32 %v1457_v34, %v615_v15  ;;  %1217 = vtanh.f32 %v653_v12 }
  0xb1   : > { %v1214_v19 = vpop.eup %1213  ;;  %840 = vst.msk [vmem:[%s1465_s28 + $0x190] sm:$0xff] %vm789_vm2, %v1212_v16  ;;  %1219 = vtanh.f32 %v693_v13 }
  0xb2   : > { %v1216_v20 = vpop.eup %1215  ;;  %793 = vst.msk [vmem:[%s1465_s28 + $0x18] sm:$0xff] %vm789_vm2, %v1214_v19  ;;  %1221 = vtanh.f32 %v576_v17 }
  0xb3   : > { %809 = vst.msk [vmem:[%s1465_s28 + $0x98] sm:$0xff] %vm789_vm2, %v1216_v20  ;;  %1223 = vtanh.f32 %v616_v18 }
  0xb5   : > { %v655_v21 = vpop.f32.mrf.mxu2 }
  0xb6   : > { %v695_v22 = vpop.f32.mrf.mxu3  ;;  %v1218_v23 = vpop.eup %1217  ;;  %v656_v24 = vadd.f32 %v1457_v34, %v655_v21 }
  0xb7   : > { %v696_v25 = vadd.f32 %v1457_v34, %v695_v22  ;;  %v577_v26 = vpop.f32.mrf.mxu0  ;;  %v617_v27 = vpop.f32.mrf.mxu1  ;;  %825 = vst.msk [vmem:[%s1465_s28 + $0x118] sm:$0xff] %vm789_vm2, %v1218_v23 }
  0xb8   : > { %v1220_v28 = vpop.eup %1219  ;;  %v578_v29 = vadd.f32 %v1457_v34, %v577_v26  ;;  %v618_v30 = vadd.f32 %v1457_v34, %v617_v27  ;;  %1225 = vtanh.f32 %v656_v24 }
  0xb9   : > { %v1222_v31 = vpop.eup %1221  ;;  %841 = vst.msk [vmem:[%s1465_s28 + $0x198] sm:$0xff] %vm789_vm2, %v1220_v28  ;;  %1227 = vtanh.f32 %v696_v25 }
  0xba   : > { %v1224_v32 = vpop.eup %1223  ;;  %794 = vst.msk [vmem:[%s1465_s28 + $0x20] sm:$0xff] %vm789_vm2, %v1222_v31  ;;  %1229 = vtanh.f32 %v578_v29 }
  0xbb   : > { %810 = vst.msk [vmem:[%s1465_s28 + $0xa0] sm:$0xff] %vm789_vm2, %v1224_v32  ;;  %1231 = vtanh.f32 %v618_v30 }
  0xbd   : > { %v657_v33 = vpop.f32.mrf.mxu2 }
  0xbe   : > { %v697_v35 = vpop.f32.mrf.mxu3  ;;  %v1226_v36 = vpop.eup %1225  ;;  %v658_v37 = vadd.f32 %v1457_v34, %v657_v33 }
  0xbf   : > { %v698_v38 = vadd.f32 %v1457_v34, %v697_v35  ;;  %v580_v39 = vpop.f32.mrf.mxu0  ;;  %v620_v40 = vpop.f32.mrf.mxu1  ;;  %826 = vst.msk [vmem:[%s1465_s28 + $0x120] sm:$0xff] %vm789_vm2, %v1226_v36 }
  0xc0   : > { %v1228_v41 = vpop.eup %1227  ;;  %v581_v42 = vadd.f32 %v1457_v34, %v580_v39  ;;  %v621_v43 = vadd.f32 %v1457_v34, %v620_v40  ;;  %1233 = vtanh.f32 %v658_v37 }
  0xc1   : > { %v1230_v44 = vpop.eup %1229  ;;  %842 = vst.msk [vmem:[%s1465_s28 + $0x1a0] sm:$0xff] %vm789_vm2, %v1228_v41  ;;  %1235 = vtanh.f32 %v698_v38 }
  0xc2   : > { %v1232_v45 = vpop.eup %1231  ;;  %795 = vst.msk [vmem:[%s1465_s28 + $0x28] sm:$0xff] %vm789_vm2, %v1230_v44  ;;  %1237 = vtanh.f32 %v581_v42 }
  0xc3   : > { %811 = vst.msk [vmem:[%s1465_s28 + $0xa8] sm:$0xff] %vm789_vm2, %v1232_v45  ;;  %1239 = vtanh.f32 %v621_v43 }
  0xc5   : > { %v660_v46 = vpop.f32.mrf.mxu2 }
  0xc6   : > { %v700_v47 = vpop.f32.mrf.mxu3  ;;  %v1234_v48 = vpop.eup %1233  ;;  %v661_v49 = vadd.f32 %v1457_v34, %v660_v46 }
  0xc7   : > { %v701_v50 = vadd.f32 %v1457_v34, %v700_v47  ;;  %v582_v51 = vpop.f32.mrf.mxu0  ;;  %v622_v52 = vpop.f32.mrf.mxu1  ;;  %827 = vst.msk [vmem:[%s1465_s28 + $0x128] sm:$0xff] %vm789_vm2, %v1234_v48 }
  0xc8   : > { %v1236_v53 = vpop.eup %1235  ;;  %v583_v54 = vadd.f32 %v1457_v34, %v582_v51  ;;  %v623_v55 = vadd.f32 %v1457_v34, %v622_v52  ;;  %1241 = vtanh.f32 %v661_v49 }
  0xc9   : > { %v1238_v56 = vpop.eup %1237  ;;  %843 = vst.msk [vmem:[%s1465_s28 + $0x1a8] sm:$0xff] %vm789_vm2, %v1236_v53  ;;  %1243 = vtanh.f32 %v701_v50 }
  0xca   : > { %v1240_v57 = vpop.eup %1239  ;;  %796 = vst.msk [vmem:[%s1465_s28 + $0x30] sm:$0xff] %vm789_vm2, %v1238_v56  ;;  %1245 = vtanh.f32 %v583_v54 }
  0xcb   : > { %812 = vst.msk [vmem:[%s1465_s28 + $0xb0] sm:$0xff] %vm789_vm2, %v1240_v57  ;;  %1247 = vtanh.f32 %v623_v55 }
  0xcd   : > { %v662_v58 = vpop.f32.mrf.mxu2 }
  0xce   : > { %v702_v59 = vpop.f32.mrf.mxu3  ;;  %v1242_v60 = vpop.eup %1241  ;;  %v663_v61 = vadd.f32 %v1457_v34, %v662_v58 }
  0xcf   : > { %v703_v62 = vadd.f32 %v1457_v34, %v702_v59  ;;  %v585_v63 = vpop.f32.mrf.mxu0  ;;  %v625_v0 = vpop.f32.mrf.mxu1  ;;  %828 = vst.msk [vmem:[%s1465_s28 + $0x130] sm:$0xff] %vm789_vm2, %v1242_v60 }
  0xd0   : > { %v1244_v1 = vpop.eup %1243  ;;  %v586_v2 = vadd.f32 %v1457_v34, %v585_v63  ;;  %v626_v3 = vadd.f32 %v1457_v34, %v625_v0  ;;  %1249 = vtanh.f32 %v663_v61 }
  0xd1   : > { %v1246_v4 = vpop.eup %1245  ;;  %844 = vst.msk [vmem:[%s1465_s28 + $0x1b0] sm:$0xff] %vm789_vm2, %v1244_v1  ;;  %1251 = vtanh.f32 %v703_v62 }
  0xd2   : > { %v1248_v5 = vpop.eup %1247  ;;  %797 = vst.msk [vmem:[%s1465_s28 + $0x38] sm:$0xff] %vm789_vm2, %v1246_v4  ;;  %1253 = vtanh.f32 %v586_v2 }
  0xd3   : > { %813 = vst.msk [vmem:[%s1465_s28 + $0xb8] sm:$0xff] %vm789_vm2, %v1248_v5  ;;  %1255 = vtanh.f32 %v626_v3 }
  0xd5   : > { %v665_v6 = vpop.f32.mrf.mxu2 }
  0xd6   : > { %v705_v7 = vpop.f32.mrf.mxu3  ;;  %v1250_v8 = vpop.eup %1249  ;;  %v666_v9 = vadd.f32 %v1457_v34, %v665_v6 }
  0xd7   : > { %v706_v10 = vadd.f32 %v1457_v34, %v705_v7  ;;  %v587_v11 = vpop.f32.mrf.mxu0  ;;  %v627_v12 = vpop.f32.mrf.mxu1  ;;  %829 = vst.msk [vmem:[%s1465_s28 + $0x138] sm:$0xff] %vm789_vm2, %v1250_v8 }
  0xd8   : > { %v1252_v13 = vpop.eup %1251  ;;  %v588_v14 = vadd.f32 %v1457_v34, %v587_v11  ;;  %v628_v15 = vadd.f32 %v1457_v34, %v627_v12  ;;  %1257 = vtanh.f32 %v666_v9 }
  0xd9   : > { %v1254_v16 = vpop.eup %1253  ;;  %845 = vst.msk [vmem:[%s1465_s28 + $0x1b8] sm:$0xff] %vm789_vm2, %v1252_v13  ;;  %1259 = vtanh.f32 %v706_v10 }
  0xda   : > { %v1256_v17 = vpop.eup %1255  ;;  %798 = vst.msk [vmem:[%s1465_s28 + $0x40] sm:$0xff] %vm789_vm2, %v1254_v16  ;;  %1261 = vtanh.f32 %v588_v14 }
  0xdb   : > { %814 = vst.msk [vmem:[%s1465_s28 + $0xc0] sm:$0xff] %vm789_vm2, %v1256_v17  ;;  %1263 = vtanh.f32 %v628_v15 }
  0xdd   : > { %v667_v18 = vpop.f32.mrf.mxu2 }
  0xde   : > { %v707_v19 = vpop.f32.mrf.mxu3  ;;  %v1258_v20 = vpop.eup %1257  ;;  %v668_v21 = vadd.f32 %v1457_v34, %v667_v18 }
  0xdf   : > { %v708_v22 = vadd.f32 %v1457_v34, %v707_v19  ;;  %v590_v23 = vpop.f32.mrf.mxu0  ;;  %v630_v24 = vpop.f32.mrf.mxu1  ;;  %830 = vst.msk [vmem:[%s1465_s28 + $0x140] sm:$0xff] %vm789_vm2, %v1258_v20 }
  0xe0   : > { %v1260_v25 = vpop.eup %1259  ;;  %v591_v26 = vadd.f32 %v1457_v34, %v590_v23  ;;  %v631_v27 = vadd.f32 %v1457_v34, %v630_v24  ;;  %1265 = vtanh.f32 %v668_v21 }
  0xe1   : > { %v1262_v28 = vpop.eup %1261  ;;  %846 = vst.msk [vmem:[%s1465_s28 + $0x1c0] sm:$0xff] %vm789_vm2, %v1260_v25  ;;  %1267 = vtanh.f32 %v708_v22 }
  0xe2   : > { %v1264_v29 = vpop.eup %1263  ;;  %799 = vst.msk [vmem:[%s1465_s28 + $0x48] sm:$0xff] %vm789_vm2, %v1262_v28  ;;  %1269 = vtanh.f32 %v591_v26 }
  0xe3   : > { %815 = vst.msk [vmem:[%s1465_s28 + $0xc8] sm:$0xff] %vm789_vm2, %v1264_v29  ;;  %1271 = vtanh.f32 %v631_v27 }
  0xe5   : > { %v670_v30 = vpop.f32.mrf.mxu2 }
  0xe6   : > { %v710_v31 = vpop.f32.mrf.mxu3  ;;  %v1266_v32 = vpop.eup %1265  ;;  %v671_v33 = vadd.f32 %v1457_v34, %v670_v30 }
  0xe7   : > { %v711_v35 = vadd.f32 %v1457_v34, %v710_v31  ;;  %v592_v36 = vpop.f32.mrf.mxu0  ;;  %v632_v37 = vpop.f32.mrf.mxu1  ;;  %831 = vst.msk [vmem:[%s1465_s28 + $0x148] sm:$0xff] %vm789_vm2, %v1266_v32 }
  0xe8   : > { %v1268_v38 = vpop.eup %1267  ;;  %v593_v39 = vadd.f32 %v1457_v34, %v592_v36  ;;  %v633_v40 = vadd.f32 %v1457_v34, %v632_v37  ;;  %1273 = vtanh.f32 %v671_v33 }
  0xe9   : > { %v1270_v41 = vpop.eup %1269  ;;  %847 = vst.msk [vmem:[%s1465_s28 + $0x1c8] sm:$0xff] %vm789_vm2, %v1268_v38  ;;  %1275 = vtanh.f32 %v711_v35 }
  0xea   : > { %v1272_v42 = vpop.eup %1271  ;;  %800 = vst.msk [vmem:[%s1465_s28 + $0x50] sm:$0xff] %vm789_vm2, %v1270_v41  ;;  %1277 = vtanh.f32 %v593_v39 }
  0xeb   : > { %816 = vst.msk [vmem:[%s1465_s28 + $0xd0] sm:$0xff] %vm789_vm2, %v1272_v42  ;;  %1279 = vtanh.f32 %v633_v40 }
  0xed   : > { %v672_v43 = vpop.f32.mrf.mxu2 }
  0xee   : > { %v712_v44 = vpop.f32.mrf.mxu3  ;;  %v1274_v45 = vpop.eup %1273  ;;  %v673_v46 = vadd.f32 %v1457_v34, %v672_v43 }
  0xef   : > { %v713_v47 = vadd.f32 %v1457_v34, %v712_v44  ;;  %v595_v48 = vpop.f32.mrf.mxu0  ;;  %v635_v49 = vpop.f32.mrf.mxu1  ;;  %832 = vst.msk [vmem:[%s1465_s28 + $0x150] sm:$0xff] %vm789_vm2, %v1274_v45 }
  0xf0   : > { %v1276_v50 = vpop.eup %1275  ;;  %v596_v51 = vadd.f32 %v1457_v34, %v595_v48  ;;  %v636_v52 = vadd.f32 %v1457_v34, %v635_v49  ;;  %1281 = vtanh.f32 %v673_v46 }
  0xf1   : > { %v1278_v53 = vpop.eup %1277  ;;  %848 = vst.msk [vmem:[%s1465_s28 + $0x1d0] sm:$0xff] %vm789_vm2, %v1276_v50  ;;  %1283 = vtanh.f32 %v713_v47 }
  0xf2   : > { %v1280_v54 = vpop.eup %1279  ;;  %801 = vst.msk [vmem:[%s1465_s28 + $0x58] sm:$0xff] %vm789_vm2, %v1278_v53  ;;  %1285 = vtanh.f32 %v596_v51 }
  0xf3   : > { %817 = vst.msk [vmem:[%s1465_s28 + $0xd8] sm:$0xff] %vm789_vm2, %v1280_v54  ;;  %1287 = vtanh.f32 %v636_v52 }
  0xf5   : > { %v675_v55 = vpop.f32.mrf.mxu2 }
  0xf6   : > { %v715_v56 = vpop.f32.mrf.mxu3  ;;  %v1282_v57 = vpop.eup %1281  ;;  %v676_v58 = vadd.f32 %v1457_v34, %v675_v55 }
  0xf7   : > { %v716_v59 = vadd.f32 %v1457_v34, %v715_v56  ;;  %v597_v60 = vpop.f32.mrf.mxu0  ;;  %v637_v61 = vpop.f32.mrf.mxu1  ;;  %833 = vst.msk [vmem:[%s1465_s28 + $0x158] sm:$0xff] %vm789_vm2, %v1282_v57 }
  0xf8   : > { %v1284_v62 = vpop.eup %1283  ;;  %v598_v63 = vadd.f32 %v1457_v34, %v597_v60  ;;  %v638_v0 = vadd.f32 %v1457_v34, %v637_v61  ;;  %1289 = vtanh.f32 %v676_v58 }
  0xf9   : > { %v1286_v1 = vpop.eup %1285  ;;  %849 = vst.msk [vmem:[%s1465_s28 + $0x1d8] sm:$0xff] %vm789_vm2, %v1284_v62  ;;  %1291 = vtanh.f32 %v716_v59 }
  0xfa   : > { %v1288_v2 = vpop.eup %1287  ;;  %802 = vst.msk [vmem:[%s1465_s28 + $0x60] sm:$0xff] %vm789_vm2, %v1286_v1  ;;  %1293 = vtanh.f32 %v598_v63 }
  0xfb   : > { %818 = vst.msk [vmem:[%s1465_s28 + $0xe0] sm:$0xff] %vm789_vm2, %v1288_v2  ;;  %1295 = vtanh.f32 %v638_v0 }
  0xfd   : > { %v677_v3 = vpop.f32.mrf.mxu2 }
  0xfe   : > { %v717_v4 = vpop.f32.mrf.mxu3  ;;  %v1290_v5 = vpop.eup %1289  ;;  %v678_v6 = vadd.f32 %v1457_v34, %v677_v3 }
  0xff   : > { %v718_v7 = vadd.f32 %v1457_v34, %v717_v4  ;;  %v600_v8 = vpop.f32.mrf.mxu0  ;;  %v640_v9 = vpop.f32.mrf.mxu1  ;;  %834 = vst.msk [vmem:[%s1465_s28 + $0x160] sm:$0xff] %vm789_vm2, %v1290_v5 }
 0x100   : > { %v1292_v10 = vpop.eup %1291  ;;  %v601_v11 = vadd.f32 %v1457_v34, %v600_v8  ;;  %v641_v12 = vadd.f32 %v1457_v34, %v640_v9  ;;  %1297 = vtanh.f32 %v678_v6 }
 0x101   : > { %v1294_v13 = vpop.eup %1293  ;;  %850 = vst.msk [vmem:[%s1465_s28 + $0x1e0] sm:$0xff] %vm789_vm2, %v1292_v10  ;;  %1299 = vtanh.f32 %v718_v7 }
 0x102   : > { %v1296_v14 = vpop.eup %1295  ;;  %803 = vst.msk [vmem:[%s1465_s28 + $0x68] sm:$0xff] %vm789_vm2, %v1294_v13  ;;  %1301 = vtanh.f32 %v601_v11 }
 0x103   : > { %819 = vst.msk [vmem:[%s1465_s28 + $0xe8] sm:$0xff] %vm789_vm2, %v1296_v14  ;;  %1303 = vtanh.f32 %v641_v12 }
 0x105   : > { %v680_v15 = vpop.f32.mrf.mxu2 }
 0x106   : > { %v720_v16 = vpop.f32.mrf.mxu3  ;;  %v1298_v17 = vpop.eup %1297  ;;  %v681_v18 = vadd.f32 %v1457_v34, %v680_v15 }
 0x107   : > { %v721_v19 = vadd.f32 %v1457_v34, %v720_v16  ;;  %v602_v20 = vpop.f32.mrf.mxu0  ;;  %v642_v21 = vpop.f32.mrf.mxu1  ;;  %835 = vst.msk [vmem:[%s1465_s28 + $0x168] sm:$0xff] %vm789_vm2, %v1298_v17 }
 0x108   : > { %v1300_v22 = vpop.eup %1299  ;;  %v603_v23 = vadd.f32 %v1457_v34, %v602_v20  ;;  %v643_v24 = vadd.f32 %v1457_v34, %v642_v21  ;;  %1305 = vtanh.f32 %v681_v18 }
 0x109   : > { %v1302_v25 = vpop.eup %1301  ;;  %851 = vst.msk [vmem:[%s1465_s28 + $0x1e8] sm:$0xff] %vm789_vm2, %v1300_v22  ;;  %1307 = vtanh.f32 %v721_v19 }
 0x10a   : > { %v1304_v26 = vpop.eup %1303  ;;  %804 = vst.msk [vmem:[%s1465_s28 + $0x70] sm:$0xff] %vm789_vm2, %v1302_v25  ;;  %1309 = vtanh.f32 %v603_v23 }
 0x10b   : > { %820 = vst.msk [vmem:[%s1465_s28 + $0xf0] sm:$0xff] %vm789_vm2, %v1304_v26  ;;  %1311 = vtanh.f32 %v643_v24 }
 0x10d   : > { %v682_v27 = vpop.f32.mrf.mxu2 }
 0x10e   : > { %v722_v28 = vpop.f32.mrf.mxu3  ;;  %v1306_v29 = vpop.eup %1305  ;;  %v683_v30 = vadd.f32 %v1457_v34, %v682_v27 }
 0x10f   : > { %v723_v31 = vadd.f32 %v1457_v34, %v722_v28  ;;  %v1308_v32 = vpop.eup %1307  ;;  %836 = vst.msk [vmem:[%s1465_s28 + $0x170] sm:$0xff] %vm789_vm2, %v1306_v29 }
 0x110   : > { %v1310_v33 = vpop.eup %1309  ;;  %852 = vst.msk [vmem:[%s1465_s28 + $0x1f0] sm:$0xff] %vm789_vm2, %v1308_v32  ;;  %1313 = vtanh.f32 %v683_v30 }
 0x111   : > { %v1312_v35 = vpop.eup %1311  ;;  %805 = vst.msk [vmem:[%s1465_s28 + $0x78] sm:$0xff] %vm789_vm2, %v1310_v33  ;;  %1315 = vtanh.f32 %v723_v31 }
 0x112   : > { %821 = vst.msk [vmem:[%s1465_s28 + $0xf8] sm:$0xff] %vm789_vm2, %v1312_v35 }
 0x116   : > { %v1314_v36 = vpop.eup %1313 }
 0x117   : > { %v1316_v37 = vpop.eup %1315  ;;  %837 = vst.msk [vmem:[%s1465_s28 + $0x178] sm:$0xff] %vm789_vm2, %v1314_v36 }
 0x118   : > { %853 = vst.msk [vmem:[%s1465_s28 + $0x1f8] sm:$0xff] %vm789_vm2, %v1316_v37 }
 0x119 PF: > { %s13_s14 = sadd.s32 1, %s1339_s14   ;;  %s1670_s12 = smov %s1335_s13 }
 0x11a   : > { %p10_p5 = scmp.ge.s32.totalorder %s13_s14, 6   ;;  %s1671_s13 = smov %s1673_s15 }
 0x11c   :  { %12 = sbr.rel (!%p10_p5) target bundleno = 2 (0x2), region = 68 }

// kernel: _lambda_.12
= control target key start
LH: loop header
LB: loop body
LE: loop exit
PB: predicated region body
PF: predicated region fallthrough
CT: control target
= control target key end

     0   :  { %s1313_s12 = smov 0   ;;  %s1834_s0 = inlined_call_operand.vmem [shape: bf16[2,16,16,8], index: 0, kind: input, shape index: {}]   ;;  %s1835_s1 = inlined_call_operand.vmem [shape: bf16[2,2,3,8,8], index: 1, kind: input, shape index: {}]   ;;  %s1836_s2 = inlined_call_operand.vmem [shape: f32[1,8], index: 2, kind: input, shape index: {}]   ;;  %s1837_s3 = inlined_call_operand.vmem [shape: bf16[2,16,2,16,8], index: 3, kind: output, shape index: {}]  }
   0x1 LB: > { %s1187_s13 = sadd.s32 4294967295, %s1286_s12   ;;  %p1191_p0 = scmp.ge.s32.totalorder %s1286_s12, 1  ;;  %s1286_s12 = sphi %s1313_s12, %s13_s12  }
   0x2   : > { %p137_p1 = scmp.lt.s32.totalorder %s1286_s12, 3 }
   0x4   : > { %p138_p2 = pnand %p1191_p0, %p137_p1 }
   0x5   : > { %p161_p3 = scmp.lt.s32.totalorder (!%p138_p2), %s1187_s13, 1  ;;  %s1718_s24 = smov (!%p138_p2), 0  }
   0x6   : > { %141 = sbr.rel (%p138_p2) target bundleno = 312 (0x138), region = 32 }
   0xb   : > { %vm172_vm0 = vcmask 60416   ;;  %v1292_v0 = vmov 0   ;;  %s1845_s13 = smov (!%p161_p3, %s1187_s13), 1  ;;  %v1376_v1 = vld [vmem:[%s1836_s2] sm:$0x1]  ;;  %vm175_vm1 = vcmask 57344  }
   0xc   : > { %177 = vst.msk [vmem:[#allocation2 + $0xc] sm:$0xf] %vm172_vm0, %v1292_v0  ;;  %s1237_s14 = sshll.u32 %s1845_s13, 8  ;;  %s1236_s20 = sshll.u32 %s1845_s13, 7  ;;  %vm585_vm2 = vsmask.f32 7938 }
   0xd   : > { %173 = vst.msk [vmem:[#allocation2] sm:$0xf] %vm172_vm0, %v1292_v0  ;;  %s1337_s17 = scalar_lea.vmem %s1837_s3, %s1237_s14  ;;  %s1394_s23 = scalar_lea.vmem %s1834_s0, %s1236_s20  ;;  %vm260_vm3 = vsmask.f32 256  ;;  %vm261_vm4 = vsmask.f32 4368  ;;  %vm1485_vm5 = vmand %vm172_vm0, %vm585_vm2 }
   0xe   : > { %174 = vst.msk [vmem:[#allocation2 + $0x4] sm:$0xf] %vm172_vm0, %v1292_v0  ;;  %v228_v2 = vld [vmem:[%s1394_s23] sm:$0xf]  ;;  %v229_v3 = vld [vmem:[%s1394_s23 + $0x4] sm:$0xf]  ;;  %vm1505_vm6 = vmor %vm260_vm3, %vm261_vm4 }
   0xf   : > { %178 = vst.msk [vmem:[#allocation2 + $0x10] sm:$0xf] %vm172_vm0, %v1292_v0  ;;  %v264_v4 = vshrl.u32 %v228_v2, 16  ;;  %v272_v5 = vshrl.u32 %v229_v3, 16  ;;  %v1417_v6 = vld [vmem:[%s1394_s23 + $0x8] sm:$0xf]  ;;  %vm1519_vm7 = vmand %vm175_vm1, %vm260_vm3 }
  0x10   : > { %180 = vst.msk [vmem:[#allocation2 + $0x18] sm:$0xf] %vm172_vm0, %v1292_v0  ;;  %v1420_v7 = vld [vmem:[%s1394_s23 + $0xc] sm:$0xf]  ;;  %v232_v9 = vld [vmem:[%s1394_s23 + $0x10] sm:$0xf] }
  0x11   : > { %181 = vst.msk [vmem:[#allocation2 + $0x1c] sm:$0xf] %vm172_vm0, %v1292_v0  ;;  %v1424_v8 = vrot.slane %v264_v4, 7  ;;  %v1431_v10 = vrot.slane %v272_v5, 7  ;;  %v281_v11 = vshrl.u32 %v1417_v6, 16  ;;  %v289_v12 = vshrl.u32 %v1420_v7, 16 }
  0x12   : > { %183 = vst.msk [vmem:[#allocation2 + $0x24] sm:$0xf] %vm172_vm0, %v1292_v0  ;;  %v1438_v13 = vld [vmem:[%s1394_s23 + $0x14] sm:$0xf]  ;;  %v1441_v14 = vld [vmem:[%s1394_s23 + $0x18] sm:$0xf] }
  0x13   : > { %184 = vst.msk [vmem:[#allocation2 + $0x28] sm:$0xf] %vm172_vm0, %v1292_v0  ;;  %v298_v15 = vshrl.u32 %v232_v9, 16  ;;  %v267_v16 = vshll.u32 %v228_v2, 16  ;;  %v270_v17 = vrot.slane %v1424_v8, 4  ;;  %v275_v18 = vshll.u32 %v229_v3, 16 }
  0x14   : > { %186 = vst.msk [vmem:[#allocation2 + $0x30] sm:$0xf] %vm172_vm0, %v1292_v0  ;;  %v284_v19 = vshll.u32 %v1417_v6, 16  ;;  %v279_v20 = vrot.slane %v1431_v10, 4  ;;  %v1452_v21 = vrot.slane %v281_v11, 7  ;;  %v306_v22 = vshrl.u32 %v1438_v13, 16 }
  0x15   : > { %187 = vst.msk [vmem:[#allocation2 + $0x34] sm:$0xf] %vm172_vm0, %v1292_v0  ;;  %v315_v23 = vshrl.u32 %v1441_v14, 16  ;;  %v1458_v24 = vrot.slane %v289_v12, 7  ;;  %v292_v25 = vshll.u32 %v1420_v7, 16  ;;  %v1466_v28 = vrot.slane %v298_v15, 7 }
  0x16   : > { %189 = vst.msk [vmem:[#allocation2 + $0x3c] sm:$0xf] %vm172_vm0, %v1292_v0  ;;  %v1462_v26 = vld [vmem:[%s1394_s23 + $0x1c] sm:$0xf]  ;;  %v587_v27 = vld [vmem:[#allocation2 + $0xc] sm:$0xf]  ;;  %v269_v31 = vor.u32 %v267_v16, %v1424_v8  ;;  %v277_v32 = vor.u32 %v275_v18, %v1431_v10  ;;  %v286_v53 = vor.u32 %v284_v19, %v1452_v21 }
  0x17   : > { %190 = vst.msk [vmem:[#allocation2 + $0x40] sm:$0xf] %vm172_vm0, %v1292_v0  ;;  %v301_v29 = vshll.u32 %v232_v9, 16  ;;  %v1469_v30 = vld [vmem:[%s1394_s23 + $0x20] sm:$0xf]  ;;  %v287_v36 = vrot.slane %v1452_v21, 4  ;;  %v294_v54 = vor.u32 %v292_v25, %v1458_v24 }
  0x18   : > { %192 = vst.msk [vmem:[#allocation2 + $0x48] sm:$0xf] %vm172_vm0, %v1292_v0  ;;  %v1476_v33 = vld [vmem:[%s1394_s23 + $0x24] sm:$0xf]  ;;  %v1479_v34 = vld [vmem:[%s1394_s23 + $0x28] sm:$0xf]  ;;  %v588_v50 = vsel %vm1485_vm5, %v269_v31, %v587_v27  ;;  %v278_v62 = vsel %vm1505_vm6, %v270_v17, %v277_v32 }
  0x19   : > { %193 = vst.msk [vmem:[#allocation2 + $0x4c] sm:$0xf] %vm172_vm0, %v1292_v0  ;;  %v1490_v37 = vrot.slane %v306_v22, 7  ;;  %v1492_v38 = vrot.slane %v315_v23, 7  ;;  %v323_v39 = vshrl.u32 %v1462_v26, 16  ;;  %v296_v40 = vrot.slane %v1458_v24, 4 }
  0x1a   : > { %195 = vst.msk [vmem:[#allocation2 + $0x54] sm:$0xf] %vm172_vm0, %v1292_v0  ;;  %v309_v41 = vshll.u32 %v1438_v13, 16  ;;  %v318_v42 = vshll.u32 %v1441_v14, 16  ;;  %v332_v43 = vshrl.u32 %v1469_v30, 16  ;;  %v304_v46 = vrot.slane %v1466_v28, 4 }
  0x1b   : > { %196 = vst.msk [vmem:[#allocation2 + $0x58] sm:$0xf] %vm172_vm0, %v1292_v0  ;;  %v596_v45 = vld [vmem:[#allocation2 + $0x18] sm:$0xf]  ;;  %v326_v47 = vshll.u32 %v1462_v26, 16  ;;  %v340_v48 = vshrl.u32 %v1476_v33, 16  ;;  %v303_v55 = vor.u32 %v301_v29, %v1466_v28  ;;  %v295_v10 = vsel %vm1505_vm6, %v287_v36, %v294_v54 }
  0x1c   : > { %198 = vst.msk [vmem:[#allocation2 + $0x60] sm:$0xf] %vm172_vm0, %v1292_v0  ;;  %v349_v49 = vshrl.u32 %v1479_v34, 16  ;;  %v603_v56 = vld [vmem:[#allocation2 + $0x24] sm:$0xf]  ;;  %v313_v58 = vrot.slane %v1490_v37, 4  ;;  %v311_v63 = vor.u32 %v309_v41, %v1490_v37  ;;  %v597_v9 = vsel %vm1485_vm5, %v286_v53, %v596_v45 }
  0x1d   : > { %199 = vst.msk [vmem:[#allocation2 + $0x64] sm:$0xf] %vm172_vm0, %v1292_v0  ;;  %v1527_v57 = vld [vmem:[%s1394_s23 + $0x2c] sm:$0xf]  ;;  %v321_v59 = vrot.slane %v1492_v38, 4  ;;  %v1533_v60 = vrot.slane %v323_v39, 7  ;;  %v604_v13 = vsel %vm1485_vm5, %v303_v55, %v603_v56  ;;  %v320_v14 = vor.u32 %v318_v42, %v1492_v38 }
  0x1e   : > { %201 = vst.msk [vmem:[#allocation2 + $0x6c] sm:$0xf] %vm172_vm0, %v1292_v0  ;;  %v335_v61 = vshll.u32 %v1469_v30, 16  ;;  %v1541_v2 = vrot.slane %v332_v43, 7  ;;  %v343_v3 = vshll.u32 %v1476_v33, 16  ;;  %v1551_v7 = vrot.slane %v340_v48, 7 }
  0x1f   : > { %202 = vst.msk [vmem:[#allocation2 + $0x70] sm:$0xf] %vm172_vm0, %v1292_v0  ;;  %v1545_v4 = vld [vmem:[%s1394_s23 + $0x30] sm:$0xf]  ;;  %v357_v8 = vshrl.u32 %v1527_v57, 16  ;;  %v1558_v12 = vrot.slane %v349_v49, 7  ;;  %v328_v21 = vor.u32 %v326_v47, %v1533_v60 }
  0x20   : > { %204 = vst.msk [vmem:[#allocation2 + $0x78] sm:$0xf] %vm172_vm0, %v1292_v0  ;;  %v610_v15 = vld [vmem:[#allocation2 + $0x30] sm:$0xf]  ;;  %v330_v16 = vrot.slane %v1533_v60, 4  ;;  %v366_v17 = vshrl.u32 %v1545_v4, 16  ;;  %v337_v22 = vor.u32 %v335_v61, %v1541_v2  ;;  %v345_v27 = vor.u32 %v343_v3, %v1551_v7 }
  0x21   : > { %205 = vst.msk [vmem:[#allocation2 + $0x7c] sm:$0xf] %vm172_vm0, %v1292_v0  ;;  %v1568_v18 = vld [vmem:[%s1394_s23 + $0x34] sm:$0xf]  ;;  %v617_v23 = vld [vmem:[#allocation2 + $0x3c] sm:$0xf]  ;;  %v611_v41 = vsel %vm1485_vm5, %v320_v14, %v610_v15  ;;  %v329_v42 = vsel %vm1505_vm6, %v321_v59, %v328_v21 }
  0x22   : > { %207 = vst.msk [vmem:[#allocation2 + $0x84] sm:$0xf] %vm172_vm0, %v1292_v0  ;;  %v1577_v24 = vld [vmem:[%s1394_s23 + $0x38] sm:$0xf]  ;;  %v1580_v25 = vld [vmem:[%s1394_s23 + $0x3c] sm:$0xf]  ;;  %v618_v47 = vsel %vm1485_vm5, %v337_v22, %v617_v23 }
  0x23   : > { %208 = vst.msk [vmem:[#allocation2 + $0x88] sm:$0xf] %vm172_vm0, %v1292_v0  ;;  %v338_v26 = vrot.slane %v1541_v2, 4  ;;  %v359_v28 = vrot.slane %v357_v8, 7  ;;  %v360_v29 = vshll.u32 %v1527_v57, 16  ;;  %v347_v32 = vrot.slane %v1551_v7, 4 }
  0x24   : > { %210 = vst.msk [vmem:[#allocation2 + $0x90] sm:$0xf] %vm172_vm0, %v1292_v0  ;;  %v374_v36 = vshrl.u32 %v1568_v18, 16  ;;  %v1591_v37 = vrot.slane %v366_v17, 7  ;;  %v369_v38 = vshll.u32 %v1545_v4, 16  ;;  %v383_v39 = vshrl.u32 %v1577_v24, 16 }
  0x25   : > { %211 = vst.msk [vmem:[#allocation2 + $0x94] sm:$0xf] %vm172_vm0, %v1292_v0  ;;  %v1601_v45 = vld [vmem:[%s1394_s23 + $0x40] sm:$0xf]  ;;  %v355_v48 = vrot.slane %v1558_v12, 4  ;;  %v362_v49 = vor.u32 %v360_v29, %v359_v28  ;;  %v377_v55 = vshll.u32 %v1568_v18, 16  ;;  %v346_v57 = vsel %vm1505_vm6, %v338_v26, %v345_v27 }
  0x26   : > { %213 = vst.msk [vmem:[#allocation2 + $0x9c] sm:$0xf] %vm172_vm0, %v1292_v0  ;;  %v376_v54 = vrot.slane %v374_v36, 7  ;;  %v386_v56 = vshll.u32 %v1577_v24, 16  ;;  %v631_v59 = vld [vmem:[#allocation2 + $0x54] sm:$0xf] }
  0x27   : > { %214 = vst.msk [vmem:[#allocation2 + $0xa0] sm:$0xf] %vm172_vm0, %v1292_v0  ;;  %v400_v60 = vshrl.u32 %v1601_v45, 16  ;;  %v385_v2 = vrot.slane %v383_v39, 7  ;;  %v394_v4 = vshll.u32 %v1580_v25, 16 }
  0x28   : > { %216 = vst.msk [vmem:[#allocation2 + $0xa8] sm:$0xf] %vm172_vm0, %v1292_v0  ;;  %v638_v14 = vld [vmem:[#allocation2 + $0x60] sm:$0xf]  ;;  %v248_v24 = vld [vmem:[%s1394_s23 + $0x50] sm:$0xf] }
  0x29   : > { %217 = vst.msk [vmem:[#allocation2 + $0xac] sm:$0xf] %vm172_vm0, %v1292_v0  ;;  %v402_v15 = vrot.slane %v400_v60, 7  ;;  %v389_v21 = vrot.slane %v385_v2, 4  ;;  %v645_v36 = vld [vmem:[#allocation2 + $0x6c] sm:$0xf] }
  0x2a   : > { %219 = vst.msk [vmem:[#allocation2 + $0xb4] sm:$0xf] %vm172_vm0, %v1292_v0 }
  0x2b   : > { %220 = vst.msk [vmem:[#allocation2 + $0xb8] sm:$0xf] %vm172_vm0, %v1292_v0 }
  0x2c   : > { %222 = vst.msk [vmem:[#allocation2 + $0xc0] sm:$0xf] %vm172_vm0, %v1292_v0 }
  0x2d   : > { %223 = vst.msk [vmem:[#allocation2 + $0xc4] sm:$0xf] %vm172_vm0, %v1292_v0 }
  0x2e   : > { %225 = vst.msk [vmem:[#allocation2 + $0xcc] sm:$0xf] %vm172_vm0, %v1292_v0 }
  0x2f   : > { %226 = vst.msk [vmem:[#allocation2 + $0xd0] sm:$0xf] %vm172_vm0, %v1292_v0 }
  0x30   : > { %179 = vst.msk [vmem:[#allocation2 + $0x14] sm:$0x1] %vm175_vm1, %v1292_v0 }
  0x31   : > { %176 = vst.msk [vmem:[#allocation2 + $0x8] sm:$0x1] %vm175_vm1, %v1292_v0 }
  0x32   : > { %182 = vst.msk [vmem:[#allocation2 + $0x20] sm:$0x1] %vm175_vm1, %v1292_v0 }
  0x33   : > { %185 = vst.msk [vmem:[#allocation2 + $0x2c] sm:$0x1] %vm175_vm1, %v1292_v0 }
  0x34   : > { %188 = vst.msk [vmem:[#allocation2 + $0x38] sm:$0x1] %vm175_vm1, %v1292_v0 }
  0x35   : > { %191 = vst.msk [vmem:[#allocation2 + $0x44] sm:$0x1] %vm175_vm1, %v1292_v0 }
  0x36   : > { %194 = vst.msk [vmem:[#allocation2 + $0x50] sm:$0x1] %vm175_vm1, %v1292_v0 }
  0x37   : > { %197 = vst.msk [vmem:[#allocation2 + $0x5c] sm:$0x1] %vm175_vm1, %v1292_v0  ;;  %v593_v52 = vld [vmem:[#allocation2 + $0x14] sm:$0x1] }
  0x38   : > { %200 = vst.msk [vmem:[#allocation2 + $0x68] sm:$0x1] %vm175_vm1, %v1292_v0  ;;  %v594_v5 = vsel %vm1519_vm7, %v279_v20, %v593_v52  ;;  %v312_v20 = vsel %vm1505_vm6, %v304_v46, %v311_v63  ;;  %v1604_v46 = vld [vmem:[%s1394_s23 + $0x44] sm:$0xf]  ;;  %v371_v63 = vor.u32 %v369_v38, %v1591_v37 }
  0x39   : > { %203 = vst.msk [vmem:[#allocation2 + $0x74] sm:$0x1] %vm175_vm1, %v1292_v0  ;;  %v600_v6 = vld [vmem:[#allocation2 + $0x20] sm:$0x1]  ;;  %v408_v61 = vshrl.u32 %v1604_v46, 16  ;;  %v411_v18 = vshll.u32 %v1604_v46, 16 }
  0x3a   : > { %206 = vst.msk [vmem:[#allocation2 + $0x80] sm:$0x1] %vm175_vm1, %v1292_v0  ;;  %v607_v11 = vld [vmem:[#allocation2 + $0x2c] sm:$0x1]  ;;  %v601_v19 = vsel %vm1519_vm7, %v296_v40, %v600_v6  ;;  %v391_v40 = vshrl.u32 %v1580_v25, 16  ;;  %v363_v6 = vsel %vm1505_vm6, %v355_v48, %v362_v49  ;;  %v437_v46 = vshll.u32 %v248_v24, 16 }
  0x3b   : > { %209 = vst.msk [vmem:[#allocation2 + $0x8c] sm:$0x1] %vm175_vm1, %v1292_v0  ;;  %v608_v30 = vsel %vm1519_vm7, %v313_v58, %v607_v11  ;;  %v614_v31 = vld [vmem:[#allocation2 + $0x38] sm:$0x1]  ;;  %v372_v11 = vrot.slane %v1591_v37, 4  ;;  %v410_v17 = vrot.slane %v408_v61, 7 }
  0x3c   : > { %212 = vst.msk [vmem:[#allocation2 + $0x98] sm:$0x1] %vm175_vm1, %v1292_v0  ;;  %v621_v43 = vld [vmem:[#allocation2 + $0x44] sm:$0x1]  ;;  %v615_v53 = vsel %vm1519_vm7, %v330_v16, %v614_v31  ;;  %v393_v3 = vrot.slane %v391_v40, 7  ;;  %v403_v16 = vshll.u32 %v1601_v45, 16 }
  0x3d   : > { %215 = vst.msk [vmem:[#allocation2 + $0xa4] sm:$0x1] %vm175_vm1, %v1292_v0  ;;  %v628_v52 = vld [vmem:[#allocation2 + $0x50] sm:$0x1]  ;;  %v406_v37 = vrot.slane %v402_v15, 4  ;;  %v413_v38 = vor.u32 %v411_v18, %v410_v17  ;;  %v415_v48 = vrot.slane %v410_v17, 4 }
  0x3e   : > { %218 = vst.msk [vmem:[#allocation2 + $0xb0] sm:$0x1] %vm175_vm1, %v1292_v0  ;;  %v635_v8 = vld [vmem:[#allocation2 + $0x5c] sm:$0x1]  ;;  %v396_v22 = vor.u32 %v394_v4, %v393_v3  ;;  %v398_v25 = vrot.slane %v393_v3, 4 }
  0x3f   : > { %221 = vst.msk [vmem:[#allocation2 + $0xbc] sm:$0x1] %vm175_vm1, %v1292_v0  ;;  %v642_v23 = vld [vmem:[#allocation2 + $0x68] sm:$0x1]  ;;  %v251_v61 = vld [vmem:[%s1394_s23 + $0x5c] sm:$0xf] }
  0x40   : > { %224 = vst.msk [vmem:[#allocation2 + $0xc8] sm:$0x1] %vm175_vm1, %v1292_v0  ;;  %v459_v3 = vshrl.u32 %v251_v61, 16 }
  0x41   : > { %227 = vst.msk [vmem:[#allocation2 + $0xd4] sm:$0x1] %vm175_vm1, %v1292_v0  ;;  %v352_v0 = vshll.u32 %v1479_v34, 16  ;;  %v624_v34 = vld [vmem:[#allocation2 + $0x48] sm:$0xf] }
  0x42   : > { %589 = vst [vmem:[#allocation2 + $0xc] sm:$0xf] %v588_v50  ;;  %v364_v50 = vrot.slane %v359_v28, 4  ;;  %v434_v28 = vshrl.u32 %v248_v24, 16 }
  0x43   : > { %590 = vst.msk [vmem:[#allocation2 + $0x10] sm:$0xf] %vm172_vm0, %v278_v62  ;;  %v354_v33 = vor.u32 %v352_v0, %v1558_v12  ;;  %v246_v62 = vld [vmem:[%s1394_s23 + $0x48] sm:$0xf]  ;;  %v379_v12 = vor.u32 %v377_v55, %v376_v54  ;;  %v381_v0 = vrot.slane %v376_v54, 4 }
  0x44   : > { %595 = vst [vmem:[#allocation2 + $0x14] sm:$0x1] %v594_v5  ;;  %v622_v5 = vsel %vm1519_vm7, %v347_v32, %v621_v43  ;;  %v629_v7 = vsel %vm1519_vm7, %v364_v50, %v628_v52  ;;  %v420_v27 = vshll.u32 %v246_v62, 16  ;;  %v652_v43 = vld [vmem:[#allocation2 + $0x78] sm:$0xf]  ;;  %v436_v45 = vrot.slane %v434_v28, 7 }
  0x45   : > { %598 = vst [vmem:[#allocation2 + $0x18] sm:$0xf] %v597_v9  ;;  %v625_v58 = vsel %vm1485_vm5, %v354_v33, %v624_v34  ;;  %v417_v9 = vshrl.u32 %v246_v62, 16  ;;  %v380_v29 = vsel %vm1505_vm6, %v372_v11, %v379_v12  ;;  %v249_v33 = vld [vmem:[%s1394_s23 + $0x54] sm:$0xf]  ;;  %v405_v34 = vor.u32 %v403_v16, %v402_v15 }
  0x46   : > { %599 = vst.msk [vmem:[#allocation2 + $0x1c] sm:$0xf] %vm172_vm0, %v295_v10  ;;  %v247_v10 = vld [vmem:[%s1394_s23 + $0x4c] sm:$0xf]  ;;  %v442_v39 = vshrl.u32 %v249_v33, 16  ;;  %v445_v55 = vshll.u32 %v249_v33, 16 }
  0x47   : > { %602 = vst [vmem:[#allocation2 + $0x20] sm:$0x1] %v601_v19  ;;  %v632_v19 = vsel %vm1485_vm5, %v371_v63, %v631_v59  ;;  %v419_v26 = vrot.slane %v417_v9, 7  ;;  %v428_v32 = vshll.u32 %v247_v10, 16  ;;  %v250_v52 = vld [vmem:[%s1394_s23 + $0x58] sm:$0xf]  ;;  %v439_v63 = vor.u32 %v437_v46, %v436_v45 }
  0x48   : > { %605 = vst [vmem:[#allocation2 + $0x24] sm:$0xf] %v604_v13  ;;  %v425_v13 = vshrl.u32 %v247_v10, 16  ;;  %v444_v54 = vrot.slane %v442_v39, 7  ;;  %v656_v59 = vld [vmem:[#allocation2 + $0x80] sm:$0x1] }
  0x49   : > { %606 = vst.msk [vmem:[#allocation2 + $0x28] sm:$0xf] %vm172_vm0, %v312_v20  ;;  %v388_v20 = vor.u32 %v386_v56, %v385_v2  ;;  %v422_v49 = vor.u32 %v420_v27, %v419_v26  ;;  %v423_v50 = vrot.slane %v419_v26, 4  ;;  %v451_v56 = vshrl.u32 %v250_v52, 16  ;;  %v663_v12 = vld [vmem:[#allocation2 + $0x8c] sm:$0x1] }
  0x4a   : > { %609 = vst [vmem:[#allocation2 + $0x2c] sm:$0x1] %v608_v30  ;;  %v636_v30 = vsel %vm1519_vm7, %v381_v0, %v635_v8  ;;  %v427_v31 = vrot.slane %v425_v13, 7  ;;  %v454_v60 = vshll.u32 %v250_v52, 16  ;;  %v440_v9 = vrot.slane %v436_v45, 4 }
  0x4b   : > { %612 = vst [vmem:[#allocation2 + $0x30] sm:$0xf] %v611_v41  ;;  %v639_v40 = vsel %vm1485_vm5, %v388_v20, %v638_v14  ;;  %v397_v41 = vsel %vm1505_vm6, %v389_v21, %v396_v22  ;;  %v453_v2 = vrot.slane %v451_v56, 7  ;;  %v447_v10 = vor.u32 %v445_v55, %v444_v54  ;;  %v666_v0 = vld [vmem:[#allocation2 + $0x90] sm:$0xf] }
  0x4c   : > { %613 = vst.msk [vmem:[#allocation2 + $0x34] sm:$0xf] %vm172_vm0, %v329_v42  ;;  %v649_v42 = vld [vmem:[#allocation2 + $0x74] sm:$0x1]  ;;  %v432_v62 = vrot.slane %v427_v31, 4  ;;  %v449_v11 = vrot.slane %v444_v54, 4 }
  0x4d   : > { %616 = vst [vmem:[#allocation2 + $0x38] sm:$0x1] %v615_v53  ;;  %v430_v53 = vor.u32 %v428_v32, %v427_v31  ;;  %v650_v4 = vsel %vm1519_vm7, %v415_v48, %v649_v42  ;;  %v252_v13 = vld [vmem:[%s1394_s23 + $0x60] sm:$0xf]  ;;  %v456_v14 = vor.u32 %v454_v60, %v453_v2  ;;  %v461_v15 = vrot.slane %v459_v3, 7 }
  0x4e   : > { %619 = vst [vmem:[#allocation2 + $0x3c] sm:$0xf] %v618_v47  ;;  %v643_v47 = vsel %vm1519_vm7, %v398_v25, %v642_v23  ;;  %v468_v16 = vshrl.u32 %v252_v13, 16  ;;  %v471_v17 = vshll.u32 %v252_v13, 16  ;;  %v657_v18 = vsel %vm1519_vm7, %v432_v62, %v656_v59  ;;  %v253_v21 = vld [vmem:[%s1394_s23 + $0x64] sm:$0xf] }
  0x4f   : > { %620 = vst.msk [vmem:[#allocation2 + $0x40] sm:$0xf] %vm172_vm0, %v346_v57  ;;  %v646_v57 = vsel %vm1485_vm5, %v405_v34, %v645_v36  ;;  %v431_v8 = vsel %vm1505_vm6, %v423_v50, %v430_v53  ;;  %v457_v20 = vrot.slane %v453_v2, 4  ;;  %v466_v23 = vrot.slane %v461_v15, 4  ;;  %v670_v27 = vld [vmem:[#allocation2 + $0x98] sm:$0x1] }
  0x50   : > { %623 = vst [vmem:[#allocation2 + $0x44] sm:$0x1] %v622_v5  ;;  %v653_v5 = vsel %vm1485_vm5, %v422_v49, %v652_v43  ;;  %v470_v24 = vrot.slane %v468_v16, 7  ;;  %v476_v25 = vshrl.u32 %v253_v21, 16  ;;  %v448_v26 = vsel %vm1505_vm6, %v440_v9, %v447_v10  ;;  %v673_v32 = vld [vmem:[#allocation2 + $0x9c] sm:$0xf] }
  0x51   : > { %626 = vst [vmem:[#allocation2 + $0x48] sm:$0xf] %v625_v58  ;;  %v414_v58 = vsel %vm1505_vm6, %v406_v37, %v413_v38  ;;  %v479_v28 = vshll.u32 %v253_v21, 16  ;;  %v254_v33 = vld [vmem:[%s1394_s23 + $0x68] sm:$0xf] }
  0x52   : > { %627 = vst.msk [vmem:[#allocation2 + $0x4c] sm:$0xf] %vm172_vm0, %v363_v6  ;;  %v659_v6 = vld [vmem:[#allocation2 + $0x84] sm:$0xf]  ;;  %v473_v31 = vor.u32 %v471_v17, %v470_v24  ;;  %v474_v34 = vrot.slane %v470_v24, 4  ;;  %v478_v36 = vrot.slane %v476_v25, 7 }
  0x53   : > { %630 = vst [vmem:[#allocation2 + $0x50] sm:$0x1] %v629_v7  ;;  %v462_v7 = vshll.u32 %v251_v61, 16  ;;  %v485_v37 = vshrl.u32 %v254_v33, 16  ;;  %v488_v38 = vshll.u32 %v254_v33, 16 }
  0x54   : > { %633 = vst [vmem:[#allocation2 + $0x54] sm:$0xf] %v632_v19  ;;  %v660_v19 = vsel %vm1485_vm5, %v439_v63, %v659_v6  ;;  %v255_v42 = vld [vmem:[%s1394_s23 + $0x6c] sm:$0xf]  ;;  %v481_v43 = vor.u32 %v479_v28, %v478_v36  ;;  %v483_v45 = vrot.slane %v478_v36, 4  ;;  %v674_v48 = vsel %vm1485_vm5, %v473_v31, %v673_v32 }
  0x55   : > { %634 = vst.msk [vmem:[#allocation2 + $0x58] sm:$0xf] %vm172_vm0, %v380_v29  ;;  %v464_v22 = vor.u32 %v462_v7, %v461_v15  ;;  %v664_v29 = vsel %vm1519_vm7, %v449_v11, %v663_v12  ;;  %v487_v46 = vrot.slane %v485_v37, 7  ;;  %v680_v49 = vld [vmem:[#allocation2 + $0xa8] sm:$0xf]  ;;  %v496_v50 = vshll.u32 %v255_v42, 16 }
  0x56   : > { %637 = vst [vmem:[#allocation2 + $0x5c] sm:$0x1] %v636_v30  ;;  %v667_v30 = vsel %vm1485_vm5, %v456_v14, %v666_v0  ;;  %v482_v52 = vsel %vm1505_vm6, %v474_v34, %v481_v43  ;;  %v256_v55 = vld [vmem:[%s1394_s23 + $0x70] sm:$0xf]  ;;  %v257_v62 = vld [vmem:[%s1394_s23 + $0x74] sm:$0xf] }
  0x57   : > { %640 = vst [vmem:[#allocation2 + $0x60] sm:$0xf] %v639_v40  ;;  %v465_v39 = vsel %vm1505_vm6, %v457_v20, %v464_v22  ;;  %v671_v40 = vsel %vm1519_vm7, %v466_v23, %v670_v27  ;;  %v490_v54 = vor.u32 %v488_v38, %v487_v46  ;;  %v491_v56 = vrot.slane %v487_v46, 4  ;;  %v684_v61 = vld [vmem:[#allocation2 + $0xb0] sm:$0x1] }
  0x58   : > { %641 = vst.msk [vmem:[#allocation2 + $0x64] sm:$0xf] %vm172_vm0, %v397_v41  ;;  %v677_v41 = vld [vmem:[#allocation2 + $0xa4] sm:$0x1]  ;;  %v505_v59 = vshll.u32 %v256_v55, 16  ;;  %v513_v6 = vshll.u32 %v257_v62, 16 }
  0x59   : > { %644 = vst [vmem:[#allocation2 + $0x68] sm:$0x1] %v643_v47  ;;  %v493_v47 = vshrl.u32 %v255_v42, 16  ;;  %v678_v53 = vsel %vm1519_vm7, %v483_v45, %v677_v41  ;;  %v681_v60 = vsel %vm1485_vm5, %v490_v54, %v680_v49  ;;  %v258_v10 = vld [vmem:[%s1394_s23 + $0x78] sm:$0xf] }
  0x5a   : > { %647 = vst [vmem:[#allocation2 + $0x6c] sm:$0xf] %v646_v57  ;;  %v519_v0 = vshrl.u32 %v258_v10, 16  ;;  %v522_v13 = vshll.u32 %v258_v10, 16  ;;  %v691_v15 = vld [vmem:[#allocation2 + $0xbc] sm:$0x1] }
  0x5b   : > { %648 = vst.msk [vmem:[#allocation2 + $0x70] sm:$0xf] %vm172_vm0, %v414_v58  ;;  %v495_v57 = vrot.slane %v493_v47, 7  ;;  %v502_v58 = vshrl.u32 %v256_v55, 16  ;;  %v259_v16 = vld [vmem:[%s1394_s23 + $0x7c] sm:$0xf] }
  0x5c   : > { %651 = vst [vmem:[#allocation2 + $0x74] sm:$0x1] %v650_v4  ;;  %v510_v4 = vshrl.u32 %v257_v62, 16  ;;  %v527_v20 = vshrl.u32 %v259_v16, 16  ;;  %v694_v21 = vld [vmem:[#allocation2 + $0xc0] sm:$0xf] }
  0x5d   : > { %654 = vst [vmem:[#allocation2 + $0x78] sm:$0xf] %v653_v5  ;;  %v498_v63 = vor.u32 %v496_v50, %v495_v57  ;;  %v500_v2 = vrot.slane %v495_v57, 4  ;;  %v504_v3 = vrot.slane %v502_v58, 7  ;;  %v687_v5 = vld [vmem:[#allocation2 + $0xb4] sm:$0xf] }
  0x5e   : > { %655 = vst.msk [vmem:[#allocation2 + $0x7c] sm:$0xf] %vm172_vm0, %v431_v8  ;;  %v512_v12 = vrot.slane %v510_v4, 7  ;;  %v530_v22 = vshll.u32 %v259_v16, 16  ;;  %v529_v27 = vrot.slane %v527_v20, 7 }
  0x5f   : > { %658 = vst [vmem:[#allocation2 + $0x80] sm:$0x1] %v657_v18  ;;  %v499_v7 = vsel %vm1505_vm6, %v491_v56, %v498_v63  ;;  %v685_v8 = vsel %vm1519_vm7, %v500_v2, %v684_v61  ;;  %v507_v9 = vor.u32 %v505_v59, %v504_v3  ;;  %v508_v11 = vrot.slane %v504_v3, 4 }
  0x60   : > { %661 = vst [vmem:[#allocation2 + $0x84] sm:$0xf] %v660_v19  ;;  %v515_v17 = vor.u32 %v513_v6, %v512_v12  ;;  %v517_v18 = vrot.slane %v512_v12, 4  ;;  %v521_v19 = vrot.slane %v519_v0, 7  ;;  %v534_v31 = vrot.slane %v529_v27, 4 }
  0x61   : > { %662 = vst.msk [vmem:[#allocation2 + $0x88] sm:$0xf] %vm172_vm0, %v448_v26  ;;  %v688_v14 = vsel %vm1485_vm5, %v507_v9, %v687_v5 }
  0x62   : > { %665 = vst [vmem:[#allocation2 + $0x8c] sm:$0x1] %v664_v29  ;;  %v516_v23 = vsel %vm1505_vm6, %v508_v11, %v515_v17  ;;  %v692_v24 = vsel %vm1519_vm7, %v517_v18, %v691_v15  ;;  %v524_v25 = vor.u32 %v522_v13, %v521_v19  ;;  %v525_v26 = vrot.slane %v521_v19, 4  ;;  %v698_v29 = vld [vmem:[#allocation2 + $0xc8] sm:$0x1] }
  0x63   : > { %668 = vst [vmem:[#allocation2 + $0x90] sm:$0xf] %v667_v30  ;;  %v532_v30 = vor.u32 %v530_v22, %v529_v27  ;;  %v699_v33 = vsel %vm1519_vm7, %v534_v31, %v698_v29 }
  0x64   : > { %669 = vst.msk [vmem:[#allocation2 + $0x94] sm:$0xf] %vm172_vm0, %v465_v39  ;;  %v695_v28 = vsel %vm1485_vm5, %v524_v25, %v694_v21 }
  0x65   : > { %672 = vst [vmem:[#allocation2 + $0x98] sm:$0x1] %v671_v40  ;;  %v533_v32 = vsel %vm1505_vm6, %v525_v26, %v532_v30 }
  0x66   : > { %675 = vst [vmem:[#allocation2 + $0x9c] sm:$0xf] %v674_v48 }
  0x67   : > { %676 = vst.msk [vmem:[#allocation2 + $0xa0] sm:$0xf] %vm172_vm0, %v482_v52 }
  0x68   : > { %679 = vst [vmem:[#allocation2 + $0xa4] sm:$0x1] %v678_v53 }
  0x69   : > { %682 = vst [vmem:[#allocation2 + $0xa8] sm:$0xf] %v681_v60 }
  0x6a   : > { %683 = vst.msk [vmem:[#allocation2 + $0xac] sm:$0xf] %vm172_vm0, %v499_v7 }
  0x6b   : > { %686 = vst [vmem:[#allocation2 + $0xb0] sm:$0x1] %v685_v8 }
  0x6c   : > { %689 = vst [vmem:[#allocation2 + $0xb4] sm:$0xf] %v688_v14 }
  0x6d   : > { %690 = vst.msk [vmem:[#allocation2 + $0xb8] sm:$0xf] %vm172_vm0, %v516_v23 }
  0x6e   : > { %693 = vst [vmem:[#allocation2 + $0xbc] sm:$0x1] %v692_v24 }
  0x6f   : > { %696 = vst [vmem:[#allocation2 + $0xc0] sm:$0xf] %v695_v28 }
  0x70   : > { %697 = vst.msk [vmem:[#allocation2 + $0xc4] sm:$0xf] %vm172_vm0, %v533_v32 }
  0x71   : > { %700 = vst [vmem:[#allocation2 + $0xc8] sm:$0x1] %v699_v33 }
  0x72 LB: >> { %vm759_vm8 = vcmask 1043456   ;;  %v1210_v35 = vld [vmem:[%s1835_s1 + $0xc] sm:$0xf]  ;;  %v731_v44 = vld [vmem:[%s1835_s1] sm:$0xf]  ;;  %s1238_s4 = smul.u32 12, %s1290_s24  ;;  %s1290_s24 = sphi %s1718_s24, %s707_s24  }
  0x73   : >> { %v838_v51 = vsel %vm759_vm8, %v1210_v35, 0  ;;  %v780_v34 = vsel %vm759_vm8, %v731_v44, 0  ;;  %v1208_v36 = vld [vmem:[%s1835_s1 + $0x8] sm:$0xf]  ;;  %v1205_v38 = vld [vmem:[%s1835_s1 + $0x4] sm:$0xf] }
  0x74   : >> { %847 = vmatpush.bf16.msra.mxu3 %v838_v51  ;;  %789 = vmatpush.bf16.msra.mxu1 %v780_v34  ;;  %v809_v37 = vsel %vm759_vm8, %v1208_v36, 0  ;;  %v1219_v39 = vld [vmem:[%s1835_s1 + $0x1c] sm:$0xf]  ;;  %vm755_vm9 = vcmask 64512   ;;  %v761_v40 = vsel %vm759_vm8, %v1205_v38, 0  ;;  %s1754_s16 = scalar_lea.vmem [#allocation2], %s1238_s4 }
  0x75   : >> { %818 = vmatpush.bf16.msra.mxu2 %v809_v37  ;;  %v970_v41 = vsel %vm759_vm8, %v1219_v39, 0  ;;  %v1212_v42 = vld [vmem:[%s1835_s1 + $0x10] sm:$0xf]  ;;  %770 = vmatpush.bf16.msra.mxu0 %v761_v40  ;;  %v1218_v45 = vld [vmem:[%s1835_s1 + $0x18] sm:$0xf]  ;;  %vm801_vm10 = vcmask 1046528  }
  0x76   : >> { %v876_v43 = vsel %vm759_vm8, %v1212_v42, 0  ;;  %v1214_v46 = vld [vmem:[%s1835_s1 + $0x14] sm:$0xf]  ;;  %v989_v52 = vsel %vm759_vm8, %v1218_v45, 0  ;;  %v1226_v3 = vld [vmem:[%s1835_s1 + $0x28] sm:$0xf] }
  0x77   : >> { %v906_v53 = vsel %vm759_vm8, %v1214_v46, 0  ;;  %v1222_v8 = vld [vmem:[%s1835_s1 + $0x20] sm:$0xf]  ;;  %v1228_v11 = vld [vmem:[%s1835_s1 + $0x2c] sm:$0xf]  ;;  %v1059_v14 = vsel %vm759_vm8, %v1226_v3, 0 }
  0x78   : >> { %v1757_v47 = vld [vmem:[%s1754_s16] sm:$0xff]   ;;  %v1760_v48 = vld [vmem:[%s1754_s16 + $0xc] sm:$0xff]   ;;  %v1199_v50 = vld [vmem:[%s1754_s16 + $0x14] sm:$0x1]  ;;  %915 = vmatpush.bf16.msrb.mxu1 %v906_v53  ;;  %998 = vmatpush.bf16.msrb.mxu3 %v989_v52  ;;  %vm742_vm11 = vsmask.f32 7424 }
  0x79   : >> { %979 = vmatpush.bf16.msrb.mxu2 %v970_v41  ;;  %v1273_v49 = vld [vmem:[%s1754_s16 + $0xc] sm:$0xf0]  ;;  %885 = vmatpush.bf16.msrb.mxu0 %v876_v43  ;;  %v1274_v54 = vld [vmem:[%s1754_s16 + $0xc] sm:$0xe]  ;;  %v739_v55 = vunpack.c.l.b16 %v1199_v50  ;;  %v713_v56 = vld [vmem:[%s1754_s16 + $0x8] sm:$0x1] }
  0x7a   : >> { %1211 = vmatmul.msk.bf16.vlgmr.msra.gmra.mxu3 %vm755_vm9, %v1757_v47  ;;  %v1275_v58 = vor.u32 %v1274_v54, %v1273_v49  ;;  %v1250_v59 = vld [vmem:[%s1754_s16] sm:$0xf0]  ;;  %v1203_v60 = vld [vmem:[%s1754_s16 + $0x20] sm:$0x1]  ;;  %1207 = vmatmul.msk.bf16.vlgmr.msra.gmra.mxu1 %vm755_vm9, %v1760_v48  ;;  %v744_v61 = vshrl.u32 %v1760_v48, 16  ;;  %v746_v62 = vshll.u32 %v1760_v48, 16  ;;  %v859_v2 = vunpack.c.l.b16 %v713_v56 }
  0x7b   : >> { %v741_v57 = vpack.c.b16 %v739_v55, %v739_v55  ;;  %v1251_v63 = vld [vmem:[%s1754_s16] sm:$0xe]  ;;  %v1249_v7 = vld [vmem:[%s1754_s16 + $0x18] sm:$0xff]   ;;  %v951_v10 = vunpack.c.l.b16 %v1203_v60  ;;  %v1224_v12 = vld [vmem:[%s1835_s1 + $0x24] sm:$0xf]  ;;  %v1017_v20 = vsel %vm759_vm8, %v1222_v8, 0 }
  0x7c   : >> { %v802_v4 = vrot.slane %v1275_v58, 1  ;;  %v748_v9 = vrot.slane %v746_v62, 1  ;;  %v957_v16 = vshll.u32 %v1249_v7, 16  ;;  %v860_v17 = vpack.c.b16 %v859_v2, %v859_v2  ;;  %v1253_v38 = vld [vmem:[%s1754_s16 + $0x18] sm:$0xf0]  ;;  %s1239_s27 = sshll.u32 %s1290_s24, 4 }
  0x7d   : >> { %v803_v5 = vrot.slane %v741_v57, 1  ;;  %v751_v6 = vshll.u32 %v741_v57, 16  ;;  %v1252_v18 = vor.u32 %v1251_v63, %v1250_v59  ;;  %v953_v19 = vpack.c.b16 %v951_v10, %v951_v10  ;;  %v1254_v39 = vld [vmem:[%s1754_s16 + $0x18] sm:$0xe]  ;;  %s1818_s28 = scalar_lea.vmem %s1337_s17, %s1239_s27  ;;  %s707_s24 = sadd.s32 1, %s1290_s24  }
  0x7e   : >> { %v749_v15 = vor.u32 %v748_v9, %v744_v61  ;;  %v1080_v21 = vsel %vm759_vm8, %v1228_v11, 0  ;;  %v1038_v22 = vsel %vm759_vm8, %v1224_v12, 0  ;;  %v863_v24 = vshll.u32 %v1757_v47, 16  ;;  %p704_p4 = scmp.ge.s32.totalorder %s707_s24, 16  }
  0x7f   : >> { %v804_v0 = vsel %vm801_vm10, %v802_v4, %v803_v5  ;;  %v753_v13 = vrot.slane %v751_v6, 1  ;;  %1089 = vmatpush.bf16.msra.mxu3 %v1080_v21  ;;  %1047 = vmatpush.bf16.msra.mxu1 %v1038_v22  ;;  %v955_v25 = vshrl.u32 %v1249_v7, 16  ;;  %v959_v26 = vrot.slane %v957_v16, 1 }
  0x80   : >> { %1209 = vmatmul.msk.bf16.vlgmr.msra.gmra.mxu2 %vm755_vm9, %v804_v0  ;;  %v899_v27 = vrot.slane %v1252_v18, 1  ;;  %v900_v28 = vrot.slane %v860_v17, 1  ;;  %v962_v29 = vshll.u32 %v953_v19, 16  ;;  %v861_v30 = vshrl.u32 %v1757_v47, 16 }
  0x81   : >> { %1068 = vmatpush.bf16.msra.mxu2 %v1059_v14  ;;  %v754_v23 = vsel %vm742_vm11, %v749_v15, %v753_v13  ;;  %v865_v31 = vrot.slane %v863_v24, 1  ;;  %v868_v32 = vshll.u32 %v860_v17, 16  ;;  %v960_v33 = vor.u32 %v959_v26, %v955_v25 }
  0x82   : >> { %1206 = vmatmul.msk.bf16.vlgmr.msra.gmra.mxu0 %vm755_vm9, %v754_v23  ;;  %v901_v35 = vsel %vm801_vm10, %v899_v27, %v900_v28  ;;  %v964_v44 = vrot.slane %v962_v29, 1  ;;  %v1255_v40 = vor.u32 %v1254_v39, %v1253_v38  ;;  %v1011_v42 = vrot.slane %v953_v19, 1 }
  0x83   : >> { %1026 = vmatpush.bf16.msra.mxu0 %v1017_v20  ;;  %v866_v51 = vor.u32 %v865_v31, %v861_v30  ;;  %v870_v34 = vrot.slane %v868_v32, 1  ;;  %v925_v62 = vperm.slane %v1376_v1, 0 }
  0x84   : >> { %v965_v36 = vsel %vm742_vm11, %v960_v33, %v964_v44  ;;  %v1010_v41 = vrot.slane %v1255_v40, 1 }
  0x85   : >> { %v871_v37 = vsel %vm742_vm11, %v866_v51, %v870_v34 }
  0x86   : >> { %v1012_v43 = vsel %vm801_vm10, %v1010_v41, %v1011_v42 }
  0x8a   : >> { %1221 = vmatmul.msk.bf16.vlgmr.msrb.gmra.mxu3 %vm755_vm9, %v1249_v7  ;;  %1215 = vmatmul.msk.bf16.vlgmr.msrb.gmra.mxu1 %vm755_vm9, %v901_v35 }
  0x90   : >> { %1220 = vmatmul.msk.bf16.vlgmr.msrb.gmra.mxu2 %vm755_vm9, %v965_v36 }
  0x92   : >> { %1213 = vmatmul.msk.bf16.vlgmr.msrb.gmra.mxu0 %vm755_vm9, %v871_v37 }
  0x9a   : >> { %1229 = vmatmul.msk.bf16.vlgmr.msra.gmra.mxu3 %vm755_vm9, %v804_v0  ;;  %1225 = vmatmul.msk.bf16.vlgmr.msra.gmra.mxu1 %vm755_vm9, %v1760_v48 }
  0xa0   : >> { %1227 = vmatmul.msk.bf16.vlgmr.msra.gmra.mxu2 %vm755_vm9, %v754_v23 }
  0xa2   : >> { %1223 = vmatmul.msk.bf16.vlgmr.msra.gmra.mxu0 %vm755_vm9, %v1012_v43 }
  0xf7   : >> { %v791_v45 = vpop.f32.mrf.mxu1 }
  0xfd   : >> { %v849_v46 = vpop.f32.mrf.mxu3 }
  0xff   : >> { %v772_v47 = vpop.f32.mrf.mxu0  ;;  %v793_v49 = vpop.f32.mrf.mxu1 }
 0x100   : >> { %v792_v53 = vadd.f32 %v791_v45, %v772_v47 }
 0x103   : >> { %v820_v50 = vpop.f32.mrf.mxu2 }
 0x104   : >> { %v825_v55 = vadd.f32 %v820_v50, %v792_v53 }
 0x105   : >> { %v851_v52 = vpop.f32.mrf.mxu3 }
 0x106   : >> { %v854_v58 = vadd.f32 %v849_v46, %v825_v55 }
 0x107   : >> { %v774_v54 = vpop.f32.mrf.mxu0  ;;  %v917_v48 = vpop.f32.mrf.mxu1 }
 0x108   : >> { %v794_v57 = vadd.f32 %v793_v49, %v774_v54 }
 0x10b   : >> { %v822_v56 = vpop.f32.mrf.mxu2 }
 0x10c   : >> { %v826_v63 = vadd.f32 %v822_v56, %v794_v57 }
 0x10d   : >> { %v1000_v59 = vpop.f32.mrf.mxu3 }
 0x10e   : >> { %v855_v7 = vadd.f32 %v851_v52, %v826_v63 }
 0x10f   : >> { %v887_v60 = vpop.f32.mrf.mxu0  ;;  %v919_v5 = vpop.f32.mrf.mxu1 }
 0x110   : >> { %v892_v61 = vadd.f32 %v887_v60, %v854_v58 }
 0x112   : >> { %v922_v2 = vadd.f32 %v917_v48, %v892_v61 }
 0x113   : >> { %v981_v3 = vpop.f32.mrf.mxu2 }
 0x114   : >> { %v927_v4 = vadd.f32 %v925_v62, %v922_v2  ;;  %v1001_v15 = vadd.f32 %v1000_v59, %v981_v3 }
 0x115   : >> { %v1002_v12 = vpop.f32.mrf.mxu3 }
 0x116   : >> { %vm929_vm12 = vcmp.ge.f32.partialorder %v927_v4, 0.0  ;;  %v931_v6 = vmul.f32 0.2, %v927_v4 }
 0x117   : >> { %v889_v8 = vpop.f32.mrf.mxu0  ;;  %v1049_v17 = vpop.f32.mrf.mxu1 }
 0x118   : >> { %v933_v9 = vsel %vm929_vm12, %v927_v4, %v931_v6  ;;  %v893_v10 = vadd.f32 %v889_v8, %v855_v7 }
 0x119   : >> { %v935_v11 = vpack.c.bf16 %v933_v9, %v933_v9 }
 0x11a   : >> { %v923_v0 = vadd.f32 %v919_v5, %v893_v10 }
 0x11b   : >> { %v983_v13 = vpop.f32.mrf.mxu2  ;;  %940 = vst.msk [vmem:[%s1818_s28] sm:$0xf] %vm172_vm0, %v935_v11 }
 0x11c   : >> { %v928_v14 = vadd.f32 %v925_v62, %v923_v0  ;;  %v1003_v26 = vadd.f32 %v1002_v12, %v983_v13 }
 0x11d   : >> { %v1091_v24 = vpop.f32.mrf.mxu3 }
 0x11e   : >> { %vm930_vm13 = vcmp.ge.f32.partialorder %v928_v14, 0.0  ;;  %v932_v16 = vmul.f32 0.2, %v928_v14 }
 0x11f   : >> { %v1028_v18 = vpop.f32.mrf.mxu0  ;;  %v1051_v31 = vpop.f32.mrf.mxu1 }
 0x120   : >> { %v934_v19 = vsel %vm930_vm13, %v928_v14, %v932_v16  ;;  %v1033_v20 = vadd.f32 %v1028_v18, %v1001_v15 }
 0x121   : >> { %v936_v21 = vpack.c.bf16 %v934_v19, %v934_v19 }
 0x122   : >> { %v1054_v22 = vadd.f32 %v1049_v17, %v1033_v20 }
 0x123   : >> { %v1070_v23 = vpop.f32.mrf.mxu2  ;;  %941 = vst.msk [vmem:[%s1818_s28 + $0x4] sm:$0xf] %vm172_vm0, %v936_v21 }
 0x124   : >> { %v1075_v25 = vadd.f32 %v1070_v23, %v1054_v22 }
 0x125   : >> { %v1093_v36 = vpop.f32.mrf.mxu3 }
 0x126   : >> { %v1096_v27 = vadd.f32 %v1091_v24, %v1075_v25 }
 0x127   : >> { %v1030_v28 = vpop.f32.mrf.mxu0 }
 0x128   : >> { %v1098_v29 = vadd.f32 %v1096_v27, %v925_v62  ;;  %v1034_v30 = vadd.f32 %v1030_v28, %v1003_v26 }
 0x12a   : >> { %vm1100_vm14 = vcmp.ge.f32.partialorder %v1098_v29, 0.0  ;;  %v1102_v32 = vmul.f32 0.2, %v1098_v29  ;;  %v1055_v33 = vadd.f32 %v1051_v31, %v1034_v30 }
 0x12b   : >> { %v1072_v35 = vpop.f32.mrf.mxu2 }
 0x12c   : >> { %v1104_v44 = vsel %vm1100_vm14, %v1098_v29, %v1102_v32  ;;  %v1076_v51 = vadd.f32 %v1072_v35, %v1055_v33 }
 0x12d   : >> { %v1106_v34 = vpack.c.bf16 %v1104_v44, %v1104_v44 }
 0x12e   : >> { %v1097_v37 = vadd.f32 %v1093_v36, %v1076_v51 }
 0x12f   : >> { %1232 = vst.msk [vmem:[%s1818_s28 + $0x8] sm:$0xf] %vm172_vm0, %v1106_v34 }
 0x130   : >> { %v1099_v38 = vadd.f32 %v1097_v37, %v925_v62 }
 0x132   : >> { %vm1101_vm15 = vcmp.ge.f32.partialorder %v1099_v38, 0.0  ;;  %v1103_v39 = vmul.f32 0.2, %v1099_v38 }
 0x133   : > { %706 = sbr.rel (!%p704_p4) target bundleno = 114 (0x72), region = 86 }
 0x134   : >> { %v1105_v40 = vsel %vm1101_vm15, %v1099_v38, %v1103_v39 }
 0x135   : >> { %v1107_v41 = vpack.c.bf16 %v1105_v40, %v1105_v40 }
 0x137   : >> { %1233 = vst.msk [vmem:[%s1818_s28 + $0xc] sm:$0xf] %vm172_vm0, %v1107_v41 }
 0x138 PF: > { %s13_s12 = sadd.s32 1, %s1286_s12  }
 0x139   : > { %p10_p5 = scmp.ge.s32.totalorder %s13_s12, 4  }
 0x13b   :  { %12 = sbr.rel (!%p10_p5) target bundleno = 1 (0x1), region = 97 }

</bundles_post_ra>
